<compile_context>
chip_gen: v7x
topology: tpu7x:2x2x1
jax: 0.10.0
libtpu: 0.0.40
codegen_flags: <defaults>
</compile_context>

<pallas_src>
import jax
import jax.numpy as jnp
from jax.experimental import pallas as pl
from jax.experimental.pallas import tpu as pltpu


def attention_kernel(x_ref,                 # (HWg, TILE_N, g*C) bf16   streamed
                     w1_ref, b1_ref,        # (C, Cr) f32, (1, Cr) f32
                     w2_ref, b2_ref,        # (Cr, C) f32, (1, C) f32
                     wf1_ref,               # (HWg, g*C, F) bf16        resident
                     wf1s_ref,              # (C, F) bf16  (row-sum over HW)
                     bf1_ref,               # (1, F) f32
                     wf2_ref, bf2_ref,      # (F, F) bf16, (1, F) f32
                     out_ref,               # (TILE_N, F) f32
                     sum_ref,               # (TILE_N, C) f32 scratch  (avg pool)
                     max_ref,               # (TILE_N, C) f32 scratch  (max pool)
                     acc_ref):              # (2, TILE_N, F) f32 scratch (dual FC1 acc)
    hw_g = x_ref.shape[0]
    c = sum_ref.shape[1]
    g = x_ref.shape[2] // c
    hw = hw_g * g

    # Accumulators live in VMEM scratch (not fori_loop carries) so the big tile
    # doesn't blow the 64-vreg budget.
    sum_ref[...] = jnp.zeros_like(sum_ref)
    max_ref[...] = jnp.full_like(max_ref, -jnp.inf)
    acc_ref[...] = jnp.zeros_like(acc_ref)

    # Single, fully unrolled pass over the (grouped) spatial axis:
    #   MXU: (TILE_N, g*C) @ (g*C, F) bf16 matmuls (f32 accumulation), with two
    #        interleaved accumulators so consecutive matmuls don't serialize on
    #        the MXU result FIFO (v5e/v6e).
    #   VPU: sum/max pooling over the same x tile; the g packed spatial steps
    #        are split off the lane axis with static 128-lane slices.
    for s in range(hw_g):
        x_s = x_ref[s]                                          # (TILE_N, g*C) bf16
        acc_ref[s % 2] += jnp.dot(x_s, wf1_ref[s],
                                  preferred_element_type=jnp.float32)
        p_sum = x_s[:, 0:c].astype(jnp.float32)
        p_max = x_s[:, 0:c]
        for j in range(1, g):
            x_j = x_s[:, j * c:(j + 1) * c]
            p_sum = p_sum + x_j.astype(jnp.float32)
            p_max = jnp.maximum(p_max, x_j)
        sum_ref[...] += p_sum
        max_ref[...] = jnp.maximum(max_ref[...], p_max.astype(jnp.float32))

    # Adaptive avg/max pool to 1x1, then the tiny squeeze-excite path (f32).
    pooled = sum_ref[...] * (1.0 / hw) + max_ref[...]           # (TILE_N, C)
    h = jnp.dot(pooled, w1_ref[...],
                preferred_element_type=jnp.float32) + b1_ref[...]
    h = jnp.maximum(h, 0.0)                                     # (TILE_N, Cr)
    att = jax.nn.sigmoid(jnp.dot(h, w2_ref[...],
                                 preferred_element_type=jnp.float32)
                         + b2_ref[...])                         # (TILE_N, C)

    # Folded FC1:  flatten(x + att_bcast) @ Wf1 + bf1
    #            = (acc0 + acc1) + att @ rowsum_HW(Wf1) + bf1
    t = (acc_ref[0] + acc_ref[1]
         + jnp.dot(att.astype(jnp.bfloat16), wf1s_ref[...],
                   preferred_element_type=jnp.float32)
         + bf1_ref[...])
    t = jnp.maximum(t, 0.0)                                     # (TILE_N, F)

    # FC2 + ReLU (bf16 operands, f32 accumulation).
    t = jnp.dot(t.astype(jnp.bfloat16), wf2_ref[...],
                preferred_element_type=jnp.float32) + bf2_ref[...]
    out_ref[...] = jnp.maximum(t, 0.0)


def _default_k_group():
    """Pack 2 spatial steps per matmul (K=2C) on 256-deep MXUs (v6e/v7x);
    keep K=C on 128-deep MXUs (v3/v4/v5)."""
    try:
        kind = jax.devices()[0].device_kind.lower()
    except Exception:
        return 2
    if ("v3" in kind) or ("v4" in kind) or ("v5" in kind):
        return 1
    return 2


def attention_forward(x_nchw, params, *, tile_n=128, k_group=None):
    """x_nchw: (N, C, H, W) float32. Returns (N, fc_dim) float32."""
    N, C, H, W = x_nchw.shape
    HW = H * W
    w1t, b1, w2t, b2, wf1t, bf1, wf2t, bf2 = params
    Cr = w1t.shape[1]
    F = wf2t.shape[-1]

    g = _default_k_group() if k_group is None else k_group
    if HW % g != 0:
        g = 1
    HWg = HW // g
    gC = g * C

    # Pad N to whole tiles; keep grid length even (v7x has 2 TensorCores).
    # Padded rows compute harmlessly on zeros and are dropped below.
    n_blocks = pl.cdiv(N, tile_n)
    if n_blocks > 1 and n_blocks % 2 == 1:
        n_blocks += 1
    N_pad = n_blocks * tile_n

    # --- wrapper-side layout plumbing (no compute hoisted out of the kernel) ---
    # Cast to bf16 FIRST so the layout transpose moves half the bytes, then
    # x_g[s2, n, j*C + c] = x[n, c, g*s2 + j]  (spatial-major, lane-dense).
    # TODO(synk): ideally the producer (ROI Align) emits channels-last so this
    # materialized HBM transpose of x disappears entirely.
    x_b = x_nchw.astype(jnp.bfloat16).reshape(N, C, HWg, g)
    x_g = jnp.transpose(x_b, (2, 0, 3, 1)).reshape(HWg, N, gC)
    if N_pad != N:
        x_g = jnp.pad(x_g, ((0, 0), (0, N_pad - N), (0, 0)))

    # fc1 weight regrouped to (HWg, g*C, F) bf16 to match the x lane order, plus
    # its per-channel row-sum (C, F) bf16 for the folded attention term.
    wf1_g = jnp.transpose(wf1t.reshape(C, HWg, g, F),
                          (1, 2, 0, 3)).reshape(HWg, gC, F).astype(jnp.bfloat16)
    wf1_rowsum = jnp.sum(wf1t.reshape(C, HW, F), axis=1).astype(jnp.bfloat16)
    wf2_b = wf2t.astype(jnp.bfloat16)

    # Explicit VMEM budget: double-buffered x/out streams + resident weights
    # (default pipeliner still allocates 2 buffers) + scratch, plus headroom.
    x_block = HWg * tile_n * gC * 2
    out_block = tile_n * F * 4
    weight_bytes = ((HWg * gC * F + C * F + F * F) * 2
                    + (C * Cr + Cr * C + Cr + 2 * C + 2 * F) * 4)
    scratch_bytes = (2 * tile_n * C + 2 * tile_n * F) * 4
    vmem_need = 2 * (x_block + out_block) + 2 * weight_bytes + scratch_bytes
    vmem_limit = int(min(max(int(1.5 * vmem_need) + (2 << 20), 16 << 20), 48 << 20))

    cost = pl.CostEstimate(
        flops=2 * N_pad * (C * HW * F      # FC1 (flatten(x) term)
                           + C * F         # folded attention term
                           + F * F         # FC2
                           + 2 * C * Cr),  # squeeze-excite 1x1 convs
        transcendentals=N_pad * C,         # sigmoid
        bytes_accessed=(x_g.size * 2 + wf1_g.size * 2 + wf1_rowsum.size * 2
                        + wf2_b.size * 2 + (w1t.size + w2t.size) * 4
                        + (b1.size + b2.size + bf1.size + bf2.size) * 4
                        + N_pad * F * 4))

    out = pl.pallas_call(
        attention_kernel,
        out_shape=jax.ShapeDtypeStruct((N_pad, F), jnp.float32),
        grid=(N_pad // tile_n,),
        in_specs=[
            pl.BlockSpec((HWg, tile_n, gC), lambda i: (0, i, 0)),   # x (bf16, streamed)
            pl.BlockSpec((C, Cr), lambda i: (0, 0)),                # fc_1 weight^T
            pl.BlockSpec((1, Cr), lambda i: (0, 0)),                # fc_1 bias
            pl.BlockSpec((Cr, C), lambda i: (0, 0)),                # fc_2 weight^T
            pl.BlockSpec((1, C), lambda i: (0, 0)),                 # fc_2 bias
            pl.BlockSpec((HWg, gC, F), lambda i: (0, 0, 0)),        # fc1 weight (bf16)
            pl.BlockSpec((C, F), lambda i: (0, 0)),                 # fc1 row-sum (bf16)
            pl.BlockSpec((1, F), lambda i: (0, 0)),                 # fc1 bias
            pl.BlockSpec((F, F), lambda i: (0, 0)),                 # fc2 weight (bf16)
            pl.BlockSpec((1, F), lambda i: (0, 0)),                 # fc2 bias
        ],
        out_specs=pl.BlockSpec((tile_n, F), lambda i: (i, 0)),
        scratch_shapes=[
            pltpu.VMEM((tile_n, C), jnp.float32),       # sum pool accumulator
            pltpu.VMEM((tile_n, C), jnp.float32),       # max pool accumulator
            pltpu.VMEM((2, tile_n, F), jnp.float32),    # dual FC1 accumulators
        ],
        compiler_params=pltpu.CompilerParams(
            dimension_semantics=("parallel",),
            vmem_limit_bytes=vmem_limit),
        cost_estimate=cost,
    )(x_g, w1t, b1, w2t, b2, wf1_g, wf1_rowsum, bf1, wf2_b, bf2)

    return out[:N]


def init_params(key, C, H, W, reduction, fc_dim):
    """Deterministic synthetic parameters (PyTorch-like fan-in scaling)."""
    Cr = C // reduction
    chw = C * H * W
    ks = jax.random.split(key, 8)

    def u(k, shape, fan_in):
        bound = 1.0 / jnp.sqrt(fan_in)
        return jax.random.uniform(k, shape, jnp.float32, -bound, bound)

    # 1x1 convs stored pre-transposed so the math is y = x @ W + b.
    w1t = u(ks[0], (C, Cr), C)            # fc_1 weight^T
    b1 = u(ks[1], (1, Cr), C)             # fc_1 bias
    w2t = u(ks[2], (Cr, C), Cr)           # fc_2 weight^T
    b2 = u(ks[3], (1, C), Cr)             # fc_2 bias
    # Linear layers, pre-transposed to (in, out).
    wf1t = u(ks[4], (chw, fc_dim), chw)
    bf1 = u(ks[5], (1, fc_dim), chw)
    wf2t = u(ks[6], (fc_dim, fc_dim), fc_dim)
    bf2 = u(ks[7], (1, fc_dim), fc_dim)
    return (w1t, b1, w2t, b2, wf1t, bf1, wf2t, bf2)


def reference_forward(x_nchw, params):
    """Pure-JAX f32 reference mirroring the PyTorch module."""
    w1t, b1, w2t, b2, wf1t, bf1, wf2t, bf2 = params
    N, C, H, W = x_nchw.shape
    avg = jnp.mean(x_nchw, axis=(2, 3))
    mx = jnp.max(x_nchw, axis=(2, 3))
    pooled = avg + mx
    h = jnp.maximum(pooled @ w1t + b1, 0.0)
    att = jax.nn.sigmoid(h @ w2t + b2)
    y = x_nchw + att[:, :, None, None]
    y = y.reshape(N, -1)
    t = jnp.maximum(y @ wf1t + bf1, 0.0)
    t = jnp.maximum(t @ wf2t + bf2, 0.0)
    return t


if __name__ == "__main__":
    # Small, lane-friendly shapes consistent with the ROI box head.
    # N deliberately not a tile multiple -> exercises the pad + output-mask path.
    N, C, H, W = 200, 128, 4, 4
    reduction = 16          # module default
    fc_dim = 128            # cfg.MODEL.ROI_BOX_HEAD.FC_DIM (NUM_FC = 2)
    # TODO(synk): cfg.MODEL.ROI_BOX_HEAD.NORM is read but unused in forward; nothing to port.

    key = jax.random.PRNGKey(0)
    kx, kp = jax.random.split(key)
    x = jax.random.normal(kx, (N, C, H, W), dtype=jnp.float32)
    params = init_params(kp, C, H, W, reduction, fc_dim)

    out = attention_forward(x, params, tile_n=128)
    out = jax.block_until_ready(out)

    ref = reference_forward(x, params)
    assert out.shape == (N, fc_dim)
    # bf16 x streaming + bf16 MXU operands with f32 accumulation.
    assert jnp.allclose(out, ref, atol=3e-2, rtol=3e-2), "mismatch vs JAX reference"

    print("KERNEL_OK")
</pallas_src>

<mosaic_0001>
module attributes {stable_mosaic.version = 11 : i64} {
  func.func @attention_kernel(%arg0: i32, %arg1: memref<8x128x256xbf16, #tpu.memory_space<vmem>>, %arg2: memref<128x8xf32, #tpu.memory_space<vmem>>, %arg3: memref<1x8xf32, #tpu.memory_space<vmem>>, %arg4: memref<8x128xf32, #tpu.memory_space<vmem>>, %arg5: memref<1x128xf32, #tpu.memory_space<vmem>>, %arg6: memref<8x256x128xbf16, #tpu.memory_space<vmem>>, %arg7: memref<128x128xbf16, #tpu.memory_space<vmem>>, %arg8: memref<1x128xf32, #tpu.memory_space<vmem>>, %arg9: memref<128x128xbf16, #tpu.memory_space<vmem>>, %arg10: memref<1x128xf32, #tpu.memory_space<vmem>>, %arg11: memref<128x128xf32, #tpu.memory_space<vmem>>, %arg12: memref<128x128xf32, #tpu.memory_space<vmem>>, %arg13: memref<128x128xf32, #tpu.memory_space<vmem>>, %arg14: memref<2x128x128xf32, #tpu.memory_space<vmem>>) attributes {dimension_semantics = [#tpu.dimension_semantics<parallel>], iteration_bounds = array<i64: 2>, scalar_prefetch = 0 : i64, scratch_operands = 3 : i64, tpu.core_type = #tpu.core_type<tc>, window_params = [{transform_indices = @transform_0, window_bounds = array<i64: 8, 128, 256>}, {pipeline_mode = #tpu.pipeline_mode<synchronous>, transform_indices = @transform_1, window_bounds = array<i64: 128, 8>}, {pipeline_mode = #tpu.pipeline_mode<synchronous>, transform_indices = @transform_2, window_bounds = array<i64: 1, 8>}, {pipeline_mode = #tpu.pipeline_mode<synchronous>, transform_indices = @transform_3, window_bounds = array<i64: 8, 128>}, {pipeline_mode = #tpu.pipeline_mode<synchronous>, transform_indices = @transform_4, window_bounds = array<i64: 1, 128>}, {pipeline_mode = #tpu.pipeline_mode<synchronous>, transform_indices = @transform_5, window_bounds = array<i64: 8, 256, 128>}, {pipeline_mode = #tpu.pipeline_mode<synchronous>, transform_indices = @transform_6, window_bounds = array<i64: 128, 128>}, {pipeline_mode = #tpu.pipeline_mode<synchronous>, transform_indices = @transform_7, window_bounds = array<i64: 1, 128>}, {pipeline_mode = #tpu.pipeline_mode<synchronous>, transform_indices = @transform_8, window_bounds = array<i64: 128, 128>}, {pipeline_mode = #tpu.pipeline_mode<synchronous>, transform_indices = @transform_9, window_bounds = array<i64: 1, 128>}, {transform_indices = @transform_10, window_bounds = array<i64: 128, 128>}]} {
    %cst = arith.constant 0.000000e+00 : f32
    %0 = vector.broadcast %cst : f32 to vector<128x128xf32>
    %c0 = arith.constant 0 : index
    %c0_0 = arith.constant 0 : index
    %1 = vector.load %arg12[%c0, %c0_0] : memref<128x128xf32, #tpu.memory_space<vmem>>, vector<128x128xf32>
    tpu.vector_store %arg12[%c0, %c0_0], %0 {strides = array<i32>} : memref<128x128xf32, #tpu.memory_space<vmem>>, vector<128x128xf32>,
    %cst_1 = arith.constant 0xFF800000 : f32
    %2 = vector.broadcast %cst_1 : f32 to vector<128x128xf32>
    %c0_2 = arith.constant 0 : index
    %c0_3 = arith.constant 0 : index
    %3 = vector.load %arg13[%c0_2, %c0_3] : memref<128x128xf32, #tpu.memory_space<vmem>>, vector<128x128xf32>
    tpu.vector_store %arg13[%c0_2, %c0_3], %2 {strides = array<i32>} : memref<128x128xf32, #tpu.memory_space<vmem>>, vector<128x128xf32>,
    %cst_4 = arith.constant 0.000000e+00 : f32
    %4 = vector.broadcast %cst_4 : f32 to vector<2x128x128xf32>
    %c0_5 = arith.constant 0 : index
    %c0_6 = arith.constant 0 : index
    %c0_7 = arith.constant 0 : index
    %5 = vector.load %arg14[%c0_5, %c0_6, %c0_7] : memref<2x128x128xf32, #tpu.memory_space<vmem>>, vector<2x128x128xf32>
    tpu.vector_store %arg14[%c0_5, %c0_6, %c0_7], %4 {strides = array<i32>} : memref<2x128x128xf32, #tpu.memory_space<vmem>>, vector<2x128x128xf32>,
    %c0_8 = arith.constant 0 : index
    %c0_9 = arith.constant 0 : index
    %c0_10 = arith.constant 0 : index
    %6 = vector.load %arg1[%c0_8, %c0_9, %c0_10] : memref<8x128x256xbf16, #tpu.memory_space<vmem>>, vector<1x128x256xbf16>
    %7 = vector.shape_cast %6 : vector<1x128x256xbf16> to vector<128x256xbf16>
    %c0_11 = arith.constant 0 : index
    %c0_12 = arith.constant 0 : index
    %c0_13 = arith.constant 0 : index
    %8 = vector.load %arg14[%c0_11, %c0_12, %c0_13] : memref<2x128x128xf32, #tpu.memory_space<vmem>>, vector<1x128x128xf32>
    %9 = vector.shape_cast %8 : vector<1x128x128xf32> to vector<128x128xf32>
    %c0_14 = arith.constant 0 : index
    %c0_15 = arith.constant 0 : index
    %c0_16 = arith.constant 0 : index
    %10 = vector.load %arg6[%c0_14, %c0_15, %c0_16] : memref<8x256x128xbf16, #tpu.memory_space<vmem>>, vector<1x256x128xbf16>
    %11 = vector.shape_cast %10 : vector<1x256x128xbf16> to vector<256x128xbf16>
    %cst_17 = arith.constant dense<0.000000e+00> : vector<128x128xf32>
    %12 = tpu.matmul %7, %11, %cst_17 {dimension_numbers = #tpu.dot_dimension_numbers<[1], [0], [0], [1], [0, 0, 1, 1], [], []>} : vector<128x256xbf16>, vector<256x128xbf16>, vector<128x128xf32> -> vector<128x128xf32>
    %13 = arith.addf %9, %12 : vector<128x128xf32>
    %c0_18 = arith.constant 0 : index
    %c0_19 = arith.constant 0 : index
    %c0_20 = arith.constant 0 : index
    %14 = vector.load %arg14[%c0_18, %c0_19, %c0_20] : memref<2x128x128xf32, #tpu.memory_space<vmem>>, vector<1x128x128xf32>
    %15 = vector.shape_cast %14 : vector<1x128x128xf32> to vector<128x128xf32>
    %16 = vector.shape_cast %13 : vector<128x128xf32> to vector<1x128x128xf32>
    tpu.vector_store %arg14[%c0_18, %c0_19, %c0_20], %16 {strides = array<i32>} : memref<2x128x128xf32, #tpu.memory_space<vmem>>, vector<1x128x128xf32>,
    %17 = vector.extract_strided_slice %7 {offsets = [0, 0], sizes = [128, 128], strides = [1, 1]} : vector<128x256xbf16> to vector<128x128xbf16>
    %18 = arith.extf %17 : vector<128x128xbf16> to vector<128x128xf32>
    %19 = vector.extract_strided_slice %7 {offsets = [0, 0], sizes = [128, 128], strides = [1, 1]} : vector<128x256xbf16> to vector<128x128xbf16>
    %20 = vector.extract_strided_slice %7 {offsets = [0, 128], sizes = [128, 128], strides = [1, 1]} : vector<128x256xbf16> to vector<128x128xbf16>
    %21 = arith.extf %20 : vector<128x128xbf16> to vector<128x128xf32>
    %22 = arith.addf %18, %21 : vector<128x128xf32>
    %23 = arith.maximumf %19, %20 : vector<128x128xbf16>
    %c0_21 = arith.constant 0 : index
    %c0_22 = arith.constant 0 : index
    %24 = vector.load %arg12[%c0_21, %c0_22] : memref<128x128xf32, #tpu.memory_space<vmem>>, vector<128x128xf32>
    %25 = arith.addf %24, %22 : vector<128x128xf32>
    %c0_23 = arith.constant 0 : index
    %c0_24 = arith.constant 0 : index
    %26 = vector.load %arg12[%c0_23, %c0_24] : memref<128x128xf32, #tpu.memory_space<vmem>>, vector<128x128xf32>
    tpu.vector_store %arg12[%c0_23, %c0_24], %25 {strides = array<i32>} : memref<128x128xf32, #tpu.memory_space<vmem>>, vector<128x128xf32>,
    %c0_25 = arith.constant 0 : index
    %c0_26 = arith.constant 0 : index
    %27 = vector.load %arg13[%c0_25, %c0_26] : memref<128x128xf32, #tpu.memory_space<vmem>>, vector<128x128xf32>
    %28 = arith.extf %23 : vector<128x128xbf16> to vector<128x128xf32>
    %29 = arith.maximumf %27, %28 : vector<128x128xf32>
    %c0_27 = arith.constant 0 : index
    %c0_28 = arith.constant 0 : index
    %30 = vector.load %arg13[%c0_27, %c0_28] : memref<128x128xf32, #tpu.memory_space<vmem>>, vector<128x128xf32>
    tpu.vector_store %arg13[%c0_27, %c0_28], %29 {strides = array<i32>} : memref<128x128xf32, #tpu.memory_space<vmem>>, vector<128x128xf32>,
    %c1 = arith.constant 1 : index
    %c0_29 = arith.constant 0 : index
    %c0_30 = arith.constant 0 : index
    %31 = vector.load %arg1[%c1, %c0_29, %c0_30] : memref<8x128x256xbf16, #tpu.memory_space<vmem>>, vector<1x128x256xbf16>
    %32 = vector.shape_cast %31 : vector<1x128x256xbf16> to vector<128x256xbf16>
    %c1_31 = arith.constant 1 : index
    %c0_32 = arith.constant 0 : index
    %c0_33 = arith.constant 0 : index
    %33 = vector.load %arg14[%c1_31, %c0_32, %c0_33] : memref<2x128x128xf32, #tpu.memory_space<vmem>>, vector<1x128x128xf32>
    %34 = vector.shape_cast %33 : vector<1x128x128xf32> to vector<128x128xf32>
    %c1_34 = arith.constant 1 : index
    %c0_35 = arith.constant 0 : index
    %c0_36 = arith.constant 0 : index
    %35 = vector.load %arg6[%c1_34, %c0_35, %c0_36] : memref<8x256x128xbf16, #tpu.memory_space<vmem>>, vector<1x256x128xbf16>
    %36 = vector.shape_cast %35 : vector<1x256x128xbf16> to vector<256x128xbf16>
    %cst_37 = arith.constant dense<0.000000e+00> : vector<128x128xf32>
    %37 = tpu.matmul %32, %36, %cst_37 {dimension_numbers = #tpu.dot_dimension_numbers<[1], [0], [0], [1], [0, 0, 1, 1], [], []>} : vector<128x256xbf16>, vector<256x128xbf16>, vector<128x128xf32> -> vector<128x128xf32>
    %38 = arith.addf %34, %37 : vector<128x128xf32>
    %c1_38 = arith.constant 1 : index
    %c0_39 = arith.constant 0 : index
    %c0_40 = arith.constant 0 : index
    %39 = vector.load %arg14[%c1_38, %c0_39, %c0_40] : memref<2x128x128xf32, #tpu.memory_space<vmem>>, vector<1x128x128xf32>
    %40 = vector.shape_cast %39 : vector<1x128x128xf32> to vector<128x128xf32>
    %41 = vector.shape_cast %38 : vector<128x128xf32> to vector<1x128x128xf32>
    tpu.vector_store %arg14[%c1_38, %c0_39, %c0_40], %41 {strides = array<i32>} : memref<2x128x128xf32, #tpu.memory_space<vmem>>, vector<1x128x128xf32>,
    %42 = vector.extract_strided_slice %32 {offsets = [0, 0], sizes = [128, 128], strides = [1, 1]} : vector<128x256xbf16> to vector<128x128xbf16>
    %43 = arith.extf %42 : vector<128x128xbf16> to vector<128x128xf32>
    %44 = vector.extract_strided_slice %32 {offsets = [0, 0], sizes = [128, 128], strides = [1, 1]} : vector<128x256xbf16> to vector<128x128xbf16>
    %45 = vector.extract_strided_slice %32 {offsets = [0, 128], sizes = [128, 128], strides = [1, 1]} : vector<128x256xbf16> to vector<128x128xbf16>
    %46 = arith.extf %45 : vector<128x128xbf16> to vector<128x128xf32>
    %47 = arith.addf %43, %46 : vector<128x128xf32>
    %48 = arith.maximumf %44, %45 : vector<128x128xbf16>
    %c0_41 = arith.constant 0 : index
    %c0_42 = arith.constant 0 : index
    %49 = vector.load %arg12[%c0_41, %c0_42] : memref<128x128xf32, #tpu.memory_space<vmem>>, vector<128x128xf32>
    %50 = arith.addf %49, %47 : vector<128x128xf32>
    %c0_43 = arith.constant 0 : index
    %c0_44 = arith.constant 0 : index
    %51 = vector.load %arg12[%c0_43, %c0_44] : memref<128x128xf32, #tpu.memory_space<vmem>>, vector<128x128xf32>
    tpu.vector_store %arg12[%c0_43, %c0_44], %50 {strides = array<i32>} : memref<128x128xf32, #tpu.memory_space<vmem>>, vector<128x128xf32>,
    %c0_45 = arith.constant 0 : index
    %c0_46 = arith.constant 0 : index
    %52 = vector.load %arg13[%c0_45, %c0_46] : memref<128x128xf32, #tpu.memory_space<vmem>>, vector<128x128xf32>
    %53 = arith.extf %48 : vector<128x128xbf16> to vector<128x128xf32>
    %54 = arith.maximumf %52, %53 : vector<128x128xf32>
    %c0_47 = arith.constant 0 : index
    %c0_48 = arith.constant 0 : index
    %55 = vector.load %arg13[%c0_47, %c0_48] : memref<128x128xf32, #tpu.memory_space<vmem>>, vector<128x128xf32>
    tpu.vector_store %arg13[%c0_47, %c0_48], %54 {strides = array<i32>} : memref<128x128xf32, #tpu.memory_space<vmem>>, vector<128x128xf32>,
    %c2 = arith.constant 2 : index
    %c0_49 = arith.constant 0 : index
    %c0_50 = arith.constant 0 : index
    %56 = vector.load %arg1[%c2, %c0_49, %c0_50] : memref<8x128x256xbf16, #tpu.memory_space<vmem>>, vector<1x128x256xbf16>
    %57 = vector.shape_cast %56 : vector<1x128x256xbf16> to vector<128x256xbf16>
    %c0_51 = arith.constant 0 : index
    %c0_52 = arith.constant 0 : index
    %c0_53 = arith.constant 0 : index
    %58 = vector.load %arg14[%c0_51, %c0_52, %c0_53] : memref<2x128x128xf32, #tpu.memory_space<vmem>>, vector<1x128x128xf32>
    %59 = vector.shape_cast %58 : vector<1x128x128xf32> to vector<128x128xf32>
    %c2_54 = arith.constant 2 : index
    %c0_55 = arith.constant 0 : index
    %c0_56 = arith.constant 0 : index
    %60 = vector.load %arg6[%c2_54, %c0_55, %c0_56] : memref<8x256x128xbf16, #tpu.memory_space<vmem>>, vector<1x256x128xbf16>
    %61 = vector.shape_cast %60 : vector<1x256x128xbf16> to vector<256x128xbf16>
    %cst_57 = arith.constant dense<0.000000e+00> : vector<128x128xf32>
    %62 = tpu.matmul %57, %61, %cst_57 {dimension_numbers = #tpu.dot_dimension_numbers<[1], [0], [0], [1], [0, 0, 1, 1], [], []>} : vector<128x256xbf16>, vector<256x128xbf16>, vector<128x128xf32> -> vector<128x128xf32>
    %63 = arith.addf %59, %62 : vector<128x128xf32>
    %c0_58 = arith.constant 0 : index
    %c0_59 = arith.constant 0 : index
    %c0_60 = arith.constant 0 : index
    %64 = vector.load %arg14[%c0_58, %c0_59, %c0_60] : memref<2x128x128xf32, #tpu.memory_space<vmem>>, vector<1x128x128xf32>
    %65 = vector.shape_cast %64 : vector<1x128x128xf32> to vector<128x128xf32>
    %66 = vector.shape_cast %63 : vector<128x128xf32> to vector<1x128x128xf32>
    tpu.vector_store %arg14[%c0_58, %c0_59, %c0_60], %66 {strides = array<i32>} : memref<2x128x128xf32, #tpu.memory_space<vmem>>, vector<1x128x128xf32>,
    %67 = vector.extract_strided_slice %57 {offsets = [0, 0], sizes = [128, 128], strides = [1, 1]} : vector<128x256xbf16> to vector<128x128xbf16>
    %68 = arith.extf %67 : vector<128x128xbf16> to vector<128x128xf32>
    %69 = vector.extract_strided_slice %57 {offsets = [0, 0], sizes = [128, 128], strides = [1, 1]} : vector<128x256xbf16> to vector<128x128xbf16>
    %70 = vector.extract_strided_slice %57 {offsets = [0, 128], sizes = [128, 128], strides = [1, 1]} : vector<128x256xbf16> to vector<128x128xbf16>
    %71 = arith.extf %70 : vector<128x128xbf16> to vector<128x128xf32>
    %72 = arith.addf %68, %71 : vector<128x128xf32>
    %73 = arith.maximumf %69, %70 : vector<128x128xbf16>
    %c0_61 = arith.constant 0 : index
    %c0_62 = arith.constant 0 : index
    %74 = vector.load %arg12[%c0_61, %c0_62] : memref<128x128xf32, #tpu.memory_space<vmem>>, vector<128x128xf32>
    %75 = arith.addf %74, %72 : vector<128x128xf32>
    %c0_63 = arith.constant 0 : index
    %c0_64 = arith.constant 0 : index
    %76 = vector.load %arg12[%c0_63, %c0_64] : memref<128x128xf32, #tpu.memory_space<vmem>>, vector<128x128xf32>
    tpu.vector_store %arg12[%c0_63, %c0_64], %75 {strides = array<i32>} : memref<128x128xf32, #tpu.memory_space<vmem>>, vector<128x128xf32>,
    %c0_65 = arith.constant 0 : index
    %c0_66 = arith.constant 0 : index
    %77 = vector.load %arg13[%c0_65, %c0_66] : memref<128x128xf32, #tpu.memory_space<vmem>>, vector<128x128xf32>
    %78 = arith.extf %73 : vector<128x128xbf16> to vector<128x128xf32>
    %79 = arith.maximumf %77, %78 : vector<128x128xf32>
    %c0_67 = arith.constant 0 : index
    %c0_68 = arith.constant 0 : index
    %80 = vector.load %arg13[%c0_67, %c0_68] : memref<128x128xf32, #tpu.memory_space<vmem>>, vector<128x128xf32>
    tpu.vector_store %arg13[%c0_67, %c0_68], %79 {strides = array<i32>} : memref<128x128xf32, #tpu.memory_space<vmem>>, vector<128x128xf32>,
    %c3 = arith.constant 3 : index
    %c0_69 = arith.constant 0 : index
    %c0_70 = arith.constant 0 : index
    %81 = vector.load %arg1[%c3, %c0_69, %c0_70] : memref<8x128x256xbf16, #tpu.memory_space<vmem>>, vector<1x128x256xbf16>
    %82 = vector.shape_cast %81 : vector<1x128x256xbf16> to vector<128x256xbf16>
    %c1_71 = arith.constant 1 : index
    %c0_72 = arith.constant 0 : index
    %c0_73 = arith.constant 0 : index
    %83 = vector.load %arg14[%c1_71, %c0_72, %c0_73] : memref<2x128x128xf32, #tpu.memory_space<vmem>>, vector<1x128x128xf32>
    %84 = vector.shape_cast %83 : vector<1x128x128xf32> to vector<128x128xf32>
    %c3_74 = arith.constant 3 : index
    %c0_75 = arith.constant 0 : index
    %c0_76 = arith.constant 0 : index
    %85 = vector.load %arg6[%c3_74, %c0_75, %c0_76] : memref<8x256x128xbf16, #tpu.memory_space<vmem>>, vector<1x256x128xbf16>
    %86 = vector.shape_cast %85 : vector<1x256x128xbf16> to vector<256x128xbf16>
    %cst_77 = arith.constant dense<0.000000e+00> : vector<128x128xf32>
    %87 = tpu.matmul %82, %86, %cst_77 {dimension_numbers = #tpu.dot_dimension_numbers<[1], [0], [0], [1], [0, 0, 1, 1], [], []>} : vector<128x256xbf16>, vector<256x128xbf16>, vector<128x128xf32> -> vector<128x128xf32>
    %88 = arith.addf %84, %87 : vector<128x128xf32>
    %c1_78 = arith.constant 1 : index
    %c0_79 = arith.constant 0 : index
    %c0_80 = arith.constant 0 : index
    %89 = vector.load %arg14[%c1_78, %c0_79, %c0_80] : memref<2x128x128xf32, #tpu.memory_space<vmem>>, vector<1x128x128xf32>
    %90 = vector.shape_cast %89 : vector<1x128x128xf32> to vector<128x128xf32>
    %91 = vector.shape_cast %88 : vector<128x128xf32> to vector<1x128x128xf32>
    tpu.vector_store %arg14[%c1_78, %c0_79, %c0_80], %91 {strides = array<i32>} : memref<2x128x128xf32, #tpu.memory_space<vmem>>, vector<1x128x128xf32>,
    %92 = vector.extract_strided_slice %82 {offsets = [0, 0], sizes = [128, 128], strides = [1, 1]} : vector<128x256xbf16> to vector<128x128xbf16>
    %93 = arith.extf %92 : vector<128x128xbf16> to vector<128x128xf32>
    %94 = vector.extract_strided_slice %82 {offsets = [0, 0], sizes = [128, 128], strides = [1, 1]} : vector<128x256xbf16> to vector<128x128xbf16>
    %95 = vector.extract_strided_slice %82 {offsets = [0, 128], sizes = [128, 128], strides = [1, 1]} : vector<128x256xbf16> to vector<128x128xbf16>
    %96 = arith.extf %95 : vector<128x128xbf16> to vector<128x128xf32>
    %97 = arith.addf %93, %96 : vector<128x128xf32>
    %98 = arith.maximumf %94, %95 : vector<128x128xbf16>
    %c0_81 = arith.constant 0 : index
    %c0_82 = arith.constant 0 : index
    %99 = vector.load %arg12[%c0_81, %c0_82] : memref<128x128xf32, #tpu.memory_space<vmem>>, vector<128x128xf32>
    %100 = arith.addf %99, %97 : vector<128x128xf32>
    %c0_83 = arith.constant 0 : index
    %c0_84 = arith.constant 0 : index
    %101 = vector.load %arg12[%c0_83, %c0_84] : memref<128x128xf32, #tpu.memory_space<vmem>>, vector<128x128xf32>
    tpu.vector_store %arg12[%c0_83, %c0_84], %100 {strides = array<i32>} : memref<128x128xf32, #tpu.memory_space<vmem>>, vector<128x128xf32>,
    %c0_85 = arith.constant 0 : index
    %c0_86 = arith.constant 0 : index
    %102 = vector.load %arg13[%c0_85, %c0_86] : memref<128x128xf32, #tpu.memory_space<vmem>>, vector<128x128xf32>
    %103 = arith.extf %98 : vector<128x128xbf16> to vector<128x128xf32>
    %104 = arith.maximumf %102, %103 : vector<128x128xf32>
    %c0_87 = arith.constant 0 : index
    %c0_88 = arith.constant 0 : index
    %105 = vector.load %arg13[%c0_87, %c0_88] : memref<128x128xf32, #tpu.memory_space<vmem>>, vector<128x128xf32>
    tpu.vector_store %arg13[%c0_87, %c0_88], %104 {strides = array<i32>} : memref<128x128xf32, #tpu.memory_space<vmem>>, vector<128x128xf32>,
    %c4 = arith.constant 4 : index
    %c0_89 = arith.constant 0 : index
    %c0_90 = arith.constant 0 : index
    %106 = vector.load %arg1[%c4, %c0_89, %c0_90] : memref<8x128x256xbf16, #tpu.memory_space<vmem>>, vector<1x128x256xbf16>
    %107 = vector.shape_cast %106 : vector<1x128x256xbf16> to vector<128x256xbf16>
    %c0_91 = arith.constant 0 : index
    %c0_92 = arith.constant 0 : index
    %c0_93 = arith.constant 0 : index
    %108 = vector.load %arg14[%c0_91, %c0_92, %c0_93] : memref<2x128x128xf32, #tpu.memory_space<vmem>>, vector<1x128x128xf32>
    %109 = vector.shape_cast %108 : vector<1x128x128xf32> to vector<128x128xf32>
    %c4_94 = arith.constant 4 : index
    %c0_95 = arith.constant 0 : index
    %c0_96 = arith.constant 0 : index
    %110 = vector.load %arg6[%c4_94, %c0_95, %c0_96] : memref<8x256x128xbf16, #tpu.memory_space<vmem>>, vector<1x256x128xbf16>
    %111 = vector.shape_cast %110 : vector<1x256x128xbf16> to vector<256x128xbf16>
    %cst_97 = arith.constant dense<0.000000e+00> : vector<128x128xf32>
    %112 = tpu.matmul %107, %111, %cst_97 {dimension_numbers = #tpu.dot_dimension_numbers<[1], [0], [0], [1], [0, 0, 1, 1], [], []>} : vector<128x256xbf16>, vector<256x128xbf16>, vector<128x128xf32> -> vector<128x128xf32>
    %113 = arith.addf %109, %112 : vector<128x128xf32>
    %c0_98 = arith.constant 0 : index
    %c0_99 = arith.constant 0 : index
    %c0_100 = arith.constant 0 : index
    %114 = vector.load %arg14[%c0_98, %c0_99, %c0_100] : memref<2x128x128xf32, #tpu.memory_space<vmem>>, vector<1x128x128xf32>
    %115 = vector.shape_cast %114 : vector<1x128x128xf32> to vector<128x128xf32>
    %116 = vector.shape_cast %113 : vector<128x128xf32> to vector<1x128x128xf32>
    tpu.vector_store %arg14[%c0_98, %c0_99, %c0_100], %116 {strides = array<i32>} : memref<2x128x128xf32, #tpu.memory_space<vmem>>, vector<1x128x128xf32>,
    %117 = vector.extract_strided_slice %107 {offsets = [0, 0], sizes = [128, 128], strides = [1, 1]} : vector<128x256xbf16> to vector<128x128xbf16>
    %118 = arith.extf %117 : vector<128x128xbf16> to vector<128x128xf32>
    %119 = vector.extract_strided_slice %107 {offsets = [0, 0], sizes = [128, 128], strides = [1, 1]} : vector<128x256xbf16> to vector<128x128xbf16>
    %120 = vector.extract_strided_slice %107 {offsets = [0, 128], sizes = [128, 128], strides = [1, 1]} : vector<128x256xbf16> to vector<128x128xbf16>
    %121 = arith.extf %120 : vector<128x128xbf16> to vector<128x128xf32>
    %122 = arith.addf %118, %121 : vector<128x128xf32>
    %123 = arith.maximumf %119, %120 : vector<128x128xbf16>
    %c0_101 = arith.constant 0 : index
    %c0_102 = arith.constant 0 : index
    %124 = vector.load %arg12[%c0_101, %c0_102] : memref<128x128xf32, #tpu.memory_space<vmem>>, vector<128x128xf32>
    %125 = arith.addf %124, %122 : vector<128x128xf32>
    %c0_103 = arith.constant 0 : index
    %c0_104 = arith.constant 0 : index
    %126 = vector.load %arg12[%c0_103, %c0_104] : memref<128x128xf32, #tpu.memory_space<vmem>>, vector<128x128xf32>
    tpu.vector_store %arg12[%c0_103, %c0_104], %125 {strides = array<i32>} : memref<128x128xf32, #tpu.memory_space<vmem>>, vector<128x128xf32>,
    %c0_105 = arith.constant 0 : index
    %c0_106 = arith.constant 0 : index
    %127 = vector.load %arg13[%c0_105, %c0_106] : memref<128x128xf32, #tpu.memory_space<vmem>>, vector<128x128xf32>
    %128 = arith.extf %123 : vector<128x128xbf16> to vector<128x128xf32>
    %129 = arith.maximumf %127, %128 : vector<128x128xf32>
    %c0_107 = arith.constant 0 : index
    %c0_108 = arith.constant 0 : index
    %130 = vector.load %arg13[%c0_107, %c0_108] : memref<128x128xf32, #tpu.memory_space<vmem>>, vector<128x128xf32>
    tpu.vector_store %arg13[%c0_107, %c0_108], %129 {strides = array<i32>} : memref<128x128xf32, #tpu.memory_space<vmem>>, vector<128x128xf32>,
    %c5 = arith.constant 5 : index
    %c0_109 = arith.constant 0 : index
    %c0_110 = arith.constant 0 : index
    %131 = vector.load %arg1[%c5, %c0_109, %c0_110] : memref<8x128x256xbf16, #tpu.memory_space<vmem>>, vector<1x128x256xbf16>
    %132 = vector.shape_cast %131 : vector<1x128x256xbf16> to vector<128x256xbf16>
    %c1_111 = arith.constant 1 : index
    %c0_112 = arith.constant 0 : index
    %c0_113 = arith.constant 0 : index
    %133 = vector.load %arg14[%c1_111, %c0_112, %c0_113] : memref<2x128x128xf32, #tpu.memory_space<vmem>>, vector<1x128x128xf32>
    %134 = vector.shape_cast %133 : vector<1x128x128xf32> to vector<128x128xf32>
    %c5_114 = arith.constant 5 : index
    %c0_115 = arith.constant 0 : index
    %c0_116 = arith.constant 0 : index
    %135 = vector.load %arg6[%c5_114, %c0_115, %c0_116] : memref<8x256x128xbf16, #tpu.memory_space<vmem>>, vector<1x256x128xbf16>
    %136 = vector.shape_cast %135 : vector<1x256x128xbf16> to vector<256x128xbf16>
    %cst_117 = arith.constant dense<0.000000e+00> : vector<128x128xf32>
    %137 = tpu.matmul %132, %136, %cst_117 {dimension_numbers = #tpu.dot_dimension_numbers<[1], [0], [0], [1], [0, 0, 1, 1], [], []>} : vector<128x256xbf16>, vector<256x128xbf16>, vector<128x128xf32> -> vector<128x128xf32>
    %138 = arith.addf %134, %137 : vector<128x128xf32>
    %c1_118 = arith.constant 1 : index
    %c0_119 = arith.constant 0 : index
    %c0_120 = arith.constant 0 : index
    %139 = vector.load %arg14[%c1_118, %c0_119, %c0_120] : memref<2x128x128xf32, #tpu.memory_space<vmem>>, vector<1x128x128xf32>
    %140 = vector.shape_cast %139 : vector<1x128x128xf32> to vector<128x128xf32>
    %141 = vector.shape_cast %138 : vector<128x128xf32> to vector<1x128x128xf32>
    tpu.vector_store %arg14[%c1_118, %c0_119, %c0_120], %141 {strides = array<i32>} : memref<2x128x128xf32, #tpu.memory_space<vmem>>, vector<1x128x128xf32>,
    %142 = vector.extract_strided_slice %132 {offsets = [0, 0], sizes = [128, 128], strides = [1, 1]} : vector<128x256xbf16> to vector<128x128xbf16>
    %143 = arith.extf %142 : vector<128x128xbf16> to vector<128x128xf32>
    %144 = vector.extract_strided_slice %132 {offsets = [0, 0], sizes = [128, 128], strides = [1, 1]} : vector<128x256xbf16> to vector<128x128xbf16>
    %145 = vector.extract_strided_slice %132 {offsets = [0, 128], sizes = [128, 128], strides = [1, 1]} : vector<128x256xbf16> to vector<128x128xbf16>
    %146 = arith.extf %145 : vector<128x128xbf16> to vector<128x128xf32>
    %147 = arith.addf %143, %146 : vector<128x128xf32>
    %148 = arith.maximumf %144, %145 : vector<128x128xbf16>
    %c0_121 = arith.constant 0 : index
    %c0_122 = arith.constant 0 : index
    %149 = vector.load %arg12[%c0_121, %c0_122] : memref<128x128xf32, #tpu.memory_space<vmem>>, vector<128x128xf32>
    %150 = arith.addf %149, %147 : vector<128x128xf32>
    %c0_123 = arith.constant 0 : index
    %c0_124 = arith.constant 0 : index
    %151 = vector.load %arg12[%c0_123, %c0_124] : memref<128x128xf32, #tpu.memory_space<vmem>>, vector<128x128xf32>
    tpu.vector_store %arg12[%c0_123, %c0_124], %150 {strides = array<i32>} : memref<128x128xf32, #tpu.memory_space<vmem>>, vector<128x128xf32>,
    %c0_125 = arith.constant 0 : index
    %c0_126 = arith.constant 0 : index
    %152 = vector.load %arg13[%c0_125, %c0_126] : memref<128x128xf32, #tpu.memory_space<vmem>>, vector<128x128xf32>
    %153 = arith.extf %148 : vector<128x128xbf16> to vector<128x128xf32>
    %154 = arith.maximumf %152, %153 : vector<128x128xf32>
    %c0_127 = arith.constant 0 : index
    %c0_128 = arith.constant 0 : index
    %155 = vector.load %arg13[%c0_127, %c0_128] : memref<128x128xf32, #tpu.memory_space<vmem>>, vector<128x128xf32>
    tpu.vector_store %arg13[%c0_127, %c0_128], %154 {strides = array<i32>} : memref<128x128xf32, #tpu.memory_space<vmem>>, vector<128x128xf32>,
    %c6 = arith.constant 6 : index
    %c0_129 = arith.constant 0 : index
    %c0_130 = arith.constant 0 : index
    %156 = vector.load %arg1[%c6, %c0_129, %c0_130] : memref<8x128x256xbf16, #tpu.memory_space<vmem>>, vector<1x128x256xbf16>
    %157 = vector.shape_cast %156 : vector<1x128x256xbf16> to vector<128x256xbf16>
    %c0_131 = arith.constant 0 : index
    %c0_132 = arith.constant 0 : index
    %c0_133 = arith.constant 0 : index
    %158 = vector.load %arg14[%c0_131, %c0_132, %c0_133] : memref<2x128x128xf32, #tpu.memory_space<vmem>>, vector<1x128x128xf32>
    %159 = vector.shape_cast %158 : vector<1x128x128xf32> to vector<128x128xf32>
    %c6_134 = arith.constant 6 : index
    %c0_135 = arith.constant 0 : index
    %c0_136 = arith.constant 0 : index
    %160 = vector.load %arg6[%c6_134, %c0_135, %c0_136] : memref<8x256x128xbf16, #tpu.memory_space<vmem>>, vector<1x256x128xbf16>
    %161 = vector.shape_cast %160 : vector<1x256x128xbf16> to vector<256x128xbf16>
    %cst_137 = arith.constant dense<0.000000e+00> : vector<128x128xf32>
    %162 = tpu.matmul %157, %161, %cst_137 {dimension_numbers = #tpu.dot_dimension_numbers<[1], [0], [0], [1], [0, 0, 1, 1], [], []>} : vector<128x256xbf16>, vector<256x128xbf16>, vector<128x128xf32> -> vector<128x128xf32>
    %163 = arith.addf %159, %162 : vector<128x128xf32>
    %c0_138 = arith.constant 0 : index
    %c0_139 = arith.constant 0 : index
    %c0_140 = arith.constant 0 : index
    %164 = vector.load %arg14[%c0_138, %c0_139, %c0_140] : memref<2x128x128xf32, #tpu.memory_space<vmem>>, vector<1x128x128xf32>
    %165 = vector.shape_cast %164 : vector<1x128x128xf32> to vector<128x128xf32>
    %166 = vector.shape_cast %163 : vector<128x128xf32> to vector<1x128x128xf32>
    tpu.vector_store %arg14[%c0_138, %c0_139, %c0_140], %166 {strides = array<i32>} : memref<2x128x128xf32, #tpu.memory_space<vmem>>, vector<1x128x128xf32>,
    %167 = vector.extract_strided_slice %157 {offsets = [0, 0], sizes = [128, 128], strides = [1, 1]} : vector<128x256xbf16> to vector<128x128xbf16>
    %168 = arith.extf %167 : vector<128x128xbf16> to vector<128x128xf32>
    %169 = vector.extract_strided_slice %157 {offsets = [0, 0], sizes = [128, 128], strides = [1, 1]} : vector<128x256xbf16> to vector<128x128xbf16>
    %170 = vector.extract_strided_slice %157 {offsets = [0, 128], sizes = [128, 128], strides = [1, 1]} : vector<128x256xbf16> to vector<128x128xbf16>
    %171 = arith.extf %170 : vector<128x128xbf16> to vector<128x128xf32>
    %172 = arith.addf %168, %171 : vector<128x128xf32>
    %173 = arith.maximumf %169, %170 : vector<128x128xbf16>
    %c0_141 = arith.constant 0 : index
    %c0_142 = arith.constant 0 : index
    %174 = vector.load %arg12[%c0_141, %c0_142] : memref<128x128xf32, #tpu.memory_space<vmem>>, vector<128x128xf32>
    %175 = arith.addf %174, %172 : vector<128x128xf32>
    %c0_143 = arith.constant 0 : index
    %c0_144 = arith.constant 0 : index
    %176 = vector.load %arg12[%c0_143, %c0_144] : memref<128x128xf32, #tpu.memory_space<vmem>>, vector<128x128xf32>
    tpu.vector_store %arg12[%c0_143, %c0_144], %175 {strides = array<i32>} : memref<128x128xf32, #tpu.memory_space<vmem>>, vector<128x128xf32>,
    %c0_145 = arith.constant 0 : index
    %c0_146 = arith.constant 0 : index
    %177 = vector.load %arg13[%c0_145, %c0_146] : memref<128x128xf32, #tpu.memory_space<vmem>>, vector<128x128xf32>
    %178 = arith.extf %173 : vector<128x128xbf16> to vector<128x128xf32>
    %179 = arith.maximumf %177, %178 : vector<128x128xf32>
    %c0_147 = arith.constant 0 : index
    %c0_148 = arith.constant 0 : index
    %180 = vector.load %arg13[%c0_147, %c0_148] : memref<128x128xf32, #tpu.memory_space<vmem>>, vector<128x128xf32>
    tpu.vector_store %arg13[%c0_147, %c0_148], %179 {strides = array<i32>} : memref<128x128xf32, #tpu.memory_space<vmem>>, vector<128x128xf32>,
    %c7 = arith.constant 7 : index
    %c0_149 = arith.constant 0 : index
    %c0_150 = arith.constant 0 : index
    %181 = vector.load %arg1[%c7, %c0_149, %c0_150] : memref<8x128x256xbf16, #tpu.memory_space<vmem>>, vector<1x128x256xbf16>
    %182 = vector.shape_cast %181 : vector<1x128x256xbf16> to vector<128x256xbf16>
    %c1_151 = arith.constant 1 : index
    %c0_152 = arith.constant 0 : index
    %c0_153 = arith.constant 0 : index
    %183 = vector.load %arg14[%c1_151, %c0_152, %c0_153] : memref<2x128x128xf32, #tpu.memory_space<vmem>>, vector<1x128x128xf32>
    %184 = vector.shape_cast %183 : vector<1x128x128xf32> to vector<128x128xf32>
    %c7_154 = arith.constant 7 : index
    %c0_155 = arith.constant 0 : index
    %c0_156 = arith.constant 0 : index
    %185 = vector.load %arg6[%c7_154, %c0_155, %c0_156] : memref<8x256x128xbf16, #tpu.memory_space<vmem>>, vector<1x256x128xbf16>
    %186 = vector.shape_cast %185 : vector<1x256x128xbf16> to vector<256x128xbf16>
    %cst_157 = arith.constant dense<0.000000e+00> : vector<128x128xf32>
    %187 = tpu.matmul %182, %186, %cst_157 {dimension_numbers = #tpu.dot_dimension_numbers<[1], [0], [0], [1], [0, 0, 1, 1], [], []>} : vector<128x256xbf16>, vector<256x128xbf16>, vector<128x128xf32> -> vector<128x128xf32>
    %188 = arith.addf %184, %187 : vector<128x128xf32>
    %c1_158 = arith.constant 1 : index
    %c0_159 = arith.constant 0 : index
    %c0_160 = arith.constant 0 : index
    %189 = vector.load %arg14[%c1_158, %c0_159, %c0_160] : memref<2x128x128xf32, #tpu.memory_space<vmem>>, vector<1x128x128xf32>
    %190 = vector.shape_cast %189 : vector<1x128x128xf32> to vector<128x128xf32>
    %191 = vector.shape_cast %188 : vector<128x128xf32> to vector<1x128x128xf32>
    tpu.vector_store %arg14[%c1_158, %c0_159, %c0_160], %191 {strides = array<i32>} : memref<2x128x128xf32, #tpu.memory_space<vmem>>, vector<1x128x128xf32>,
    %192 = vector.extract_strided_slice %182 {offsets = [0, 0], sizes = [128, 128], strides = [1, 1]} : vector<128x256xbf16> to vector<128x128xbf16>
    %193 = arith.extf %192 : vector<128x128xbf16> to vector<128x128xf32>
    %194 = vector.extract_strided_slice %182 {offsets = [0, 0], sizes = [128, 128], strides = [1, 1]} : vector<128x256xbf16> to vector<128x128xbf16>
    %195 = vector.extract_strided_slice %182 {offsets = [0, 128], sizes = [128, 128], strides = [1, 1]} : vector<128x256xbf16> to vector<128x128xbf16>
    %196 = arith.extf %195 : vector<128x128xbf16> to vector<128x128xf32>
    %197 = arith.addf %193, %196 : vector<128x128xf32>
    %198 = arith.maximumf %194, %195 : vector<128x128xbf16>
    %c0_161 = arith.constant 0 : index
    %c0_162 = arith.constant 0 : index
    %199 = vector.load %arg12[%c0_161, %c0_162] : memref<128x128xf32, #tpu.memory_space<vmem>>, vector<128x128xf32>
    %200 = arith.addf %199, %197 : vector<128x128xf32>
    %c0_163 = arith.constant 0 : index
    %c0_164 = arith.constant 0 : index
    %201 = vector.load %arg12[%c0_163, %c0_164] : memref<128x128xf32, #tpu.memory_space<vmem>>, vector<128x128xf32>
    tpu.vector_store %arg12[%c0_163, %c0_164], %200 {strides = array<i32>} : memref<128x128xf32, #tpu.memory_space<vmem>>, vector<128x128xf32>,
    %c0_165 = arith.constant 0 : index
    %c0_166 = arith.constant 0 : index
    %202 = vector.load %arg13[%c0_165, %c0_166] : memref<128x128xf32, #tpu.memory_space<vmem>>, vector<128x128xf32>
    %203 = arith.extf %198 : vector<128x128xbf16> to vector<128x128xf32>
    %204 = arith.maximumf %202, %203 : vector<128x128xf32>
    %c0_167 = arith.constant 0 : index
    %c0_168 = arith.constant 0 : index
    %205 = vector.load %arg13[%c0_167, %c0_168] : memref<128x128xf32, #tpu.memory_space<vmem>>, vector<128x128xf32>
    tpu.vector_store %arg13[%c0_167, %c0_168], %204 {strides = array<i32>} : memref<128x128xf32, #tpu.memory_space<vmem>>, vector<128x128xf32>,
    %c0_169 = arith.constant 0 : index
    %c0_170 = arith.constant 0 : index
    %206 = vector.load %arg12[%c0_169, %c0_170] : memref<128x128xf32, #tpu.memory_space<vmem>>, vector<128x128xf32>
    %cst_171 = arith.constant 6.250000e-02 : f32
    %207 = vector.broadcast %cst_171 : f32 to vector<128x128xf32>
    %208 = arith.mulf %206, %207 : vector<128x128xf32>
    %c0_172 = arith.constant 0 : index
    %c0_173 = arith.constant 0 : index
    %209 = vector.load %arg13[%c0_172, %c0_173] : memref<128x128xf32, #tpu.memory_space<vmem>>, vector<128x128xf32>
    %210 = arith.addf %208, %209 : vector<128x128xf32>
    %c0_174 = arith.constant 0 : index
    %c0_175 = arith.constant 0 : index
    %211 = vector.load %arg2[%c0_174, %c0_175] : memref<128x8xf32, #tpu.memory_space<vmem>>, vector<128x8xf32>
    %cst_176 = arith.constant dense<0.000000e+00> : vector<128x8xf32>
    %212 = tpu.matmul %210, %211, %cst_176 {dimension_numbers = #tpu.dot_dimension_numbers<[1], [0], [0], [1], [0, 0, 1, 1], [], []>} : vector<128x128xf32>, vector<128x8xf32>, vector<128x8xf32> -> vector<128x8xf32>
    %c0_177 = arith.constant 0 : index
    %c0_178 = arith.constant 0 : index
    %213 = vector.load %arg3[%c0_177, %c0_178] : memref<1x8xf32, #tpu.memory_space<vmem>>, vector<1x8xf32>
    %214 = vector.broadcast %213 : vector<1x8xf32> to vector<128x8xf32>
    %215 = arith.addf %212, %214 : vector<128x8xf32>
    %cst_179 = arith.constant 0.000000e+00 : f32
    %216 = vector.broadcast %cst_179 : f32 to vector<128x8xf32>
    %217 = arith.maximumf %215, %216 : vector<128x8xf32>
    %c0_180 = arith.constant 0 : index
    %c0_181 = arith.constant 0 : index
    %218 = vector.load %arg4[%c0_180, %c0_181] : memref<8x128xf32, #tpu.memory_space<vmem>>, vector<8x128xf32>
    %cst_182 = arith.constant dense<0.000000e+00> : vector<128x128xf32>
    %219 = tpu.matmul %217, %218, %cst_182 {dimension_numbers = #tpu.dot_dimension_numbers<[1], [0], [0], [1], [0, 0, 1, 1], [], []>} : vector<128x8xf32>, vector<8x128xf32>, vector<128x128xf32> -> vector<128x128xf32>
    %c0_183 = arith.constant 0 : index
    %c0_184 = arith.constant 0 : index
    %220 = vector.load %arg5[%c0_183, %c0_184] : memref<1x128xf32, #tpu.memory_space<vmem>>, vector<1x128xf32>
    %221 = vector.broadcast %220 : vector<1x128xf32> to vector<128x128xf32>
    %222 = arith.addf %219, %221 : vector<128x128xf32>
    %223 = arith.negf %222 : vector<128x128xf32>
    %224 = math.exp %223 : vector<128x128xf32>
    %cst_185 = arith.constant 1.000000e+00 : f32
    %225 = vector.broadcast %cst_185 : f32 to vector<128x128xf32>
    %226 = arith.addf %225, %224 : vector<128x128xf32>
    %227 = arith.divf %225, %226 : vector<128x128xf32>
    %c0_186 = arith.constant 0 : index
    %c0_187 = arith.constant 0 : index
    %c0_188 = arith.constant 0 : index
    %228 = vector.load %arg14[%c0_186, %c0_187, %c0_188] : memref<2x128x128xf32, #tpu.memory_space<vmem>>, vector<1x128x128xf32>
    %229 = vector.shape_cast %228 : vector<1x128x128xf32> to vector<128x128xf32>
    %c1_189 = arith.constant 1 : index
    %c0_190 = arith.constant 0 : index
    %c0_191 = arith.constant 0 : index
    %230 = vector.load %arg14[%c1_189, %c0_190, %c0_191] : memref<2x128x128xf32, #tpu.memory_space<vmem>>, vector<1x128x128xf32>
    %231 = vector.shape_cast %230 : vector<1x128x128xf32> to vector<128x128xf32>
    %232 = arith.addf %229, %231 : vector<128x128xf32>
    %233 = arith.truncf %227 : vector<128x128xf32> to vector<128x128xbf16>
    %c0_192 = arith.constant 0 : index
    %c0_193 = arith.constant 0 : index
    %234 = vector.load %arg7[%c0_192, %c0_193] : memref<128x128xbf16, #tpu.memory_space<vmem>>, vector<128x128xbf16>
    %cst_194 = arith.constant dense<0.000000e+00> : vector<128x128xf32>
    %235 = tpu.matmul %233, %234, %cst_194 {dimension_numbers = #tpu.dot_dimension_numbers<[1], [0], [0], [1], [0, 0, 1, 1], [], []>} : vector<128x128xbf16>, vector<128x128xbf16>, vector<128x128xf32> -> vector<128x128xf32>
    %236 = arith.addf %232, %235 : vector<128x128xf32>
    %c0_195 = arith.constant 0 : index
    %c0_196 = arith.constant 0 : index
    %237 = vector.load %arg8[%c0_195, %c0_196] : memref<1x128xf32, #tpu.memory_space<vmem>>, vector<1x128xf32>
    %238 = vector.broadcast %237 : vector<1x128xf32> to vector<128x128xf32>
    %239 = arith.addf %236, %238 : vector<128x128xf32>
    %cst_197 = arith.constant 0.000000e+00 : f32
    %240 = vector.broadcast %cst_197 : f32 to vector<128x128xf32>
    %241 = arith.maximumf %239, %240 : vector<128x128xf32>
    %242 = arith.truncf %241 : vector<128x128xf32> to vector<128x128xbf16>
    %c0_198 = arith.constant 0 : index
    %c0_199 = arith.constant 0 : index
    %243 = vector.load %arg9[%c0_198, %c0_199] : memref<128x128xbf16, #tpu.memory_space<vmem>>, vector<128x128xbf16>
    %cst_200 = arith.constant dense<0.000000e+00> : vector<128x128xf32>
    %244 = tpu.matmul %242, %243, %cst_200 {dimension_numbers = #tpu.dot_dimension_numbers<[1], [0], [0], [1], [0, 0, 1, 1], [], []>} : vector<128x128xbf16>, vector<128x128xbf16>, vector<128x128xf32> -> vector<128x128xf32>
    %c0_201 = arith.constant 0 : index
    %c0_202 = arith.constant 0 : index
    %245 = vector.load %arg10[%c0_201, %c0_202] : memref<1x128xf32, #tpu.memory_space<vmem>>, vector<1x128xf32>
    %246 = vector.broadcast %245 : vector<1x128xf32> to vector<128x128xf32>
    %247 = arith.addf %244, %246 : vector<128x128xf32>
    %cst_203 = arith.constant 0.000000e+00 : f32
    %248 = vector.broadcast %cst_203 : f32 to vector<128x128xf32>
    %249 = arith.maximumf %247, %248 : vector<128x128xf32>
    %c0_204 = arith.constant 0 : index
    %c0_205 = arith.constant 0 : index
    %250 = vector.load %arg11[%c0_204, %c0_205] : memref<128x128xf32, #tpu.memory_space<vmem>>, vector<128x128xf32>
    tpu.vector_store %arg11[%c0_204, %c0_205], %249 {strides = array<i32>} : memref<128x128xf32, #tpu.memory_space<vmem>>, vector<128x128xf32>,
    return
  }
  func.func @transform_0(%arg0: i32) -> (i32, i32, i32) {
    %c0_i32 = arith.constant 0 : i32
    %c0_i32_0 = arith.constant 0 : i32
    %c0_i32_1 = arith.constant 0 : i32
    return %c0_i32, %arg0, %c0_i32_0 : i32, i32, i32
  }
  func.func @transform_1(%arg0: i32) -> (i32, i32) {
    %c0_i32 = arith.constant 0 : i32
    %c0_i32_0 = arith.constant 0 : i32
    %c0_i32_1 = arith.constant 0 : i32
    return %c0_i32, %c0_i32_0 : i32, i32
  }
  func.func @transform_2(%arg0: i32) -> (i32, i32) {
    %c0_i32 = arith.constant 0 : i32
    %c0_i32_0 = arith.constant 0 : i32
    %c0_i32_1 = arith.constant 0 : i32
    return %c0_i32, %c0_i32_0 : i32, i32
  }
  func.func @transform_3(%arg0: i32) -> (i32, i32) {
    %c0_i32 = arith.constant 0 : i32
    %c0_i32_0 = arith.constant 0 : i32
    %c0_i32_1 = arith.constant 0 : i32
    return %c0_i32, %c0_i32_0 : i32, i32
  }
  func.func @transform_4(%arg0: i32) -> (i32, i32) {
    %c0_i32 = arith.constant 0 : i32
    %c0_i32_0 = arith.constant 0 : i32
    %c0_i32_1 = arith.constant 0 : i32
    return %c0_i32, %c0_i32_0 : i32, i32
  }
  func.func @transform_5(%arg0: i32) -> (i32, i32, i32) {
    %c0_i32 = arith.constant 0 : i32
    %c0_i32_0 = arith.constant 0 : i32
    %c0_i32_1 = arith.constant 0 : i32
    %c0_i32_2 = arith.constant 0 : i32
    return %c0_i32, %c0_i32_0, %c0_i32_1 : i32, i32, i32
  }
  func.func @transform_6(%arg0: i32) -> (i32, i32) {
    %c0_i32 = arith.constant 0 : i32
    %c0_i32_0 = arith.constant 0 : i32
    %c0_i32_1 = arith.constant 0 : i32
    return %c0_i32, %c0_i32_0 : i32, i32
  }
  func.func @transform_7(%arg0: i32) -> (i32, i32) {
    %c0_i32 = arith.constant 0 : i32
    %c0_i32_0 = arith.constant 0 : i32
    %c0_i32_1 = arith.constant 0 : i32
    return %c0_i32, %c0_i32_0 : i32, i32
  }
  func.func @transform_8(%arg0: i32) -> (i32, i32) {
    %c0_i32 = arith.constant 0 : i32
    %c0_i32_0 = arith.constant 0 : i32
    %c0_i32_1 = arith.constant 0 : i32
    return %c0_i32, %c0_i32_0 : i32, i32
  }
  func.func @transform_9(%arg0: i32) -> (i32, i32) {
    %c0_i32 = arith.constant 0 : i32
    %c0_i32_0 = arith.constant 0 : i32
    %c0_i32_1 = arith.constant 0 : i32
    return %c0_i32, %c0_i32_0 : i32, i32
  }
  func.func @transform_10(%arg0: i32) -> (i32, i32) {
    %c0_i32 = arith.constant 0 : i32
    %c0_i32_0 = arith.constant 0 : i32
    return %arg0, %c0_i32 : i32, i32
  }
}

</mosaic_0001>

<bundles_post_ra>
// kernel: tpu_custom_call.1
= control target key start
LH: loop header
LB: loop body
LE: loop exit
PB: predicated region body
PF: predicated region fallthrough
CT: control target
= control target key end

     0   :  { %s10672_s0 = inlined_call_operand.hbm [shape: bf16[8,256,256], index: 0, kind: input, shape index: {}]   ;;  %s10673_s1 = inlined_call_operand.vmem [shape: f32[128,8], index: 1, kind: input, shape index: {}]   ;;  %s10674_s2 = inlined_call_operand.vmem [shape: f32[1,8], index: 2, kind: input, shape index: {}]   ;;  %s10675_s3 = inlined_call_operand.vmem [shape: f32[8,128], index: 3, kind: input, shape index: {}]   ;;  %s10676_s4 = inlined_call_operand.vmem [shape: f32[1,128], index: 4, kind: input, shape index: {}]   ;;  %s10677_s5 = inlined_call_operand.hbm [shape: bf16[8,256,128], index: 5, kind: input, shape index: {}]   ;;  %s10678_s6 = inlined_call_operand.vmem [shape: bf16[128,128], index: 6, kind: input, shape index: {}]   ;;  %s10679_s7 = inlined_call_operand.vmem [shape: f32[1,128], index: 7, kind: input, shape index: {}]   ;;  %s10680_s8 = inlined_call_operand.vmem [shape: bf16[128,128], index: 8, kind: input, shape index: {}]   ;;  %s10681_s9 = inlined_call_operand.vmem [shape: f32[1,128], index: 9, kind: input, shape index: {}]   ;;  %s10682_s10 = inlined_call_operand.hbm [shape: f32[256,128], index: 10, kind: output, shape index: {}]  }
   0x1   :  { %10841 = sst [smem:[#allocation159_spill]] %s10677_s5 }
   0x2   :  { %15 = vsyncpa [#allocation6], 0 }
   0x3   :  { %17 = vsyncpa [#allocation6 + $0x1], 0 }
   0x4   :  { %18 = vsyncpa [#allocation9], 0 }
   0x5   :  { %19 = vsyncpa [#allocation7], 0 }
   0x6   :  { %21 = vsyncpa [#allocation7 + $0x1], 0  ;;  %s8074_s13 = smov 0   ;;  %s8076_s14 = smov 0  }
   0x7   :  { %s8078_s15 = smov 0   ;;  %s8080_s16 = smov 0  }
   0x8 LB: > { %10842 = sst [smem:[#allocation17_spill]] %s8001_s15  ;;  %s8095_s17 = sadd.s32 4294967295, %s8005_s16   ;;  %s8005_s16 = sphi %s8080_s16, %s11399_s16   ;;  %s8001_s15 = sphi %s8078_s15, %s11401_s15   ;;  %s7997_s14 = sphi %s8076_s14, %s11403_s14   ;;  %s7993_s13 = sphi %s8074_s13, %s11402_s13  }
   0x9   : > { %10843 = sst [smem:[#allocation18_spill]] %s8005_s16  ;;  %s6240_s18 = sadd.s32 4294967294, %s8005_s16  }
   0xa   : > { %s8099_s19 = sadd.s32 1, %s8005_s16   ;;  %s34_s20 = sadd.s32 1, %s8001_s15 }
   0xb   : > { %10844 = sst [smem:[#allocation19_spill]] %s8099_s19  ;;  %s31_s21 = ssub.s32 %s8005_s16, %s8099_s19 }
   0xc   : > { %p41_p0 = scmp.ne.s32.totalorder %s8001_s15, %s7997_s14  ;;  %p32_p1 = scmp.eq.s32.totalorder %s31_s21, 0 }
   0xd   : > { %p42_p2 = scmp.eq.s32.totalorder %s8005_s16, 0  ;;  %p47_p3 = scmp.ne.s32.totalorder %s7997_s14, %s7993_s13 }
   0xe   : > { %p10685_p4 = scmp.eq.s32.totalorder %s8095_s17, 0  ;;  %p260_p7 = scmp.eq.s32.totalorder %s8095_s17, 1 }
   0xf   : > { %s8111_s22 = scalar_select %p32_p1, %s8001_s15, %s34_s20  }
  0x10   : > { %p8113_p5 = por %p42_p2, %p41_p0  ;;  %p8119_p6 = por %p10685_p4, %p47_p3 }
  0x11   : > { %10845 = sst [smem:[#allocation20_spill]] %s8111_s22  ;;  %p266_p8 = scmp.eq.s32.totalorder %s6240_s18, 1 }
  0x12   : > { %s10846_s23 = scalar_select %p8113_p5, 1, 0 }
  0x13   : > { %s10847_s24 = scalar_select %p8119_p6, 1, 0 }
  0x14   : > { %p6241_p9 = scmp.ge.s32.totalorder %s8005_s16, 1  ;;  %p273_p10 = scmp.lt.s32.totalorder %s8005_s16, 3 }
  0x15   : > { %p8126_p11 = por %p260_p7, %p41_p0  ;;  %p8130_p12 = por %p266_p8, %p47_p3 }
  0x16   : > { %p8134_p13 = pnand %p6241_p9, %p273_p10  ;;  %s8007_s28 = smov [#allocation8]  }
  0x17   : > { %s10848_s25 = scalar_select %p8126_p11, 1, 0 }
  0x18   : > { %s10849_s26 = scalar_select %p8130_p12, 1, 0 }
  0x19   : > { %s10851_s27 = scalar_select %p8134_p13, 1, 0 }
  0x1a   : > { %10850 = sst [smem:[#allocation21_spill]] %s10849_s26  ;;  %p7468_p1 = pneg %p8134_p13 }
  0x1b   : > { %s297_s29 = sshll.u32 %s8007_s28, 4  ;;  %s10853_s5 = sld [smem:[#allocation159_spill]]  ;;  %s298_s29 = int_to_ptr.vmem [resolvable:$true] %s297_s29 }
  0x1c   : > { %p8142_p2 = pnand %p7468_p1, %p10685_p4 }
  0x1e   : > { %p7909_p3 = pneg %p8142_p2 }
  0x21   : > { %s7907_s18 = scalar_lea.hbm %s10853_s5, 16384 }
  0x22   : > { %p7908_p0 = scmp.ne.s32.totalorder %s10853_s5, %s7907_s18  ;;  %p7914_p9 = scmp.lt.u32.totalorder %s7907_s18, %s10853_s5 }
  0x24   : > { %p7910_p7 = pnand %p7909_p3, %p7908_p0 }
  0x26   : > { %p7911_p8 = pneg %p7910_p7 }
  0x28   : > { %p7916_p10 = pnand %p7914_p9, %p7911_p8 }
  0x2a   : > { %7919 = shalt.err (!%p7916_p10)
}
  0x2b   : > { %s7920_s19 = scalar_lea.vmem %s298_s29, 16384  ;;  %p7928_p11 = scmp.lt.s32.totalorder %s298_s29, %s298_s29 }
  0x2c   : > { %p7921_p1 = scmp.ne.s32.totalorder %s298_s29, %s7920_s19  ;;  %p7929_p6 = scmp.lt.s32.totalorder %s7920_s19, %s7920_s19 }
  0x2e   : > { %p7923_p4 = pnand %p7921_p1, %p7909_p3  ;;  %p7930_p13 = por %p7929_p6, %p7928_p11 }
  0x30   : > { %p7924_p12 = pneg %p7923_p4 }
  0x32   : > { %p7931_p5 = pnand %p7930_p13, %p7924_p12 }
  0x34   : > { %7934 = shalt.err (!%p7931_p5)
}
  0x35   : > { %s8008_s11 = smov 64   ;;  %s8009_s12 = smov 4  }
  0x36   : > { %7471 = dma.hbm_to_vmem [thread:$0]  (!%p8142_p2), %s10853_s5, 16384, %s298_s29, [#allocation9], %s8008_s11, %s8008_s11, %s8009_s12  }
  0x37   : > { %p6243_p0 = scmp.ge.s32.totalorder %s8005_s16, 2 }
  0x39   : > { %319 = sbr.rel (%p6243_p0) target bundleno = 79 (0x4f), region = 52 }
  0x40   : > { %s323_s19 = sand.u32 1, %s8001_s15   ;;  %s6680_s22 = sshll.u32 %s8005_s16, 11 }
  0x41   : > { %s6244_s30 = sshll.u32 %s323_s19, 10  ;;  %s334_s29 = scalar_lea.hbm %s10672_s0, %s6680_s22 }
  0x42   : > { %p10854_p4 = scmp.ne.s32.totalorder %s10846_s23, 0  ;;  %s327_s12 = scalar_lea.vmem [#allocation5], %s6244_s30 }
  0x43   : > { %s347_s20 = sshll.u32 %s327_s12, 4  ;;  %s8010_s5 = smov 4096   ;;  %s348_s20 = int_to_ptr.vmem [resolvable:$true] %s347_s20 }
  0x44   : > { %s7455_s11 = scalar_select %p10854_p4, [#allocation0], [#allocation13] }
  0x45   : > { %7456 = sst [smem:[#allocation12]] (%p10854_p4), %s8010_s5  ;;  %s8011_s15 = smov 2048  }
  0x46   : > { %s339_s21 = sld [smem:[%s7455_s11]]   ;;  %s8012_s16 = smov 16  }
  0x47   : > { %7457 = sst [smem:[#allocation12 + $0x1]] (%p10854_p4), %s8011_s15  ;;  %s8013_s26 = smov 128  }
  0x48   : > { %7458 = sst [smem:[#allocation12 + $0x2]] (%p10854_p4), %s8012_s16  ;;  %s8014_s30 = smov 8  }
  0x49   : > { %7459 = sst [smem:[#allocation12 + $0x3]] (%p10854_p4), %s8013_s26  ;;  %s324_s28 = scalar_lea.sflag [#allocation6], %s323_s19 }
  0x4a   : > { %7460 = sst [smem:[#allocation12 + $0x4]] (%p10854_p4), %s8013_s26  ;;  %s8015_s11 = smov [#allocation11]  }
  0x4b   : > { %7461 = sst [smem:[#allocation12 + $0x5]] (%p10854_p4), %s8014_s30 }
  0x4c   : > { %s6248_s22 = sshll.u32 %s339_s21, 26 }
  0x4d   : > { %s6249_s18 = sadd.s32 134217728, %s6248_s22 }
  0x4e   : > { %7462 = dma.general (%p10854_p4), %s334_s29, 16384, %s348_s20, %s324_s28, %s8015_s11, [#allocation12], %s6249_s18, 0  }
  0x4f PF: > { %p10855_p5 = scmp.ne.s32.totalorder %s10851_s27, 0 }
  0x51   : > { %372 = sbr.rel (%p10855_p5) target bundleno = 1395 (0x573), region = 60 }
  0x58   : > { %s8189_s5 = sand.u32 1, %s7997_s14   ;;  %p10856_p6 = scmp.ne.s32.totalorder %s10847_s24, 0 }
  0x59   : > { %s6251_s15 = sshll.u32 %s8189_s5, 10  ;;  %s375_s16 = scalar_lea.sflag [#allocation6], %s8189_s5 }
  0x5a   : > { %s8193_s26 = scalar_lea.vmem [#allocation5], %s6251_s15 }
  0x5b   : > { %7980 = dma.done.wait (%p10856_p6), %s375_s16, 16384  }
  0x5c   : > { %7982 = vsyncadd (%p10856_p6), %s375_s16, 4294950912  ;;  %p10857_p11 = scmp.eq.s32.totalorder %s8095_s17, 0 }
  0x5e   : > { %7984 = dma.done.wait (%p10857_p11), [#allocation9], 16384   ;;  %p10858_p12 = pmov %p10857_p11 }
  0x5f   : > { %v7522_v0 = vld [vmem:[#allocation8 + $0x40] sm:$0xff]   ;;  %v7526_v4 = vld [vmem:[#allocation8 + $0x48] sm:$0xff]   ;;  %v7530_v8 = vld [vmem:[#allocation8 + $0x50] sm:$0xff]   ;;  %vm5373_vm0 = vcmask 64512   ;;  %s6253_s28 = sshll.u32 %s8189_s5, 7  ;;  %s6681_s15 = sshll.u32 %s8095_s17, 11 }
  0x60   : > { %7986 = vsyncadd (%p10858_p12), [#allocation9], 4294950912  ;;  %v7523_v1 = vld [vmem:[#allocation8 + $0xc0] sm:$0xff]   ;;  %6682 = vmatprep.subr.bf16.mxu0 %v7522_v0  ;;  %v7527_v5 = vld [vmem:[#allocation8 + $0xc8] sm:$0xff]   ;;  %s10603_s11 = scalar_lea.vmem [#allocation10], %s6253_s28  ;;  %s10623_s27 = scalar_lea.hbm %s10682_s10, %s6681_s15 }
  0x61   : > { %v7524_v2 = vld [vmem:[#allocation8] sm:$0xff]   ;;  %6746 = vmatprep.subr.bf16.mxu1 %v7523_v1  ;;  %v7528_v6 = vld [vmem:[#allocation8 + $0x8] sm:$0xff]   ;;  %v7531_v9 = vld [vmem:[#allocation8 + $0xd0] sm:$0xff]   ;;  %s6157_s16 = sshll.u32 %s10603_s11, 4  ;;  %s6144_s17 = scalar_lea.sflag [#allocation7], %s8189_s5  ;;  %s10625_s16 = int_to_ptr.vmem [resolvable:$true] %s6157_s16 }
  0x62   : > { %v7525_v3 = vld [vmem:[#allocation8 + $0x80] sm:$0xff]   ;;  %6683 = vmatpush3.bf16.msra.mxu0 %v7524_v2  ;;  %v7529_v7 = vld [vmem:[#allocation8 + $0x88] sm:$0xff]   ;;  %v7532_v10 = vld [vmem:[#allocation8 + $0x10] sm:$0xff]   ;;  %s7935_s19 = scalar_lea.vmem %s10625_s16, 2048  ;;  %p11395_p2 = scmp.ne.s32.totalorder %s10848_s25, 0 }
  0x63   : > { %6747 = vmatpush3.bf16.msra.mxu1 %v7525_v3  ;;  %6684 = vmatprep.subr.bf16.mxu0 %v7526_v4  ;;  %v7533_v11 = vld [vmem:[#allocation8 + $0x90] sm:$0xff]   ;;  %v7534_v12 = vld [vmem:[#allocation8 + $0x58] sm:$0xff]   ;;  %v7538_v16 = vld [vmem:[#allocation8 + $0x60] sm:$0xff]   ;;  %p7936_p13 = scmp.ne.s32.totalorder %s10625_s16, %s7935_s19 }
  0x64   : > { %6748 = vmatprep.subr.bf16.mxu1 %v7527_v5  ;;  %v7535_v13 = vld [vmem:[#allocation8 + $0xd8] sm:$0xff]   ;;  %v7539_v17 = vld [vmem:[#allocation8 + $0xe0] sm:$0xff]   ;;  %v7542_v20 = vld [vmem:[#allocation8 + $0x68] sm:$0xff]  }
  0x65   : > { %v7536_v14 = vld [vmem:[#allocation8 + $0x18] sm:$0xff]   ;;  %v7540_v18 = vld [vmem:[#allocation8 + $0x20] sm:$0xff]   ;;  %v7543_v21 = vld [vmem:[#allocation8 + $0xe8] sm:$0xff]   ;;  %p7937_p3 = pnand %p7936_p13, %p11395_p2 }
  0x66   : > { %6685 = vmatpush3.bf16.msra.mxu0 %v7528_v6  ;;  %v7537_v15 = vld [vmem:[#allocation8 + $0x98] sm:$0xff]   ;;  %v7541_v19 = vld [vmem:[#allocation8 + $0xa0] sm:$0xff]   ;;  %v7544_v22 = vld [vmem:[#allocation8 + $0x28] sm:$0xff]  }
  0x67   : > { %6749 = vmatpush3.bf16.msra.mxu1 %v7529_v7  ;;  %6686 = vmatprep.subr.bf16.mxu0 %v7530_v8  ;;  %v7545_v23 = vld [vmem:[#allocation8 + $0xa8] sm:$0xff]   ;;  %v7546_v24 = vld [vmem:[#allocation8 + $0x70] sm:$0xff]   ;;  %v7550_v28 = vld [vmem:[#allocation8 + $0x78] sm:$0xff]   ;;  %p7938_p7 = pneg %p7937_p3 }
  0x68   : > { %6750 = vmatprep.subr.bf16.mxu1 %v7531_v9  ;;  %v7547_v25 = vld [vmem:[#allocation8 + $0xf0] sm:$0xff]   ;;  %v7551_v29 = vld [vmem:[#allocation8 + $0xf8] sm:$0xff]   ;;  %v486_v32 = vld [vmem:[%s8193_s26] sm:$0xff] }
  0x69   : > { %v7548_v26 = vld [vmem:[#allocation8 + $0x30] sm:$0xff]   ;;  %v7552_v30 = vld [vmem:[#allocation8 + $0x38] sm:$0xff]   ;;  %v487_v33 = vld [vmem:[%s8193_s26 + $0x8] sm:$0xff]  ;;  %v855_v36 = vunpack.c.l.bf16 %v486_v32  ;;  %v871_v38 = vrot.slane %v486_v32, 4 }
  0x6a   : > { %6687 = vmatpush3.bf16.msra.mxu0 %v7532_v10  ;;  %v7549_v27 = vld [vmem:[#allocation8 + $0xb0] sm:$0xff]   ;;  %v7553_v31 = vld [vmem:[#allocation8 + $0xb8] sm:$0xff]   ;;  %v6286_v34 = vld [vmem:[%s8193_s26 + $0x80] sm:$0xff]  ;;  %v6255_v35 = vcombine.high %v486_v32, %v487_v33  ;;  %v856_v37 = vunpack.c.l.bf16 %v487_v33  ;;  %v872_v40 = vrot.slane %v487_v33, 4  ;;  %v6254_v52 = vcombine.low %v486_v32, %v487_v33 }
  0x6b   : > { %6751 = vmatpush3.bf16.msra.mxu1 %v7533_v11  ;;  %6688 = vmatprep.subr.bf16.mxu0 %v7534_v12  ;;  %v6287_v39 = vld [vmem:[%s8193_s26 + $0x88] sm:$0xff]  ;;  %v1435_v42 = vunpack.c.l.bf16 %v6286_v34  ;;  %v7558_v44 = vld [vmem:[#allocation8 + $0x140] sm:$0xff]   ;;  %v903_v45 = vunpack.c.l.bf16 %v871_v38  ;;  %v935_v46 = vmax.bf16 %v871_v38, %v486_v32  ;;  %v1451_v47 = vrot.slane %v6286_v34, 4  ;;  %v8208_v54 = vld [vmem:[%s8193_s26 + $0x10] sm:$0xff] }
  0x6c   : > { %6752 = vmatprep.subr.bf16.mxu1 %v7535_v13  ;;  %v6303_v41 = vcombine.high %v6286_v34, %v6287_v39  ;;  %v1436_v43 = vunpack.c.l.bf16 %v6287_v39  ;;  %758 = vmatprep.mubr.bf16.mxu0 %v6255_v35  ;;  %v1452_v48 = vrot.slane %v6287_v39, 4  ;;  %v7559_v49 = vld [vmem:[#allocation8 + $0x100] sm:$0xff]   ;;  %v904_v50 = vunpack.c.l.bf16 %v872_v40  ;;  %v8211_v55 = vld [vmem:[%s8193_s26 + $0x18] sm:$0xff]  ;;  %v7564_v60 = vld [vmem:[#allocation8 + $0x148] sm:$0xff]  }
  0x6d   : > { %v936_v51 = vmax.bf16 %v872_v40, %v487_v33  ;;  %v6302_v53 = vcombine.low %v6286_v34, %v6287_v39  ;;  %v919_v56 = vadd.f32 %v903_v45, %v855_v36  ;;  %v1015_v57 = vunpack.c.l.bf16 %v935_v46  ;;  %v8214_v1 = vld [vmem:[%s8193_s26 + $0x90] sm:$0xff]  ;;  %v8217_v2 = vld [vmem:[%s8193_s26 + $0x98] sm:$0xff]  ;;  %v7565_v6 = vld [vmem:[#allocation8 + $0x108] sm:$0xff]  }
  0x6e   : > { %6689 = vmatpush3.bf16.msra.mxu0 %v7536_v14  ;;  %1338 = vmatprep.mubr.bf16.mxu1 %v6303_v41  ;;  %v1483_v58 = vunpack.c.l.bf16 %v1451_v47  ;;  %v1484_v59 = vunpack.c.l.bf16 %v1452_v48  ;;  %v920_v61 = vadd.f32 %v904_v50, %v856_v37  ;;  %v1515_v63 = vmax.bf16 %v6286_v34, %v1451_v47  ;;  %v7570_v9 = vld [vmem:[#allocation8 + $0x150] sm:$0xff]   ;;  %v7586_v32 = vld [vmem:[#allocation8 + $0x1c8] sm:$0xff]   ;;  %v7584_v34 = vld [vmem:[#allocation8 + $0x120] sm:$0xff]  }
  0x6f   : > { %6753 = vmatpush3.bf16.msra.mxu1 %v7537_v15  ;;  %6690 = vmatprep.subr.bf16.mxu0 %v7538_v16  ;;  %v1016_v62 = vunpack.c.l.bf16 %v936_v51  ;;  %v1516_v0 = vmax.bf16 %v6287_v39, %v1452_v48  ;;  %v6257_v5 = vcombine.high %v8208_v54, %v8211_v55  ;;  %v6305_v12 = vcombine.high %v8214_v1, %v8217_v2  ;;  %v8232_v15 = vld [vmem:[%s8193_s26 + $0x20] sm:$0xff]  ;;  %v8235_v16 = vld [vmem:[%s8193_s26 + $0x28] sm:$0xff]  ;;  %v8265_v39 = vld [vmem:[%s8193_s26 + $0xb0] sm:$0xff] }
  0x70   : > { %6754 = vmatprep.subr.bf16.mxu1 %v7539_v17  ;;  %v1499_v3 = vadd.f32 %v1483_v58, %v1435_v42  ;;  %v1500_v4 = vadd.f32 %v1484_v59, %v1436_v43  ;;  %v1595_v7 = vunpack.c.l.bf16 %v1515_v63  ;;  %v7571_v17 = vld [vmem:[#allocation8 + $0x110] sm:$0xff]   ;;  %v874_v33 = vrot.slane %v8211_v55, 4  ;;  %v7587_v35 = vld [vmem:[#allocation8 + $0x188] sm:$0xff]   ;;  %v8268_v40 = vld [vmem:[%s8193_s26 + $0xb8] sm:$0xff] }
  0x71   : > { %v1596_v8 = vunpack.c.l.bf16 %v1516_v0  ;;  %v1453_v36 = vrot.slane %v8214_v1, 4  ;;  %v6258_v37 = vcombine.low %v8232_v15, %v8235_v16  ;;  %v857_v41 = vunpack.c.l.bf16 %v8208_v54  ;;  %v7592_v45 = vld [vmem:[#allocation8 + $0x168] sm:$0xff]   ;;  %v7593_v47 = vld [vmem:[#allocation8 + $0x1d0] sm:$0xff]  }
  0x72   : > { %6691 = vmatpush3.bf16.msra.mxu0 %v7540_v18  ;;  %v8221_v10 = vadd.f32 %v1499_v3, %v919_v56  ;;  %v8223_v11 = vadd.f32 %v1500_v4, %v920_v61  ;;  %v8227_v13 = vmax.f32 %v1015_v57, %v1595_v7  ;;  %v6256_v18 = vcombine.low %v8208_v54, %v8211_v55  ;;  %v8290_v58 = vld [vmem:[%s8193_s26 + $0x48] sm:$0xff] }
  0x73   : > { %6755 = vmatpush3.bf16.msra.mxu1 %v7541_v19  ;;  %6692 = vmatprep.subr.bf16.mxu0 %v7542_v20  ;;  %v8229_v14 = vmax.f32 %v1016_v62, %v1596_v8  ;;  %v6304_v19 = vcombine.low %v8214_v1, %v8217_v2  ;;  %v7576_v20 = vld [vmem:[#allocation8 + $0x158] sm:$0xff]   ;;  %v858_v48 = vunpack.c.l.bf16 %v8211_v55  ;;  %v8279_v50 = vmax.bf16 %v874_v33, %v8211_v55  ;;  %v7595_v62 = vld [vmem:[#allocation8 + $0x190] sm:$0xff]  }
  0x74   : > { %6756 = vmatprep.subr.bf16.mxu1 %v7543_v21  ;;  %v8242_v21 = vld [vmem:[%s8193_s26 + $0xa0] sm:$0xff]  ;;  %v6309_v51 = vcombine.high %v8265_v39, %v8268_v40  ;;  %v1438_v56 = vunpack.c.l.bf16 %v8217_v2  ;;  %v875_v57 = vrot.slane %v8232_v15, 4  ;;  %v8296_v63 = vmax.bf16 %v8214_v1, %v1453_v36 }
  0x75   : > { %10859 = vst [vmem:[#allocation22_spill] sm:$0xff] %v8279_v50  ;;  %v876_v0 = vrot.slane %v8235_v16, 4  ;;  %v6308_v4 = vcombine.low %v8265_v39, %v8268_v40 }
  0x76   : > { %6693 = vmatpush3.bf16.msra.mxu0 %v7544_v22  ;;  %v8245_v22 = vld [vmem:[%s8193_s26 + $0xa8] sm:$0xff] }
  0x77   : > { %6757 = vmatpush3.bf16.msra.mxu1 %v7545_v23  ;;  %6694 = vmatprep.subr.bf16.mxu0 %v7546_v24  ;;  %v6259_v23 = vcombine.high %v8232_v15, %v8235_v16  ;;  %v7577_v24 = vld [vmem:[#allocation8 + $0x118] sm:$0xff]   ;;  %v6306_v38 = vcombine.low %v8242_v21, %v8245_v22 }
  0x78   : > { %6758 = vmatprep.subr.bf16.mxu1 %v7547_v25  ;;  %v7583_v25 = vld [vmem:[#allocation8 + $0x1c0] sm:$0xff]  }
  0x7a   : > { %6695 = vmatpush3.bf16.msra.mxu0 %v7548_v26  ;;  %v6307_v26 = vcombine.high %v8242_v21, %v8245_v22 }
  0x7b   : > { %6759 = vmatpush3.bf16.msra.mxu1 %v7549_v27  ;;  %6696 = vmatprep.subr.bf16.mxu0 %v7550_v28  ;;  %v7582_v27 = vld [vmem:[#allocation8 + $0x160] sm:$0xff]   ;;  %v873_v28 = vrot.slane %v8208_v54, 4 }
  0x7c   : > { %6760 = vmatprep.subr.bf16.mxu1 %v7551_v29  ;;  %v8253_v29 = vld [vmem:[%s8193_s26 + $0x30] sm:$0xff] }
  0x7d   : > { %v905_v42 = vunpack.c.l.bf16 %v873_v28  ;;  %v8272_v43 = vmax.bf16 %v873_v28, %v8208_v54  ;;  %v1437_v54 = vunpack.c.l.bf16 %v8214_v1  ;;  %v8311_v1 = vld [vmem:[%s8193_s26 + $0xc0] sm:$0xff]  ;;  %v8451_v28 = vld [vmem:[%s8193_s26 + $0x78] sm:$0xff] }
  0x7e   : > { %6697 = vmatpush3.bf16.msra.mxu0 %v7552_v30  ;;  %v8256_v30 = vld [vmem:[%s8193_s26 + $0x38] sm:$0xff] }
  0x7f   : > { %6761 = vmatpush3.bf16.msra.mxu1 %v7553_v31  ;;  %6810 = vmatprep.subr.bf16.mxu0 %v7558_v44  ;;  %v7585_v31 = vld [vmem:[#allocation8 + $0x180] sm:$0xff]   ;;  %v1454_v44 = vrot.slane %v8217_v2, 4  ;;  %v6261_v46 = vcombine.high %v8253_v29, %v8256_v30  ;;  %v8292_v55 = vadd.f32 %v905_v42, %v857_v41  ;;  %v6260_v3 = vcombine.low %v8253_v29, %v8256_v30  ;;  %v7604_v42 = vld [vmem:[#allocation8 + $0x130] sm:$0xff]  }
  0x80   : > { %6874 = vmatprep.subr.bf16.mxu1 %v7583_v25  ;;  %v860_v25 = vunpack.c.l.bf16 %v8235_v16  ;;  %v1457_v41 = vrot.slane %v8265_v39, 4 }
  0x81   : > { %759 = vmatmul.mubr.bf16.vlgmr.msra.gmra.mrb[0].mxu0 %v6254_v52  ;;  %v8284_v52 = vld [vmem:[%s8193_s26 + $0x40] sm:$0xff]  ;;  %v1486_v61 = vunpack.c.l.bf16 %v1454_v44  ;;  %v8307_v8 = vmax.bf16 %v8217_v2, %v1454_v44 }
  0x82   : > { %1339 = vmatmul.mubr.bf16.vlgmr.msra.gmra.mrb[0].mxu1 %v6302_v53  ;;  %6811 = vmatpush3.bf16.msra.mxu0 %v7559_v49  ;;  %v906_v49 = vunpack.c.l.bf16 %v874_v33  ;;  %v7594_v53 = vld [vmem:[#allocation8 + $0x128] sm:$0xff]   ;;  %v6263_v2 = vcombine.high %v8284_v52, %v8290_v58  ;;  %v8333_v33 = vld [vmem:[%s8193_s26 + $0x50] sm:$0xff]  ;;  %v7605_v44 = vld [vmem:[#allocation8 + $0x1a0] sm:$0xff]  }
  0x83   : > { %6812 = vmatprep.subr.bf16.mxu0 %v7564_v60  ;;  %766 = vmatprep.mubr.bf16.mxu0 %v6257_v5  ;;  %v1485_v60 = vunpack.c.l.bf16 %v1453_v36  ;;  %v7596_v5 = vld [vmem:[#allocation8 + $0x1d8] sm:$0xff]   ;;  %10860 = vst [vmem:[#allocation23_spill] sm:$0xff] %v8307_v8 }
  0x84   : > { %1346 = vmatprep.mubr.bf16.mxu1 %v6305_v12  ;;  %6875 = vmatpush3.bf16.msra.mxu1 %v7585_v31  ;;  %v8314_v12 = vld [vmem:[%s8193_s26 + $0xc8] sm:$0xff]  ;;  %v877_v31 = vrot.slane %v8253_v29, 4  ;;  %v8467_v36 = vld [vmem:[%s8193_s26 + $0xf8] sm:$0xff] }
  0x85   : > { %6876 = vmatprep.subr.bf16.mxu1 %v7586_v32  ;;  %v6311_v32 = vcombine.high %v8311_v1, %v8314_v12  ;;  %v9013_v8 = vld [vmem:[%s8193_s26 + $0x258] sm:$0xff] }
  0x86   : > { %6813 = vmatpush3.bf16.msra.mxu0 %v7565_v6  ;;  %v8303_v6 = vadd.f32 %v906_v49, %v858_v48  ;;  %v1440_v48 = vunpack.c.l.bf16 %v8245_v22  ;;  %10970 = vst [vmem:[#allocation126_spill] sm:$0xff] %v9013_v8 }
  0x87   : > { %6814 = vmatprep.subr.bf16.mxu0 %v7570_v9  ;;  %v859_v9 = vunpack.c.l.bf16 %v8232_v15 }
  0x88   : > { %6877 = vmatpush3.bf16.msra.mxu1 %v7587_v35  ;;  %v7603_v35 = vld [vmem:[#allocation8 + $0x1e0] sm:$0xff]  }
  0x89   : > { %767 = vmatmul.mubr.bf16.gmra.mrb[4].mxu0 %v6256_v18  ;;  %6878 = vmatprep.subr.bf16.mxu1 %v7593_v47  ;;  %v907_v18 = vunpack.c.l.bf16 %v875_v57 }
  0x8a   : > { %1347 = vmatmul.mubr.bf16.gmra.mrb[4].mxu1 %v6304_v19  ;;  %6815 = vmatpush3.bf16.msra.mxu0 %v7571_v17  ;;  %v7597_v17 = vld [vmem:[#allocation8 + $0x198] sm:$0xff]   ;;  %v8317_v19 = vmax.bf16 %v875_v57, %v8232_v15  ;;  %v908_v15 = vunpack.c.l.bf16 %v876_v0 }
  0x8b   : > { %774 = vmatprep.mubr.bf16.mxu0 %v6259_v23  ;;  %6816 = vmatprep.subr.bf16.mxu0 %v7576_v20  ;;  %v1455_v20 = vrot.slane %v8242_v21, 4  ;;  %v8322_v23 = vadd.f32 %v1485_v60, %v1437_v54  ;;  %v1458_v54 = vrot.slane %v8268_v40, 4  ;;  %v6262_v60 = vcombine.low %v8284_v52, %v8290_v58 }
  0x8c   : > { %1354 = vmatprep.mubr.bf16.mxu1 %v6307_v26  ;;  %6879 = vmatpush3.bf16.msra.mxu1 %v7595_v62  ;;  %10861 = vst [vmem:[#allocation24_spill] sm:$0xff] %v8317_v19  ;;  %v1456_v26 = vrot.slane %v8245_v22, 4  ;;  %v8363_v62 = vld [vmem:[%s8193_s26 + $0xd0] sm:$0xff] }
  0x8d   : > { %6880 = vmatprep.subr.bf16.mxu1 %v7596_v5  ;;  %v1487_v49 = vunpack.c.l.bf16 %v1455_v20  ;;  %v1461_v59 = vrot.slane %v8363_v62, 4  ;;  %v9029_v19 = vld [vmem:[%s8193_s26 + $0x2d0] sm:$0xff] }
  0x8e   : > { %6817 = vmatpush3.bf16.msra.mxu0 %v7577_v24  ;;  %v8324_v24 = vadd.f32 %v1486_v61, %v1438_v56  ;;  %v7606_v56 = vld [vmem:[#allocation8 + $0x1e8] sm:$0xff]   ;;  %v8356_v57 = vmax.bf16 %v8245_v22, %v1456_v26  ;;  %v6310_v61 = vcombine.low %v8311_v1, %v8314_v12 }
  0x8f   : > { %6818 = vmatprep.subr.bf16.mxu0 %v7582_v27  ;;  %v7602_v27 = vld [vmem:[#allocation8 + $0x170] sm:$0xff]   ;;  %v7607_v22 = vld [vmem:[#allocation8 + $0x1a8] sm:$0xff]  }
  0x90   : > { %6881 = vmatpush3.bf16.msra.mxu1 %v7597_v17  ;;  %10866 = vst [vmem:[#allocation29_spill] sm:$0xff] %v8356_v57  ;;  %v8373_v17 = vmax.bf16 %v877_v31, %v8253_v29 }
  0x91   : > { %775 = vmatmul.mubr.bf16.gmra.mrb[8].mxu0 %v6258_v37  ;;  %v1439_v37 = vunpack.c.l.bf16 %v8242_v21  ;;  %6882 = vmatprep.subr.bf16.mxu1 %v7603_v35  ;;  %v879_v35 = vrot.slane %v8284_v52, 4 }
  0x92   : > { %1355 = vmatmul.mubr.bf16.gmra.mrb[8].mxu1 %v6306_v38  ;;  %6819 = vmatpush3.bf16.msra.mxu0 %v7584_v34  ;;  %v8336_v34 = vld [vmem:[%s8193_s26 + $0x58] sm:$0xff]  ;;  %v878_v38 = vrot.slane %v8256_v30, 4  ;;  %10867 = vst [vmem:[#allocation30_spill] sm:$0xff] %v8373_v17 }
  0x93   : > { %782 = vmatprep.mubr.bf16.mxu0 %v6261_v46  ;;  %6820 = vmatprep.subr.bf16.mxu0 %v7592_v45  ;;  %v8342_v45 = vadd.f32 %v907_v18, %v859_v9  ;;  %v8345_v46 = vmax.bf16 %v876_v0, %v8235_v16  ;;  %v8353_v16 = vadd.f32 %v908_v15, %v860_v25  ;;  %v861_v0 = vunpack.c.l.bf16 %v8253_v29 }
  0x94   : > { %1362 = vmatprep.mubr.bf16.mxu1 %v6309_v51  ;;  %v1488_v51 = vunpack.c.l.bf16 %v1456_v26  ;;  %v6265_v5 = vcombine.high %v8333_v33, %v8336_v34  ;;  %6883 = vmatpush3.bf16.msra.mxu1 %v7605_v44  ;;  %v910_v9 = vunpack.c.l.bf16 %v878_v38  ;;  %v8376_v18 = vmax.bf16 %v878_v38, %v8256_v30  ;;  %v8389_v38 = vld [vmem:[%s8193_s26 + $0x60] sm:$0xff] }
  0x95   : > { %10862 = vst [vmem:[#allocation25_spill] sm:$0xff] %v8342_v45  ;;  %10863 = vst [vmem:[#allocation26_spill] sm:$0xff] %v8345_v46  ;;  %6884 = vmatprep.subr.bf16.mxu1 %v7606_v56  ;;  %v1442_v25 = vunpack.c.l.bf16 %v8268_v40  ;;  %v1489_v26 = vunpack.c.l.bf16 %v1457_v41  ;;  %v8399_v29 = vmax.bf16 %v8265_v39, %v1457_v41  ;;  %v8412_v56 = vmax.bf16 %v8268_v40, %v1458_v54  ;;  %v8977_v45 = vld [vmem:[%s8193_s26 + $0x240] sm:$0xff] }
  0x96   : > { %6821 = vmatpush3.bf16.msra.mxu0 %v7594_v53  ;;  %v8350_v53 = vmax.bf16 %v8242_v21, %v1455_v20  ;;  %10865 = vst [vmem:[#allocation28_spill] sm:$0xff] %v8353_v16  ;;  %v8366_v21 = vld [vmem:[%s8193_s26 + $0xd8] sm:$0xff]  ;;  %10868 = vst [vmem:[#allocation31_spill] sm:$0xff] %v8376_v18  ;;  %v1441_v20 = vunpack.c.l.bf16 %v8265_v39  ;;  %v7615_v39 = vld [vmem:[#allocation8 + $0x1b0] sm:$0xff]   ;;  %v6264_v40 = vcombine.low %v8333_v33, %v8336_v34  ;;  %v882_v44 = vrot.slane %v8336_v34, 4 }
  0x97   : > { %6822 = vmatprep.subr.bf16.mxu0 %v7602_v27  ;;  %v1490_v27 = vunpack.c.l.bf16 %v1458_v54  ;;  %v6313_v15 = vcombine.high %v8363_v62, %v8366_v21  ;;  %10872 = vst [vmem:[#allocation35_spill] sm:$0xff] %v8399_v29  ;;  %10874 = vst [vmem:[#allocation37_spill] sm:$0xff] %v8412_v56  ;;  %v6312_v54 = vcombine.low %v8363_v62, %v8366_v21  ;;  %v883_v29 = vrot.slane %v8389_v38, 4  ;;  %v8855_v16 = vld [vmem:[%s8193_s26 + $0x178] sm:$0xff] }
  0x98   : > { %10864 = vst [vmem:[#allocation27_spill] sm:$0xff] %v8350_v53  ;;  %6885 = vmatpush3.bf16.msra.mxu1 %v7607_v22  ;;  %v8414_v41 = vadd.f32 %v1489_v26, %v1441_v20  ;;  %v1459_v20 = vrot.slane %v8311_v1, 4  ;;  %v7617_v26 = vld [vmem:[#allocation8 + $0x1b8] sm:$0xff]   ;;  %v881_v22 = vrot.slane %v8333_v33, 4  ;;  %10951 = vst [vmem:[#allocation113_spill] sm:$0xff] %v8855_v16  ;;  %v8971_v53 = vld [vmem:[%s8193_s26 + $0x2b0] sm:$0xff] }
  0x99   : > { %783 = vmatmul.mubr.bf16.gmra.mrb[12].mxu0 %v6260_v3  ;;  %v862_v3 = vunpack.c.l.bf16 %v8256_v30  ;;  %v8385_v30 = vadd.f32 %v1488_v51, %v1440_v48  ;;  %v8405_v48 = vld [vmem:[%s8193_s26 + $0xe8] sm:$0xff] }
  0x9a   : > { %1363 = vmatmul.mubr.bf16.gmra.mrb[12].mxu1 %v6308_v4  ;;  %790 = vmatprep.mubr.bf16.mxu0 %v6263_v2  ;;  %v909_v4 = vunpack.c.l.bf16 %v877_v31  ;;  %v7612_v2 = vld [vmem:[#allocation8 + $0x178] sm:$0xff]   ;;  %v8383_v31 = vadd.f32 %v1487_v49, %v1439_v37  ;;  %v8402_v37 = vld [vmem:[%s8193_s26 + $0xe0] sm:$0xff]  ;;  %10875 = vst [vmem:[#allocation38_spill] sm:$0xff] %v8414_v41  ;;  %v1491_v18 = vunpack.c.l.bf16 %v1459_v20 }
  0x9b   : > { %1370 = vmatprep.mubr.bf16.mxu1 %v6311_v32  ;;  %6823 = vmatpush3.bf16.msra.mxu0 %v7604_v42  ;;  %v7613_v32 = vld [vmem:[#allocation8 + $0x1f0] sm:$0xff]   ;;  %10870 = vst [vmem:[#allocation33_spill] sm:$0xff] %v8385_v30  ;;  %v8392_v42 = vld [vmem:[%s8193_s26 + $0x68] sm:$0xff]  ;;  %v7614_v49 = vld [vmem:[#allocation8 + $0x138] sm:$0xff]   ;;  %v8407_v51 = vadd.f32 %v910_v9, %v862_v3  ;;  %v911_v9 = vunpack.c.l.bf16 %v879_v35 }
  0x9c   : > { %10869 = vst [vmem:[#allocation32_spill] sm:$0xff] %v8383_v31  ;;  %v8396_v47 = vadd.f32 %v909_v4, %v861_v0  ;;  %6824 = vmatprep.subr.bf16.mxu0 %v7612_v2  ;;  %v8416_v0 = vadd.f32 %v1490_v27, %v1442_v25  ;;  %v863_v4 = vunpack.c.l.bf16 %v8284_v52  ;;  %6886 = vmatprep.subr.bf16.mxu1 %v7613_v32  ;;  %v7616_v3 = vld [vmem:[#allocation8 + $0x1f8] sm:$0xff]   ;;  %v1460_v2 = vrot.slane %v8314_v12, 4 }
  0x9d   : > { %10873 = vst [vmem:[#allocation36_spill] sm:$0xff] %v8407_v51  ;;  %v6267_v25 = vcombine.high %v8389_v38, %v8392_v42  ;;  %v1443_v32 = vunpack.c.l.bf16 %v8311_v1  ;;  %6887 = vmatpush3.bf16.msra.mxu1 %v7615_v39  ;;  %v8448_v39 = vld [vmem:[%s8193_s26 + $0x70] sm:$0xff]  ;;  %v8974_v31 = vld [vmem:[%s8193_s26 + $0x2b8] sm:$0xff] }
  0x9e   : > { %10871 = vst [vmem:[#allocation34_spill] sm:$0xff] %v8396_v47  ;;  %10876 = vst [vmem:[#allocation39_spill] sm:$0xff] %v8416_v0  ;;  %6888 = vmatprep.subr.bf16.mxu1 %v7616_v3  ;;  %v8440_v27 = vadd.f32 %v911_v9, %v863_v4  ;;  %v1492_v56 = vunpack.c.l.bf16 %v1460_v2  ;;  %v8454_v3 = vmax.bf16 %v8311_v1, %v1459_v20  ;;  %v1462_v4 = vrot.slane %v8366_v21, 4 }
  0x9f   : > { %6825 = vmatpush3.bf16.msra.mxu0 %v7614_v49  ;;  %v7622_v49 = vld [vmem:[#allocation8 + $0x240] sm:$0xff]   ;;  %v865_v9 = vunpack.c.l.bf16 %v8333_v33  ;;  %v913_v1 = vunpack.c.l.bf16 %v881_v22  ;;  %v914_v20 = vunpack.c.l.bf16 %v882_v44 }
  0xa0   : > { %10878 = vst [vmem:[#allocation41_spill] sm:$0xff] %v8440_v27  ;;  %10880 = vst [vmem:[#allocation43_spill] sm:$0xff] %v8454_v3  ;;  %6938 = vmatprep.subr.bf16.mxu0 %v7622_v49  ;;  %v6314_v27 = vcombine.low %v8402_v37, %v8405_v48  ;;  %v1494_v0 = vunpack.c.l.bf16 %v1462_v4  ;;  %v8493_v51 = vmax.bf16 %v8366_v21, %v1462_v4  ;;  %v8513_v4 = vld [vmem:[%s8193_s26 + $0x100] sm:$0xff]  ;;  %v7650_v3 = vld [vmem:[#allocation8 + $0x2c8] sm:$0xff]  }
  0xa1   : > { %791 = vmatmul.mubr.bf16.gmra.mrb[16].mxu0 %v6262_v60  ;;  %v1444_v60 = vunpack.c.l.bf16 %v8314_v12  ;;  %6889 = vmatpush3.bf16.msra.mxu1 %v7617_v26  ;;  %v8481_v26 = vmax.bf16 %v8363_v62, %v1461_v59  ;;  %v8500_v41 = vadd.f32 %v913_v1, %v865_v9  ;;  %v884_v1 = vrot.slane %v8392_v42, 4 }
  0xa2   : > { %1371 = vmatmul.mubr.bf16.gmra.mrb[16].mxu1 %v6310_v61  ;;  %798 = vmatprep.mubr.bf16.mxu0 %v6265_v5  ;;  %v880_v5 = vrot.slane %v8290_v58, 4  ;;  %10887 = vst [vmem:[#allocation50_spill] sm:$0xff] %v8493_v51 }
  0xa3   : > { %1378 = vmatprep.mubr.bf16.mxu1 %v6313_v15  ;;  %v8421_v15 = vmax.bf16 %v879_v35, %v8284_v52  ;;  %v864_v52 = vunpack.c.l.bf16 %v8290_v58  ;;  %v6315_v35 = vcombine.high %v8402_v37, %v8405_v48  ;;  %10884 = vst [vmem:[#allocation47_spill] sm:$0xff] %v8481_v26  ;;  %v8495_v17 = vadd.f32 %v1492_v56, %v1444_v60 }
  0xa4   : > { %v912_v61 = vunpack.c.l.bf16 %v880_v5  ;;  %v8443_v7 = vmax.bf16 %v880_v5, %v8290_v58  ;;  %v8458_v58 = vld [vmem:[%s8193_s26 + $0xf0] sm:$0xff]  ;;  %v8461_v5 = vmax.bf16 %v8314_v12, %v1460_v2  ;;  %v8474_v12 = vmax.bf16 %v882_v44, %v8336_v34  ;;  %10889 = vst [vmem:[#allocation52_spill] sm:$0xff] %v8500_v41 }
  0xa5   : > { %10877 = vst [vmem:[#allocation40_spill] sm:$0xff] %v8421_v15  ;;  %v1493_v2 = vunpack.c.l.bf16 %v1461_v59  ;;  %v6266_v15 = vcombine.low %v8389_v38, %v8392_v42  ;;  %v8490_v44 = vadd.f32 %v1491_v18, %v1443_v32  ;;  %10888 = vst [vmem:[#allocation51_spill] sm:$0xff] %v8495_v17  ;;  %v867_v32 = vunpack.c.l.bf16 %v8389_v38  ;;  %v8682_v17 = vld [vmem:[%s8193_s26 + $0x1b0] sm:$0xff] }
  0xa6   : > { %10879 = vst [vmem:[#allocation42_spill] sm:$0xff] %v8443_v7  ;;  %10881 = vst [vmem:[#allocation44_spill] sm:$0xff] %v8461_v5  ;;  %v8487_v49 = vadd.f32 %v912_v61, %v864_v52  ;;  %v7647_v52 = vld [vmem:[#allocation8 + $0x2c0] sm:$0xff]   ;;  %v916_v59 = vunpack.c.l.bf16 %v884_v1 }
  0xa7   : > { %10883 = vst [vmem:[#allocation46_spill] sm:$0xff] %v8474_v12  ;;  %10886 = vst [vmem:[#allocation49_spill] sm:$0xff] %v8490_v44  ;;  %7002 = vmatprep.subr.bf16.mxu1 %v7647_v52  ;;  %v7649_v5 = vld [vmem:[#allocation8 + $0x280] sm:$0xff]  }
  0xa8   : > { %10885 = vst [vmem:[#allocation48_spill] sm:$0xff] %v8487_v49  ;;  %v8611_v49 = vld [vmem:[%s8193_s26 + $0x120] sm:$0xff]  ;;  %10920 = vst [vmem:[#allocation82_spill] sm:$0xff] %v8682_v17 }
  0xa9   : > { %799 = vmatmul.mubr.bf16.gmra.mrb[20].mxu0 %v6264_v40  ;;  %v866_v40 = vunpack.c.l.bf16 %v8336_v34  ;;  %10906 = vst [vmem:[#allocation68_spill] sm:$0xff] %v8611_v49 }
  0xaa   : > { %1379 = vmatmul.mubr.bf16.gmra.mrb[20].mxu1 %v6312_v54  ;;  %806 = vmatprep.mubr.bf16.mxu0 %v6267_v25  ;;  %v1445_v54 = vunpack.c.l.bf16 %v8363_v62  ;;  %v8470_v25 = vmax.bf16 %v881_v22, %v8333_v33  ;;  %v6269_v33 = vcombine.high %v8448_v39, %v8451_v28  ;;  %v6317_v22 = vcombine.high %v8458_v58, %v8467_v36 }
  0xab   : > { %1386 = vmatprep.mubr.bf16.mxu1 %v6315_v35  ;;  %v1446_v35 = vunpack.c.l.bf16 %v8366_v21  ;;  %v8502_v61 = vadd.f32 %v914_v20, %v866_v40  ;;  %v868_v40 = vunpack.c.l.bf16 %v8392_v42  ;;  %v915_v20 = vunpack.c.l.bf16 %v883_v29 }
  0xac   : > { %10882 = vst [vmem:[#allocation45_spill] sm:$0xff] %v8470_v25  ;;  %v8506_v56 = vadd.f32 %v1493_v2, %v1445_v54  ;;  %v8526_v54 = vld [vmem:[%s8193_s26 + $0x188] sm:$0xff]  ;;  %v1463_v2 = vrot.slane %v8402_v37, 4  ;;  %v6316_v21 = vcombine.low %v8458_v58, %v8467_v36 }
  0xad   : > { %10890 = vst [vmem:[#allocation53_spill] sm:$0xff] %v8502_v61  ;;  %v8508_v60 = vadd.f32 %v1494_v0, %v1446_v35  ;;  %v8523_v0 = vld [vmem:[%s8193_s26 + $0x180] sm:$0xff]  ;;  %v8529_v35 = vmax.bf16 %v883_v29, %v8389_v38  ;;  %v2594_v38 = vunpack.c.l.bf16 %v8526_v54  ;;  %v2610_v62 = vrot.slane %v8526_v54, 4 }
  0xae   : > { %10891 = vst [vmem:[#allocation54_spill] sm:$0xff] %v8506_v56  ;;  %v6399_v29 = vcombine.high %v8523_v0, %v8526_v54  ;;  %v8550_v61 = vmax.bf16 %v884_v1, %v8392_v42  ;;  %v1495_v41 = vunpack.c.l.bf16 %v1463_v2  ;;  %v10977_v50 = vrot.slane %v8523_v0, 4 }
  0xaf   : > { %10892 = vst [vmem:[#allocation55_spill] sm:$0xff] %v8508_v60  ;;  %10893 = vst [vmem:[#allocation56_spill] sm:$0xff] %v8529_v35  ;;  %v8547_v60 = vadd.f32 %v915_v20, %v867_v32  ;;  %v2642_v25 = vunpack.c.l.bf16 %v2610_v62  ;;  %v2674_v26 = vmax.bf16 %v8526_v54, %v2610_v62  ;;  %v885_v32 = vrot.slane %v8448_v39, 4  ;;  %v8556_v20 = vld [vmem:[%s8193_s26 + $0x110] sm:$0xff]  ;;  %v7629_v35 = vld [vmem:[#allocation8 + $0x208] sm:$0xff]  }
  0xb0   : > { %10895 = vst [vmem:[#allocation58_spill] sm:$0xff] %v8550_v61  ;;  %v8561_v62 = vadd.f32 %v916_v59, %v868_v40  ;;  %v1466_v59 = vrot.slane %v8467_v36, 4 }
  0xb1   : > { %807 = vmatmul.mubr.bf16.gmra.mrb[24].mxu0 %v6266_v15  ;;  %v1448_v15 = vunpack.c.l.bf16 %v8405_v48  ;;  %10894 = vst [vmem:[#allocation57_spill] sm:$0xff] %v8547_v60  ;;  %v2658_v42 = vadd.f32 %v2642_v25, %v2594_v38  ;;  %v2754_v1 = vunpack.c.l.bf16 %v2674_v26  ;;  %v8559_v60 = vld [vmem:[%s8193_s26 + $0x118] sm:$0xff]  ;;  %v1465_v26 = vrot.slane %v8458_v58, 4 }
  0xb2   : > { %1387 = vmatmul.mubr.bf16.gmra.mrb[24].mxu1 %v6314_v27  ;;  %814 = vmatprep.mubr.bf16.mxu0 %v6269_v33  ;;  %v8520_v27 = vld [vmem:[%s8193_s26 + $0x108] sm:$0xff]  ;;  %v1464_v33 = vrot.slane %v8405_v48, 4  ;;  %10896 = vst [vmem:[#allocation59_spill] sm:$0xff] %v8559_v60  ;;  %10897 = vst [vmem:[#allocation60_spill] sm:$0xff] %v8561_v62  ;;  %v6353_v38 = vcombine.high %v8556_v20, %v8559_v60  ;;  %v1498_v62 = vunpack.c.l.bf16 %v1466_v59 }
  0xb3   : > { %1394 = vmatprep.mubr.bf16.mxu1 %v6317_v22  ;;  %v6268_v22 = vcombine.low %v8448_v39, %v8451_v28  ;;  %v2015_v9 = vunpack.c.l.bf16 %v8520_v27  ;;  %v2031_v18 = vrot.slane %v8520_v27, 4  ;;  %v6351_v34 = vcombine.high %v8513_v4, %v8520_v27 }
  0xb4   : > { %v1496_v52 = vunpack.c.l.bf16 %v1464_v33  ;;  %v8576_v25 = vmax.bf16 %v8405_v48, %v1464_v33  ;;  %v917_v48 = vunpack.c.l.bf16 %v885_v32  ;;  %v7623_v33 = vld [vmem:[#allocation8 + $0x200] sm:$0xff]   ;;  %v1497_v56 = vunpack.c.l.bf16 %v1465_v26 }
  0xb5   : > { %v2063_v12 = vunpack.c.l.bf16 %v2031_v18  ;;  %v2095_v51 = vmax.bf16 %v8520_v27, %v2031_v18 }
  0xb6   : > { %10900 = vst [vmem:[#allocation63_spill] sm:$0xff] %v8576_v25 }
  0xb7   : > { %v2079_v7 = vadd.f32 %v2063_v12, %v2015_v9  ;;  %v2175_v18 = vunpack.c.l.bf16 %v2095_v51  ;;  %v8567_v51 = vld [vmem:[%s8193_s26 + $0x190] sm:$0xff]  ;;  %v8570_v9 = vld [vmem:[%s8193_s26 + $0x198] sm:$0xff] }
  0xb8   : > { %10898 = vst [vmem:[#allocation61_spill] sm:$0xff] %v8570_v9 }
  0xb9   : > { %815 = vmatmul.mubr.bf16.gmra.mrb[28].mxu0 %v6268_v22  ;;  %v886_v22 = vrot.slane %v8451_v28, 4  ;;  %v2191_v12 = vmax.f32 %v8229_v14, %v2175_v18  ;;  %v6398_v14 = vcombine.low %v8523_v0, %v8526_v54  ;;  %v7628_v54 = vld [vmem:[#allocation8 + $0x248] sm:$0xff]  }
  0xba   : > { %1395 = vmatmul.mubr.bf16.gmra.mrb[28].mxu1 %v6316_v21  ;;  %1917 = vmatprep.mubr.bf16.mxu0 %v6351_v34  ;;  %v2127_v21 = vadd.f32 %v2079_v7, %v8223_v11  ;;  %v8573_v34 = vmax.bf16 %v8402_v37, %v1463_v2  ;;  %v6350_v11 = vcombine.low %v8513_v4, %v8520_v27  ;;  %v869_v7 = vunpack.c.l.bf16 %v8448_v39 }
  0xbb   : > { %2496 = vmatprep.mubr.bf16.mxu1 %v6399_v29  ;;  %v8582_v29 = vmax.f32 %v2191_v12, %v2754_v1  ;;  %v870_v2 = vunpack.c.l.bf16 %v8451_v28  ;;  %v918_v18 = vunpack.c.l.bf16 %v886_v22  ;;  %v8596_v1 = vmax.bf16 %v886_v22, %v8451_v28 }
  0xbc   : > { %10899 = vst [vmem:[#allocation62_spill] sm:$0xff] %v8573_v34  ;;  %v8580_v40 = vadd.f32 %v2658_v42, %v2127_v21  ;;  %v8593_v42 = vmax.bf16 %v885_v32, %v8448_v39  ;;  %v6401_v27 = vcombine.high %v8567_v51, %v8570_v9  ;;  %v1449_v21 = vunpack.c.l.bf16 %v8458_v58 }
  0xbd   : > { %10902 = vst [vmem:[#allocation65_spill] sm:$0xff] %v8596_v1  ;;  %v1450_v12 = vunpack.c.l.bf16 %v8467_v36  ;;  %v10903_v32 = vunpack.c.l.bf16 %v8402_v37  ;;  %v8607_v22 = vadd.f32 %v1496_v52, %v1448_v15  ;;  %v8614_v47 = vadd.f32 %v917_v48, %v869_v7  ;;  %v8624_v15 = vld [vmem:[%s8193_s26 + $0x1a0] sm:$0xff]  ;;  %v8627_v52 = vld [vmem:[%s8193_s26 + $0x1a8] sm:$0xff] }
  0xbe   : > { %10901 = vst [vmem:[#allocation64_spill] sm:$0xff] %v8593_v42  ;;  %v8617_v39 = vmax.bf16 %v8458_v58, %v1465_v26  ;;  %v2030_v37 = vrot.slane %v8513_v4, 4  ;;  %10910 = vst [vmem:[#allocation72_spill] sm:$0xff] %v8624_v15  ;;  %v8634_v48 = vmax.bf16 %v8467_v36, %v1466_v59  ;;  %v7634_v58 = vld [vmem:[#allocation8 + $0x250] sm:$0xff]   ;;  %v8636_v26 = vadd.f32 %v1497_v56, %v1449_v21  ;;  %v7640_v21 = vld [vmem:[#allocation8 + $0x258] sm:$0xff]  }
  0xbf   : > { %v8605_v28 = vadd.f32 %v1495_v41, %v10903_v32  ;;  %10905 = vst [vmem:[#allocation67_spill] sm:$0xff] %v8607_v22  ;;  %10907 = vst [vmem:[#allocation69_spill] sm:$0xff] %v8614_v47  ;;  %v8621_v41 = vld [vmem:[%s8193_s26 + $0x128] sm:$0xff]  ;;  %v2033_v7 = vrot.slane %v8559_v60, 4  ;;  %v6352_v36 = vcombine.low %v8556_v20, %v8559_v60  ;;  %v6400_v56 = vcombine.low %v8567_v51, %v8570_v9  ;;  %v7635_v59 = vld [vmem:[#allocation8 + $0x210] sm:$0xff]  }
  0xc0   : > { %10908 = vst [vmem:[#allocation70_spill] sm:$0xff] %v8617_v39  ;;  %10909 = vst [vmem:[#allocation71_spill] sm:$0xff] %v8621_v41  ;;  %v8685_v32 = vld [vmem:[%s8193_s26 + $0x1b8] sm:$0xff]  ;;  %v7646_v39 = vld [vmem:[#allocation8 + $0x260] sm:$0xff]  }
  0xc1   : > { %10904 = vst [vmem:[#allocation66_spill] sm:$0xff] %v8605_v28  ;;  %1918 = vmatmul.mubr.bf16.vlgmr.msra.gmra.mrb[32].mxu0 %v6350_v11  ;;  %10911 = vst [vmem:[#allocation73_spill] sm:$0xff] %v8627_v52  ;;  %v8629_v11 = vadd.f32 %v918_v18, %v870_v2  ;;  %v2032_v2 = vrot.slane %v8556_v20, 4  ;;  %v7651_v18 = vld [vmem:[#allocation8 + $0x288] sm:$0xff]   ;;  %v8671_v1 = vunpack.c.l.bf16 %v2033_v7  ;;  %v8716_v42 = vld [vmem:[%s8193_s26 + $0x140] sm:$0xff] }
  0xc2   : > { %2497 = vmatmul.mubr.bf16.vlgmr.msra.gmra.mrb[32].mxu1 %v6398_v14  ;;  %6939 = vmatpush3.bf16.msra.mxu0 %v7623_v33  ;;  %10913 = vst [vmem:[#allocation75_spill] sm:$0xff] %v8634_v48  ;;  %10914 = vst [vmem:[#allocation76_spill] sm:$0xff] %v8636_v26  ;;  %v8638_v33 = vadd.f32 %v1498_v62, %v1450_v12  ;;  %v8659_v14 = vunpack.c.l.bf16 %v2030_v37  ;;  %v7659_v12 = vld [vmem:[#allocation8 + $0x290] sm:$0xff]   ;;  %v8679_v62 = vld [vmem:[%s8193_s26 + $0x138] sm:$0xff]  ;;  %v2038_v34 = vrot.slane %v8716_v42, 4 }
  0xc3   : > { %1925 = vmatprep.mubr.bf16.mxu0 %v6353_v38  ;;  %10912 = vst [vmem:[#allocation74_spill] sm:$0xff] %v8629_v11  ;;  %2504 = vmatprep.mubr.bf16.mxu1 %v6401_v27  ;;  %v8641_v38 = vmax.bf16 %v8513_v4, %v2030_v37  ;;  %v8652_v27 = vmax.bf16 %v8556_v20, %v2032_v2  ;;  %v8669_v44 = vunpack.c.l.bf16 %v2032_v2  ;;  %10917 = vst [vmem:[#allocation79_spill] sm:$0xff] %v8671_v1  ;;  %v7661_v11 = vld [vmem:[#allocation8 + $0x298] sm:$0xff]   ;;  %v7648_v2 = vld [vmem:[#allocation8 + $0x220] sm:$0xff]  }
  0xc4   : > { %6940 = vmatprep.subr.bf16.mxu0 %v7628_v54  ;;  %10915 = vst [vmem:[#allocation77_spill] sm:$0xff] %v8638_v33  ;;  %7003 = vmatpush3.bf16.msra.mxu1 %v7649_v5  ;;  %v6355_v5 = vcombine.high %v8611_v49, %v8621_v41  ;;  %v6403_v54 = vcombine.high %v8624_v15, %v8627_v52  ;;  %v8676_v33 = vld [vmem:[%s8193_s26 + $0x130] sm:$0xff]  ;;  %10919 = vst [vmem:[#allocation81_spill] sm:$0xff] %v8679_v62  ;;  %v2034_v37 = vrot.slane %v8611_v49, 4  ;;  %v8719_v26 = vld [vmem:[%s8193_s26 + $0x148] sm:$0xff] }
  0xc5   : > { %7004 = vmatprep.subr.bf16.mxu1 %v7650_v3  ;;  %v8663_v3 = vmax.bf16 %v8559_v60, %v2033_v7  ;;  %10918 = vst [vmem:[#allocation80_spill] sm:$0xff] %v8676_v33  ;;  %10921 = vst [vmem:[#allocation83_spill] sm:$0xff] %v8685_v32  ;;  %v2036_v48 = vrot.slane %v8676_v33, 4  ;;  %v7667_v47 = vld [vmem:[#allocation8 + $0x2e0] sm:$0xff]   ;;  %v8744_v22 = vld [vmem:[%s8193_s26 + $0x1c8] sm:$0xff] }
  0xc6   : > { %6941 = vmatpush3.bf16.msra.mxu0 %v7629_v35  ;;  %v7657_v35 = vld [vmem:[#allocation8 + $0x2d0] sm:$0xff]   ;;  %v8696_v7 = vmax.bf16 %v8611_v49, %v2034_v37  ;;  %10924 = vst [vmem:[#allocation86_spill] sm:$0xff] %v8716_v42  ;;  %10925 = vst [vmem:[#allocation87_spill] sm:$0xff] %v8719_v26  ;;  %v8721_v61 = vunpack.c.l.bf16 %v2034_v37  ;;  %v7656_v37 = vld [vmem:[#allocation8 + $0x268] sm:$0xff]  }
  0xc7   : > { %10916 = vst [vmem:[#allocation78_spill] sm:$0xff] %v8663_v3  ;;  %6942 = vmatprep.subr.bf16.mxu0 %v7634_v58  ;;  %v2035_v58 = vrot.slane %v8621_v41, 4  ;;  %v8741_v28 = vld [vmem:[%s8193_s26 + $0x1c0] sm:$0xff]  ;;  %10932 = vst [vmem:[#allocation94_spill] sm:$0xff] %v8744_v22  ;;  %v8980_v9 = vld [vmem:[%s8193_s26 + $0x248] sm:$0xff] }
  0xc8   : > { %7005 = vmatpush3.bf16.msra.mxu1 %v7651_v18  ;;  %v7660_v18 = vld [vmem:[#allocation8 + $0x2d8] sm:$0xff]   ;;  %10922 = vst [vmem:[#allocation84_spill] sm:$0xff] %v8696_v7  ;;  %10926 = vst [vmem:[#allocation88_spill] sm:$0xff] %v8721_v61  ;;  %v8955_v7 = vld [vmem:[%s8193_s26 + $0x2a8] sm:$0xff] }
  0xc9   : > { %1926 = vmatmul.mubr.bf16.gmra.mrb[36].mxu0 %v6352_v36  ;;  %v7641_v36 = vld [vmem:[#allocation8 + $0x218] sm:$0xff]   ;;  %7006 = vmatprep.subr.bf16.mxu1 %v7657_v35  ;;  %v6402_v35 = vcombine.low %v8624_v15, %v8627_v52  ;;  %v8723_v25 = vunpack.c.l.bf16 %v2035_v58  ;;  %10931 = vst [vmem:[#allocation93_spill] sm:$0xff] %v8741_v28  ;;  %v8833_v15 = vld [vmem:[%s8193_s26 + $0x1e8] sm:$0xff]  ;;  %v8997_v1 = vld [vmem:[%s8193_s26 + $0x250] sm:$0xff] }
  0xca   : > { %2505 = vmatmul.mubr.bf16.gmra.mrb[36].mxu1 %v6400_v56  ;;  %1933 = vmatprep.mubr.bf16.mxu0 %v6355_v5  ;;  %v8699_v5 = vmax.bf16 %v8621_v41, %v2035_v58  ;;  %v6357_v56 = vcombine.high %v8676_v33, %v8679_v62  ;;  %v7669_v58 = vld [vmem:[#allocation8 + $0x2a0] sm:$0xff]   ;;  %10949 = vst [vmem:[#allocation111_spill] sm:$0xff] %v8833_v15  ;;  %v8961_v61 = vld [vmem:[%s8193_s26 + $0x238] sm:$0xff]  ;;  %v8994_v3 = vld [vmem:[%s8193_s26 + $0x2c8] sm:$0xff] }
  0xcb   : > { %2512 = vmatprep.mubr.bf16.mxu1 %v6403_v54  ;;  %6943 = vmatpush3.bf16.msra.mxu0 %v7635_v59  ;;  %v6354_v59 = vcombine.low %v8611_v49, %v8621_v41  ;;  %10927 = vst [vmem:[#allocation89_spill] sm:$0xff] %v8723_v25  ;;  %v8727_v54 = vmax.bf16 %v8676_v33, %v2036_v48  ;;  %v8788_v41 = vunpack.c.l.bf16 %v2038_v34  ;;  %v7679_v25 = vld [vmem:[#allocation8 + $0x2b0] sm:$0xff]   ;;  %10966 = vst [vmem:[#allocation124_spill] sm:$0xff] %v8994_v3 }
  0xcc   : > { %10923 = vst [vmem:[#allocation85_spill] sm:$0xff] %v8699_v5  ;;  %6944 = vmatprep.subr.bf16.mxu0 %v7640_v21  ;;  %7007 = vmatpush3.bf16.msra.mxu1 %v7659_v12  ;;  %v2037_v21 = vrot.slane %v8679_v62, 4  ;;  %v6405_v12 = vcombine.high %v8682_v17, %v8685_v32  ;;  %v7668_v5 = vld [vmem:[#allocation8 + $0x230] sm:$0xff]   ;;  %10967 = vst [vmem:[#allocation125_spill] sm:$0xff] %v8997_v1 }
  0xcd   : > { %7008 = vmatprep.subr.bf16.mxu1 %v7660_v18  ;;  %10928 = vst [vmem:[#allocation90_spill] sm:$0xff] %v8727_v54  ;;  %v8735_v18 = vunpack.c.l.bf16 %v2036_v48  ;;  %v7658_v48 = vld [vmem:[#allocation8 + $0x228] sm:$0xff]   ;;  %v7666_v54 = vld [vmem:[#allocation8 + $0x270] sm:$0xff]   ;;  %10940 = vst [vmem:[#allocation102_spill] sm:$0xff] %v8788_v41 }
  0xce   : > { %v8733_v52 = vmax.bf16 %v8679_v62, %v2037_v21  ;;  %v7680_v41 = vld [vmem:[#allocation8 + $0x2f8] sm:$0xff]  }
  0xcf   : > { %6945 = vmatpush3.bf16.msra.mxu0 %v7641_v36  ;;  %10930 = vst [vmem:[#allocation92_spill] sm:$0xff] %v8735_v18  ;;  %v6359_v36 = vcombine.high %v8716_v42, %v8719_v26 }
  0xd0   : > { %10929 = vst [vmem:[#allocation91_spill] sm:$0xff] %v8733_v52  ;;  %6946 = vmatprep.subr.bf16.mxu0 %v7646_v39  ;;  %7009 = vmatpush3.bf16.msra.mxu1 %v7661_v11  ;;  %v7670_v39 = vld [vmem:[#allocation8 + $0x2e8] sm:$0xff]   ;;  %v8746_v11 = vunpack.c.l.bf16 %v2037_v21  ;;  %v8759_v21 = vld [vmem:[%s8193_s26 + $0x150] sm:$0xff] }
  0xd1   : > { %1934 = vmatmul.mubr.bf16.gmra.mrb[40].mxu0 %v6354_v59  ;;  %v6356_v59 = vcombine.low %v8676_v33, %v8679_v62  ;;  %10934 = vst [vmem:[#allocation96_spill] sm:$0xff] %v8759_v21  ;;  %7010 = vmatprep.subr.bf16.mxu1 %v7667_v47  ;;  %v6407_v62 = vcombine.high %v8741_v28, %v8744_v22  ;;  %v2040_v33 = vrot.slane %v8759_v21, 4 }
  0xd2   : > { %2513 = vmatmul.mubr.bf16.gmra.mrb[40].mxu1 %v6402_v35  ;;  %1941 = vmatprep.mubr.bf16.mxu0 %v6357_v56  ;;  %10933 = vst [vmem:[#allocation95_spill] sm:$0xff] %v8746_v11  ;;  %v6404_v35 = vcombine.low %v8682_v17, %v8685_v32  ;;  %v2039_v56 = vrot.slane %v8719_v26, 4  ;;  %v8770_v17 = vmax.bf16 %v8716_v42, %v2038_v34  ;;  %v8778_v11 = vld [vmem:[%s8193_s26 + $0x1d0] sm:$0xff]  ;;  %v8781_v32 = vld [vmem:[%s8193_s26 + $0x1d8] sm:$0xff]  ;;  %v8816_v34 = vld [vmem:[%s8193_s26 + $0x1e0] sm:$0xff] }
  0xd3   : > { %2520 = vmatprep.mubr.bf16.mxu1 %v6405_v12  ;;  %6947 = vmatpush3.bf16.msra.mxu0 %v7648_v2  ;;  %v8762_v12 = vld [vmem:[%s8193_s26 + $0x158] sm:$0xff]  ;;  %v7671_v2 = vld [vmem:[#allocation8 + $0x2a8] sm:$0xff]   ;;  %10938 = vst [vmem:[#allocation100_spill] sm:$0xff] %v8778_v11  ;;  %10939 = vst [vmem:[#allocation101_spill] sm:$0xff] %v8781_v32  ;;  %v8825_v57 = vunpack.c.l.bf16 %v2040_v33 }
  0xd4   : > { %10935 = vst [vmem:[#allocation97_spill] sm:$0xff] %v8762_v12  ;;  %6948 = vmatprep.subr.bf16.mxu0 %v7656_v37  ;;  %7011 = vmatpush3.bf16.msra.mxu1 %v7669_v58  ;;  %10936 = vst [vmem:[#allocation98_spill] sm:$0xff] %v8770_v17  ;;  %v8773_v18 = vmax.bf16 %v8719_v26, %v2039_v56  ;;  %v8790_v47 = vunpack.c.l.bf16 %v2039_v56  ;;  %v2041_v46 = vrot.slane %v8762_v12, 4  ;;  %v8799_v37 = vld [vmem:[%s8193_s26 + $0x168] sm:$0xff]  ;;  %v7677_v58 = vld [vmem:[#allocation8 + $0x2f0] sm:$0xff]  }
  0xd5   : > { %7012 = vmatprep.subr.bf16.mxu1 %v7670_v39  ;;  %v8796_v39 = vld [vmem:[%s8193_s26 + $0x160] sm:$0xff]  ;;  %10943 = vst [vmem:[#allocation105_spill] sm:$0xff] %v8799_v37  ;;  %v6409_v56 = vcombine.high %v8778_v11, %v8781_v32  ;;  %10946 = vst [vmem:[#allocation108_spill] sm:$0xff] %v8816_v34  ;;  %v8858_v17 = vld [vmem:[%s8193_s26 + $0x1f0] sm:$0xff]  ;;  %v10968_v60 = vcombine.low %v8759_v21, %v8762_v12 }
  0xd6   : > { %10937 = vst [vmem:[#allocation99_spill] sm:$0xff] %v8773_v18  ;;  %10941 = vst [vmem:[#allocation103_spill] sm:$0xff] %v8790_v47  ;;  %v8806_v47 = vmax.bf16 %v8759_v21, %v2040_v33  ;;  %v8811_v30 = vmax.bf16 %v8762_v12, %v2041_v46  ;;  %v8827_v18 = vunpack.c.l.bf16 %v2041_v46  ;;  %v8852_v33 = vld [vmem:[%s8193_s26 + $0x170] sm:$0xff] }
  0xd7   : > { %6949 = vmatpush3.bf16.msra.mxu0 %v7658_v48  ;;  %10942 = vst [vmem:[#allocation104_spill] sm:$0xff] %v8796_v39  ;;  %v7676_v48 = vld [vmem:[#allocation8 + $0x278] sm:$0xff]   ;;  %10947 = vst [vmem:[#allocation109_spill] sm:$0xff] %v8825_v57 }
  0xd8   : > { %10944 = vst [vmem:[#allocation106_spill] sm:$0xff] %v8806_v47  ;;  %6950 = vmatprep.subr.bf16.mxu0 %v7666_v54  ;;  %7013 = vmatpush3.bf16.msra.mxu1 %v7671_v2  ;;  %10945 = vst [vmem:[#allocation107_spill] sm:$0xff] %v8811_v30  ;;  %v8819_v54 = vld [vmem:[%s8193_s26 + $0x208] sm:$0xff]  ;;  %v2042_v2 = vrot.slane %v8796_v39, 4  ;;  %v2044_v47 = vrot.slane %v8852_v33, 4 }
  0xd9   : > { %1942 = vmatmul.mubr.bf16.gmra.mrb[44].mxu0 %v6356_v59  ;;  %v10731_v52 = vrot.slane %v8819_v54, 4  ;;  %10948 = vst [vmem:[#allocation110_spill] sm:$0xff] %v8827_v18  ;;  %7014 = vmatprep.subr.bf16.mxu1 %v7677_v58  ;;  %v7686_v58 = vld [vmem:[#allocation8 + $0x340] sm:$0xff]   ;;  %10950 = vst [vmem:[#allocation112_spill] sm:$0xff] %v8852_v33 }
  0xda   : > { %2521 = vmatmul.mubr.bf16.gmra.mrb[44].mxu1 %v6404_v35  ;;  %1949 = vmatprep.mubr.bf16.mxu0 %v6359_v36  ;;  %v7681_v36 = vld [vmem:[#allocation8 + $0x2b8] sm:$0xff]   ;;  %v2043_v35 = vrot.slane %v8799_v37, 4  ;;  %10952 = vst [vmem:[#allocation114_spill] sm:$0xff] %v8858_v17  ;;  %v8887_v18 = vunpack.c.l.bf16 %v2042_v2 }
  0xdb   : > { %2528 = vmatprep.mubr.bf16.mxu1 %v6407_v62  ;;  %6951 = vmatpush3.bf16.msra.mxu0 %v7668_v5  ;;  %v7678_v62 = vld [vmem:[#allocation8 + $0x238] sm:$0xff]   ;;  %v3253_v5 = vmax.bf16 %v8819_v54, %v10731_v52  ;;  %v8861_v52 = vmax.bf16 %v8796_v39, %v2042_v2 }
  0xdc   : > { %6952 = vmatprep.subr.bf16.mxu0 %v7676_v48  ;;  %7015 = vmatpush3.bf16.msra.mxu1 %v7679_v25  ;;  %v8864_v30 = vmax.bf16 %v8799_v37, %v2043_v35  ;;  %v8869_v25 = vld [vmem:[%s8193_s26 + $0x1f8] sm:$0xff]  ;;  %v8872_v48 = vld [vmem:[%s8193_s26 + $0x288] sm:$0xff]  ;;  %10958 = vst [vmem:[#allocation118_spill] sm:$0xff] %v8887_v18  ;;  %v8889_v46 = vunpack.c.l.bf16 %v2043_v35  ;;  %v8916_v35 = vld [vmem:[%s8193_s26 + $0x210] sm:$0xff]  ;;  %v8921_v18 = vunpack.c.l.bf16 %v2044_v47 }
  0xdd   : > { %7016 = vmatprep.subr.bf16.mxu1 %v7680_v41  ;;  %v3333_v59 = vunpack.c.l.bf16 %v3253_v5  ;;  %10953 = vst [vmem:[#allocation115_spill] sm:$0xff] %v8861_v52  ;;  %10955 = vst [vmem:[#allocation117_spill] sm:$0xff] %v8869_v25  ;;  %v10956_v41 = vcombine.low %v8716_v42, %v8719_v26  ;;  %v8919_v2 = vld [vmem:[%s8193_s26 + $0x218] sm:$0xff]  ;;  %v8941_v5 = vld [vmem:[%s8193_s26 + $0x220] sm:$0xff]  ;;  %v10969_v26 = vcombine.low %v8778_v11, %v8781_v32  ;;  %v2641_v11 = vunpack.c.l.bf16 %v10977_v50 }
  0xde   : > { %10954 = vst [vmem:[#allocation116_spill] sm:$0xff] %v8864_v30  ;;  %10959 = vst [vmem:[#allocation119_spill] sm:$0xff] %v8889_v46  ;;  %v8930_v52 = vld [vmem:[%s8193_s26 + $0x298] sm:$0xff]  ;;  %v10965_v46 = vrot.slane %v8819_v54, 4  ;;  %v8944_v30 = vld [vmem:[%s8193_s26 + $0x228] sm:$0xff] }
  0xdf   : > { %6953 = vmatpush3.bf16.msra.mxu0 %v7678_v62  ;;  %v8879_v57 = vmax.f32 %v8582_v29, %v3333_v59  ;;  %v10957_v62 = vcombine.low %v8741_v28, %v8744_v22  ;;  %v2045_v29 = vrot.slane %v8855_v16, 4  ;;  %v7711_v59 = vld [vmem:[#allocation8 + $0x3c0] sm:$0xff]   ;;  %10962 = vst [vmem:[#allocation121_spill] sm:$0xff] %v8921_v18 }
  0xe0   : > { %7017 = vmatpush3.bf16.msra.mxu1 %v7681_v36  ;;  %7066 = vmatprep.subr.bf16.mxu0 %v7686_v58  ;;  %v10960_v58 = vcombine.high %v8759_v21, %v8762_v12  ;;  %v3768_v36 = vrot.slane %v8872_v48, 4  ;;  %v3221_v18 = vunpack.c.l.bf16 %v10965_v46  ;;  %v8952_v42 = vld [vmem:[%s8193_s26 + $0x2a0] sm:$0xff]  ;;  %v8958_v46 = vld [vmem:[%s8193_s26 + $0x230] sm:$0xff]  ;;  %v9072_v12 = vld [vmem:[%s8193_s26 + $0x2e8] sm:$0xff]  ;;  %v10980_v21 = vcombine.low %v8796_v39, %v8799_v37 }
  0xe1   : > { %1950 = vmatmul.mubr.bf16.gmra.mrb[48].mxu0 %v10956_v41  ;;  %v8913_v41 = vld [vmem:[%s8193_s26 + $0x280] sm:$0xff]  ;;  %7130 = vmatprep.subr.bf16.mxu1 %v7711_v59  ;;  %v8932_v22 = vunpack.c.l.bf16 %v2045_v29  ;;  %v8935_v59 = vmax.bf16 %v8855_v16, %v2045_v29  ;;  %10975 = vst [vmem:[#allocation129_spill] sm:$0xff] %v9072_v12 }
  0xe2   : > { %2529 = vmatmul.mubr.bf16.gmra.mrb[48].mxu1 %v10957_v62  ;;  %1957 = vmatprep.mubr.bf16.mxu0 %v10960_v58  ;;  %v8902_v62 = vld [vmem:[%s8193_s26 + $0x200] sm:$0xff]  ;;  %v8908_v58 = vmax.bf16 %v8852_v33, %v2044_v47  ;;  %v3173_v47 = vunpack.c.l.bf16 %v8819_v54  ;;  %v3800_v28 = vunpack.c.l.bf16 %v3768_v36  ;;  %v8949_v29 = vmax.bf16 %v8872_v48, %v3768_v36 }
  0xe3   : > { %2536 = vmatprep.mubr.bf16.mxu1 %v6409_v56  ;;  %v8927_v56 = vld [vmem:[%s8193_s26 + $0x290] sm:$0xff]  ;;  %10963 = vst [vmem:[#allocation122_spill] sm:$0xff] %v8932_v22  ;;  %10964 = vst [vmem:[#allocation123_spill] sm:$0xff] %v8935_v59  ;;  %v3752_v22 = vunpack.c.l.bf16 %v8872_v48  ;;  %v9059_v32 = vld [vmem:[%s8193_s26 + $0x260] sm:$0xff] }
  0xe4   : > { %10961 = vst [vmem:[#allocation120_spill] sm:$0xff] %v8908_v58  ;;  %v8991_v58 = vld [vmem:[%s8193_s26 + $0x2c0] sm:$0xff]  ;;  %v9006_v49 = vadd.f32 %v3221_v18, %v3173_v47  ;;  %v9040_v47 = vld [vmem:[%s8193_s26 + $0x2d8] sm:$0xff]  ;;  %v9062_v18 = vld [vmem:[%s8193_s26 + $0x268] sm:$0xff] }
  0xe5   : > { %v9021_v36 = vadd.f32 %v3800_v28, %v3752_v22  ;;  %10973 = vst [vmem:[#allocation127_spill] sm:$0xff] %v9062_v18  ;;  %v3188_v22 = vrot.slane %v8902_v62, 4  ;;  %v10981_v28 = vcombine.low %v8816_v34, %v8833_v15 }
  0xe9   : > { %1958 = vmatmul.mubr.bf16.gmra.mrb[52].mxu0 %v10968_v60  ;;  %v10971_v60 = vcombine.high %v8796_v39, %v8799_v37  ;;  %v3751_v37 = vunpack.c.l.bf16 %v8913_v41  ;;  %v9118_v39 = vld [vmem:[%s8193_s26 + $0x270] sm:$0xff] }
  0xea   : > { %2537 = vmatmul.mubr.bf16.gmra.mrb[52].mxu1 %v10969_v26  ;;  %v10972_v26 = vcombine.high %v8816_v34, %v8833_v15  ;;  %10985 = vst [vmem:[#allocation130_spill] sm:$0xff] %v9118_v39 }
  0xeb   : > { %1965 = vmatprep.mubr.bf16.mxu0 %v10971_v60  ;;  %v9065_v60 = vld [vmem:[%s8193_s26 + $0x2e0] sm:$0xff] }
  0xec   : > { %2544 = vmatprep.mubr.bf16.mxu1 %v10972_v26  ;;  %10974 = vst [vmem:[#allocation128_spill] sm:$0xff] %v9065_v60  ;;  %v10976_v26 = vunpack.c.l.bf16 %v8513_v4  ;;  %v10978_v4 = vunpack.c.l.bf16 %v8523_v0 }
  0xee   : > { %v2078_v59 = vadd.f32 %v8659_v14, %v10976_v26  ;;  %v2657_v1 = vadd.f32 %v2641_v11, %v10978_v4  ;;  %v10979_v14 = vmov %v10977_v50  ;;  %v3172_v26 = vunpack.c.l.bf16 %v8902_v62 }
  0xef   : > { %v2673_v50 = vmax.bf16 %v8523_v0, %v10979_v14  ;;  %v3767_v0 = vrot.slane %v8913_v41, 4  ;;  %v10982_v4 = vcombine.high %v8852_v33, %v8855_v16  ;;  %v3252_v11 = vmax.bf16 %v8902_v62, %v3188_v22 }
  0xf0   : > { %v2126_v8 = vadd.f32 %v2078_v59, %v8221_v10  ;;  %v3220_v59 = vunpack.c.l.bf16 %v3188_v22 }
  0xf1   : > { %1966 = vmatmul.mubr.bf16.gmra.mrb[56].mxu0 %v10980_v21  ;;  %v10983_v21 = vcombine.high %v8858_v17, %v8869_v25  ;;  %v2753_v3 = vunpack.c.l.bf16 %v2673_v50  ;;  %v3799_v34 = vunpack.c.l.bf16 %v3767_v0  ;;  %v3332_v12 = vunpack.c.l.bf16 %v3252_v11  ;;  %v9239_v50 = vld [vmem:[%s8193_s26 + $0x318] sm:$0xff]  ;;  %v5183_v11 = vld [vmem:[%s10673_s1 + $0x10] sm:$0xff] }
  0xf2   : > { %2545 = vmatmul.mubr.bf16.gmra.mrb[56].mxu1 %v10981_v28  ;;  %1973 = vmatprep.mubr.bf16.mxu0 %v10982_v4  ;;  %v10984_v28 = vunpack.c.l.bf16 %v8641_v38  ;;  %v2705_v10 = vadd.f32 %v2657_v1, %v2126_v8  ;;  %v3236_v15 = vadd.f32 %v3220_v59, %v3172_v26  ;;  %v1549_v4 = vadd.f32 %v8322_v23, %v8292_v55  ;;  %v9131_v26 = vld [vmem:[%s8193_s26 + $0x2f0] sm:$0xff]  ;;  %v9134_v59 = vld [vmem:[%s8193_s26 + $0x2f8] sm:$0xff] }
  0xf3   : > { %2552 = vmatprep.mubr.bf16.mxu1 %v10983_v21  ;;  %v9121_v21 = vld [vmem:[%s8193_s26 + $0x278] sm:$0xff]  ;;  %v10987_v8 = vunpack.c.l.bf16 %v8296_v63  ;;  %v10988_v1 = vunpack.c.l.bf16 %v8272_v43  ;;  %10989 = vst [vmem:[#allocation132_spill] sm:$0xff] %v9131_v26  ;;  %10990 = vst [vmem:[#allocation133_spill] sm:$0xff] %v9134_v59  ;;  %v9280_v59 = vld [vmem:[%s8193_s26 + $0x3a8] sm:$0xff]  ;;  %v11010_v26 = vcombine.low %v8902_v62, %v8819_v54 }
  0xf4   : > { %v2190_v14 = vmax.f32 %v8227_v13, %v10984_v28  ;;  %10986 = vst [vmem:[#allocation131_spill] sm:$0xff] %v9121_v21  ;;  %v3831_v13 = vmax.bf16 %v8913_v41, %v3767_v0  ;;  %v3284_v23 = vadd.f32 %v3236_v15, %v2705_v10  ;;  %v10992_v15 = vunpack.c.l.bf16 %v8652_v27  ;;  %11009 = vst [vmem:[#allocation136_spill] sm:$0xff] %v9280_v59  ;;  %v9337_v59 = vld [vmem:[%s8193_s26 + $0x340] sm:$0xff] }
  0xf5   : > { %v1613_v22 = vmax.f32 %v10988_v1, %v10987_v8  ;;  %v10991_v8 = vunpack.c.l.bf16 %v8556_v20  ;;  %v10993_v10 = vrot.slane %v8567_v51, 4  ;;  %11019 = vst [vmem:[#allocation142_spill] sm:$0xff] %v9337_v59  ;;  %v7724_v59 = vld [vmem:[#allocation8 + $0x3d8] sm:$0xff]  }
  0xf6   : > { %v2769_v38 = vmax.f32 %v2190_v14, %v2753_v3  ;;  %v3815_v3 = vadd.f32 %v3799_v34, %v3751_v37  ;;  %v3911_v0 = vunpack.c.l.bf16 %v3831_v13  ;;  %v3285_v14 = vadd.f32 %v9006_v49, %v8580_v40  ;;  %v9245_v13 = vld [vmem:[%s8193_s26 + $0x398] sm:$0xff] }
  0xf7   : > { %v2080_v1 = vadd.f32 %v8669_v44, %v10991_v8  ;;  %v2192_v37 = vmax.f32 %v1613_v22, %v10992_v15  ;;  %v2643_v63 = vunpack.c.l.bf16 %v10993_v10  ;;  %v10995_v49 = vcombine.low %v8852_v33, %v8855_v16  ;;  %v7693_v16 = vld [vmem:[#allocation8 + $0x308] sm:$0xff]   ;;  %v9277_v33 = vld [vmem:[%s8193_s26 + $0x3a0] sm:$0xff] }
  0xf8   : > { %v3348_v43 = vmax.f32 %v2769_v38, %v3332_v12  ;;  %v9142_v28 = vadd.f32 %v3815_v3, %v3284_v23  ;;  %v10994_v12 = vmov %v10993_v10  ;;  %v10996_v44 = vcombine.low %v8858_v17, %v8869_v25  ;;  %v11002_v10 = vld [vmem:[#allocation23_spill] sm:$0xff]  ;;  %v9263_v25 = vld [vmem:[%s8193_s26 + $0x320] sm:$0xff] }
  0xf9   : > { %v2675_v38 = vmax.bf16 %v8567_v51, %v10994_v12  ;;  %1974 = vmatmul.mubr.bf16.gmra.mrb[60].mxu0 %v10995_v49  ;;  %v9166_v20 = vadd.f32 %v9021_v36, %v3285_v14  ;;  %v10997_v40 = vunpack.c.l.bf16 %v8949_v29  ;;  %v2128_v22 = vadd.f32 %v2080_v1, %v1549_v4  ;;  %v9185_v4 = vld [vmem:[%s8193_s26 + $0x300] sm:$0xff]  ;;  %v7714_v14 = vld [vmem:[#allocation8 + $0x3c8] sm:$0xff]  }
  0xfa   : > { %v9151_v34 = vmax.f32 %v3348_v43, %v3911_v0  ;;  %2553 = vmatmul.mubr.bf16.gmra.mrb[60].mxu1 %v10996_v44  ;;  %v3190_v23 = vrot.slane %v8916_v35, 4  ;;  %v10998_v3 = vcombine.high %v8902_v62, %v8819_v54  ;;  %v10999_v43 = vcombine.high %v8913_v41, %v8872_v48  ;;  %11001 = vst [vmem:[#allocation134_spill] sm:$0xff] %v9185_v4  ;;  %v7687_v49 = vld [vmem:[#allocation8 + $0x300] sm:$0xff]   ;;  %v9203_v44 = vld [vmem:[%s8193_s26 + $0x308] sm:$0xff] }
  0xfb   : > { %v9171_v27 = vmax.f32 %v8879_v57, %v10997_v40  ;;  %v11000_v36 = vunpack.c.l.bf16 %v8567_v51  ;;  %v2755_v0 = vunpack.c.l.bf16 %v2675_v38  ;;  %v9194_v15 = vadd.f32 %v8324_v24, %v8303_v6  ;;  %v11004_v51 = vld [vmem:[#allocation22_spill] sm:$0xff]  ;;  %11006 = vst [vmem:[#allocation23_spill] sm:$0xff] %v9203_v44  ;;  %v9242_v57 = vld [vmem:[%s8193_s26 + $0x390] sm:$0xff]  ;;  %v9274_v17 = vld [vmem:[%s8193_s26 + $0x328] sm:$0xff] }
  0xfc   : > { %3075 = vmatprep.mubr.bf16.mxu0 %v10998_v3  ;;  %3654 = vmatprep.mubr.bf16.mxu1 %v10999_v43  ;;  %v9187_v8 = vunpack.c.l.bf16 %v3190_v23  ;;  %v9190_v1 = vmax.bf16 %v8916_v35, %v3190_v23  ;;  %v11003_v12 = vunpack.c.l.bf16 %v11002_v10  ;;  %v9206_v40 = vld [vmem:[%s8193_s26 + $0x380] sm:$0xff]  ;;  %v9209_v3 = vld [vmem:[%s8193_s26 + $0x388] sm:$0xff]  ;;  %v4346_v43 = vrot.slane %v9185_v4, 4  ;;  %v5184_v23 = vld [vmem:[%s10673_s1 + $0x18] sm:$0xff]  ;;  %11008 = vst [vmem:[#allocation135_spill] sm:$0xff] %v9274_v17 }
  0xfd   : > { %v2659_v29 = vadd.f32 %v2643_v63, %v11000_v36  ;;  %v11005_v63 = vunpack.c.l.bf16 %v11004_v51  ;;  %v9215_v24 = vmax.f32 %v2192_v37, %v2755_v0  ;;  %v7692_v36 = vld [vmem:[#allocation8 + $0x348] sm:$0xff]   ;;  %v4347_v51 = vrot.slane %v9203_v44, 4  ;;  %v7713_v0 = vld [vmem:[#allocation8 + $0x380] sm:$0xff]  }
  0xfe   : > { %v5182_v37 = vld [vmem:[%s10673_s1 + $0x8] sm:$0xff]  ;;  %v5185_v62 = vld [vmem:[%s10673_s1 + $0x20] sm:$0xff]  ;;  %v4410_v21 = vmax.bf16 %v9185_v4, %v4346_v43  ;;  %v11043_v60 = vunpack.c.l.bf16 %v9206_v40 }
  0xff   : > { %v9200_v38 = vmax.f32 %v11005_v63, %v11003_v12  ;;  %v9213_v6 = vadd.f32 %v2659_v29, %v2128_v22  ;;  %v5181_v22 = vld [vmem:[%s10673_s1] sm:$0xff]  ;;  %v9230_v29 = vld [vmem:[%s8193_s26 + $0x310] sm:$0xff]  ;;  %v9247_v12 = vunpack.c.l.bf16 %v4347_v51  ;;  %v9250_v10 = vmax.bf16 %v9203_v44, %v4347_v51  ;;  %v9345_v54 = vld [vmem:[%s8193_s26 + $0x348] sm:$0xff] }
 0x100   : > { %v9252_v55 = vpack.c.bf16 %v5182_v37, %v5181_v22  ;;  %v9271_v63 = vpack.c.bf16 %v5184_v23, %v5183_v11  ;;  %v11011_v51 = vcombine.low %v8913_v41, %v8872_v48  ;;  %v7698_v37 = vld [vmem:[#allocation8 + $0x350] sm:$0xff]   ;;  %v5186_v48 = vld [vmem:[%s10673_s1 + $0x28] sm:$0xff]  ;;  %v9312_v23 = vld [vmem:[%s8193_s26 + $0x338] sm:$0xff]  ;;  %11021 = vst [vmem:[#allocation144_spill] sm:$0xff] %v9345_v54  ;;  %v4490_v17 = vunpack.c.l.bf16 %v4410_v21 }
 0x101   : > { %3076 = vmatmul.mubr.bf16.vlgmr.msra.gmra.mrb[64].mxu0 %v11010_v26  ;;  %v9302_v41 = vld [vmem:[%s8193_s26 + $0x330] sm:$0xff]  ;;  %v11013_v26 = vcombine.high %v8916_v35, %v8919_v2  ;;  %v9309_v22 = vpack.c.bf16 %v5186_v48, %v5185_v62  ;;  %11015 = vst [vmem:[#allocation139_spill] sm:$0xff] %v9312_v23  ;;  %v9348_v62 = vld [vmem:[%s8193_s26 + $0x3c0] sm:$0xff]  ;;  %v9351_v23 = vld [vmem:[%s8193_s26 + $0x3c8] sm:$0xff] }
 0x102   : > { %11007 = vst [vmem:[#allocation22_spill] sm:$0xff] %v9271_v63  ;;  %3655 = vmatmul.mubr.bf16.vlgmr.msra.gmra.mrb[64].mxu1 %v11011_v51  ;;  %11012 = vst [vmem:[#allocation137_spill] sm:$0xff] %v9302_v41  ;;  %7067 = vmatpush3.bf16.msra.mxu0 %v7687_v49  ;;  %v7715_v51 = vld [vmem:[#allocation8 + $0x388] sm:$0xff]   ;;  %v9315_v11 = vld [vmem:[%s8193_s26 + $0x3b0] sm:$0xff]  ;;  %v4378_v49 = vunpack.c.l.bf16 %v4346_v43  ;;  %v11024_v41 = vunpack.c.l.bf16 %v9185_v4 }
 0x103   : > { %3083 = vmatprep.mubr.bf16.mxu0 %v11013_v26  ;;  %11014 = vst [vmem:[#allocation138_spill] sm:$0xff] %v9309_v22  ;;  %11016 = vst [vmem:[#allocation140_spill] sm:$0xff] %v9315_v11  ;;  %v9318_v63 = vld [vmem:[%s8193_s26 + $0x3b8] sm:$0xff]  ;;  %v11018_v26 = vcombine.high %v8927_v56, %v8930_v52  ;;  %7068 = vmatprep.subr.bf16.mxu0 %v7692_v36  ;;  %v5187_v22 = vld [vmem:[%s10673_s1 + $0x30] sm:$0xff] }
 0x104   : > { %11017 = vst [vmem:[#allocation141_spill] sm:$0xff] %v9318_v63  ;;  %v5188_v43 = vld [vmem:[%s10673_s1 + $0x38] sm:$0xff]  ;;  %7131 = vmatpush3.bf16.msra.mxu1 %v7713_v0  ;;  %11022 = vst [vmem:[#allocation145_spill] sm:$0xff] %v9348_v62  ;;  %v4394_v39 = vadd.f32 %v4378_v49, %v11024_v41  ;;  %v7699_v36 = vld [vmem:[#allocation8 + $0x310] sm:$0xff]   ;;  %v4506_v62 = vmax.f32 %v9151_v34, %v4490_v17 }
 0x105   : > { %3662 = vmatprep.mubr.bf16.mxu1 %v11018_v26  ;;  %v9342_v48 = vpack.c.bf16 %v5188_v43, %v5187_v22  ;;  %11023 = vst [vmem:[#allocation146_spill] sm:$0xff] %v9351_v23  ;;  %7132 = vmatprep.subr.bf16.mxu1 %v7714_v14  ;;  %v7721_v0 = vld [vmem:[#allocation8 + $0x3d0] sm:$0xff]   ;;  %v5189_v21 = vld [vmem:[%s10673_s1 + $0x40] sm:$0xff]  ;;  %v5190_v14 = vld [vmem:[%s10673_s1 + $0x48] sm:$0xff] }
 0x106   : > { %v9370_v41 = vld [vmem:[%s8193_s26 + $0x350] sm:$0xff]  ;;  %7069 = vmatpush3.bf16.msra.mxu0 %v7693_v16  ;;  %v7704_v49 = vld [vmem:[#allocation8 + $0x358] sm:$0xff]   ;;  %v9372_v43 = vpack.c.bf16 %v5190_v14, %v5189_v21  ;;  %v4442_v23 = vadd.f32 %v4394_v39, %v9142_v28  ;;  %v4925_v16 = vrot.slane %v9206_v40, 4  ;;  %v9401_v28 = vld [vmem:[%s8193_s26 + $0x360] sm:$0xff] }
 0x107   : > { %11020 = vst [vmem:[#allocation143_spill] sm:$0xff] %v9342_v48  ;;  %11025 = vst [vmem:[#allocation147_spill] sm:$0xff] %v9370_v41  ;;  %v7723_v22 = vld [vmem:[#allocation8 + $0x390] sm:$0xff]   ;;  %v9375_v26 = vld [vmem:[%s8193_s26 + $0x358] sm:$0xff]  ;;  %7070 = vmatprep.subr.bf16.mxu0 %v7698_v37  ;;  %v11039_v41 = vrot.slane %v9209_v3, 4 }
 0x108   : > { %11026 = vst [vmem:[#allocation148_spill] sm:$0xff] %v9372_v43  ;;  %11027 = vst [vmem:[#allocation149_spill] sm:$0xff] %v9375_v26  ;;  %v9378_v54 = vld [vmem:[%s8193_s26 + $0x3d0] sm:$0xff]  ;;  %v9381_v48 = vld [vmem:[%s8193_s26 + $0x3d8] sm:$0xff]  ;;  %7133 = vmatpush3.bf16.msra.mxu1 %v7715_v51  ;;  %v4957_v63 = vunpack.c.l.bf16 %v4925_v16  ;;  %v4989_v21 = vmax.bf16 %v9206_v40, %v4925_v16  ;;  %v11036_v26 = vcombine.low %v8916_v35, %v8919_v2 }
 0x109   : > { %11028 = vst [vmem:[#allocation150_spill] sm:$0xff] %v9378_v54  ;;  %11029 = vst [vmem:[#allocation151_spill] sm:$0xff] %v9381_v48  ;;  %v5191_v17 = vld [vmem:[%s10673_s1 + $0x50] sm:$0xff]  ;;  %v5192_v39 = vld [vmem:[%s10673_s1 + $0x58] sm:$0xff]  ;;  %v11035_v48 = vunpack.c.l.bf16 %v9203_v44  ;;  %v11037_v51 = vcombine.low %v8927_v56, %v8930_v52  ;;  %7134 = vmatprep.subr.bf16.mxu1 %v7721_v0 }
 0x10a   : > { %11030 = vst [vmem:[#allocation152_spill] sm:$0xff] %v9401_v28  ;;  %v9403_v34 = vpack.c.bf16 %v5192_v39, %v5191_v17  ;;  %v9406_v37 = vld [vmem:[%s8193_s26 + $0x368] sm:$0xff]  ;;  %v9409_v43 = vld [vmem:[%s8193_s26 + $0x3e0] sm:$0xff]  ;;  %3084 = vmatmul.mubr.bf16.gmra.mrb[68].mxu0 %v11036_v26  ;;  %v7705_v17 = vld [vmem:[#allocation8 + $0x318] sm:$0xff]   ;;  %v11040_v39 = vcombine.high %v8941_v5, %v8944_v30  ;;  %v5069_v18 = vunpack.c.l.bf16 %v4989_v21 }
 0x10b   : > { %11032 = vst [vmem:[#allocation154_spill] sm:$0xff] %v9406_v37  ;;  %11033 = vst [vmem:[#allocation155_spill] sm:$0xff] %v9409_v43  ;;  %v9412_v14 = vld [vmem:[%s8193_s26 + $0x3e8] sm:$0xff]  ;;  %v4395_v54 = vadd.f32 %v9247_v12, %v11035_v48  ;;  %3663 = vmatmul.mubr.bf16.gmra.mrb[68].mxu1 %v11037_v51  ;;  %v5193_v48 = vld [vmem:[%s10673_s1 + $0x60] sm:$0xff]  ;;  %v11041_v12 = vcombine.high %v8952_v42, %v8955_v7  ;;  %7071 = vmatpush3.bf16.msra.mxu0 %v7699_v36  ;;  %v11045_v43 = vunpack.c.l.bf16 %v9250_v10 }
 0x10c   : > { %11031 = vst [vmem:[#allocation153_spill] sm:$0xff] %v9403_v34  ;;  %11034 = vst [vmem:[#allocation156_spill] sm:$0xff] %v9412_v14  ;;  %v5194_v26 = vld [vmem:[%s10673_s1 + $0x68] sm:$0xff]  ;;  %v9437_v51 = vld [vmem:[%s8193_s26 + $0x370] sm:$0xff]  ;;  %v4958_v34 = vunpack.c.l.bf16 %v11039_v41  ;;  %3091 = vmatprep.mubr.bf16.mxu0 %v11040_v39  ;;  %v4973_v39 = vadd.f32 %v4957_v63, %v11043_v60  ;;  %v3334_v63 = vunpack.c.l.bf16 %v9190_v1  ;;  %7072 = vmatprep.subr.bf16.mxu0 %v7704_v49 }
 0x10d   : > { %11038 = vst [vmem:[#allocation157_spill] sm:$0xff] %v9437_v51  ;;  %3670 = vmatprep.mubr.bf16.mxu1 %v11041_v12  ;;  %v7710_v16 = vld [vmem:[#allocation8 + $0x360] sm:$0xff]   ;;  %v7725_v37 = vld [vmem:[#allocation8 + $0x398] sm:$0xff]   ;;  %v9449_v11 = vpack.c.bf16 %v5194_v26, %v5193_v48  ;;  %v9455_v4 = vld [vmem:[%s8193_s26 + $0x3f0] sm:$0xff]  ;;  %7135 = vmatpush3.bf16.msra.mxu1 %v7723_v22  ;;  %v11044_v48 = vrot.slane %v8927_v56, 4  ;;  %v5085_v51 = vmax.f32 %v4506_v62, %v5069_v18  ;;  %v11046_v22 = vunpack.c.l.bf16 %v9209_v3 }
 0x10e   : > { %v9452_v44 = vld [vmem:[%s8193_s26 + $0x378] sm:$0xff]  ;;  %v5195_v26 = vld [vmem:[%s10673_s1 + $0x70] sm:$0xff]  ;;  %v5021_v21 = vadd.f32 %v4973_v39, %v4442_v23  ;;  %v7712_v12 = vld [vmem:[#allocation8 + $0x320] sm:$0xff]   ;;  %7136 = vmatprep.subr.bf16.mxu1 %v7724_v59  ;;  %v4443_v14 = vadd.f32 %v4395_v54, %v9166_v20  ;;  %v4507_v1 = vmax.f32 %v9171_v27, %v11045_v43  ;;  %v11047_v23 = vrot.slane %v9209_v3, 4 }
 0x10f   : > { %11042 = vst [vmem:[#allocation158_spill] sm:$0xff] %v9452_v44  ;;  %v9458_v41 = vld [vmem:[%s8193_s26 + $0x3f8] sm:$0xff]  ;;  %v3801_v28 = vunpack.c.l.bf16 %v11044_v48  ;;  %v7731_v44 = vld [vmem:[#allocation8 + $0x3e0] sm:$0xff]   ;;  %v4974_v49 = vadd.f32 %v4958_v34, %v11046_v22  ;;  %v7720_v36 = vld [vmem:[#allocation8 + $0x368] sm:$0xff]   ;;  %v11048_v59 = vunpack.c.l.bf16 %v8916_v35  ;;  %v3350_v20 = vmax.f32 %v9215_v24, %v3334_v63  ;;  %7073 = vmatpush3.bf16.msra.mxu0 %v7705_v17 }
 0x110   : > { %v5196_v60 = vld [vmem:[%s10673_s1 + $0x78] sm:$0xff]  ;;  %v4990_v39 = vmax.bf16 %v9209_v3, %v11047_v23  ;;  %v11049_v27 = vunpack.c.l.bf16 %v8927_v56  ;;  %v11050_v62 = vmov %v11044_v48  ;;  %v4332_v34 = vunpack.c.l.bf16 %v9230_v29  ;;  %7074 = vmatprep.subr.bf16.mxu0 %v7710_v16  ;;  %v7734_v48 = vld [vmem:[#allocation8 + $0x3e8] sm:$0xff]  }
 0x111   : > { %v9477_v0 = vpack.c.bf16 %v5196_v60, %v5195_v26  ;;  %v7733_v26 = vld [vmem:[#allocation8 + $0x3a0] sm:$0xff]   ;;  %v5133_v60 = vmul.f32 0.0625, %v5021_v21  ;;  %v3238_v18 = vadd.f32 %v9187_v8, %v11048_v59  ;;  %v5022_v10 = vadd.f32 %v4974_v49, %v4443_v14  ;;  %7137 = vmatpush3.bf16.msra.mxu1 %v7725_v37  ;;  %v7735_v22 = vld [vmem:[#allocation8 + $0x3a8] sm:$0xff]  }
 0x112   : > { %v3817_v54 = vadd.f32 %v3801_v28, %v11049_v27  ;;  %v3833_v43 = vmax.bf16 %v8927_v56, %v11050_v62  ;;  %v5070_v35 = vunpack.c.l.bf16 %v4990_v39  ;;  %v4348_v24 = vrot.slane %v9230_v29, 4  ;;  %v7722_v56 = vld [vmem:[#allocation8 + $0x328] sm:$0xff]   ;;  %7138 = vmatprep.subr.bf16.mxu1 %v7731_v44 }
 0x113   : > { %v9500_v21 = vadd.f32 %v5133_v60, %v5085_v51  ;;  %v3286_v8 = vadd.f32 %v3238_v18, %v9213_v6  ;;  %v11051_v14 = vcombine.low %v8941_v5, %v8944_v30  ;;  %v11052_v28 = vcombine.low %v8952_v42, %v8955_v7  ;;  %v7730_v30 = vld [vmem:[#allocation8 + $0x370] sm:$0xff]   ;;  %7075 = vmatpush3.bf16.msra.mxu0 %v7712_v12  ;;  %v11057_v62 = vld [vmem:[#allocation79_spill] sm:$0xff] }
 0x114   : > { %v5134_v17 = vmul.f32 0.0625, %v5022_v10  ;;  %v3913_v16 = vunpack.c.l.bf16 %v3833_v43  ;;  %v4911_v37 = vunpack.c.l.bf16 %v9242_v57  ;;  %v4927_v51 = vrot.slane %v9242_v57, 4  ;;  %v11055_v10 = vld [vmem:[#allocation59_spill] sm:$0xff]  ;;  %7076 = vmatprep.subr.bf16.mxu0 %v7720_v36  ;;  %v7858_v36 = vld [vmem:[%s8193_s26 + $0x198] sm:$0xff] }
 0x115   : > { %3092 = vmatmul.mubr.bf16.gmra.mrb[72].mxu0 %v11051_v14  ;;  %3671 = vmatmul.mubr.bf16.gmra.mrb[72].mxu1 %v11052_v28  ;;  %v11053_v6 = vcombine.high %v8958_v46, %v8961_v61  ;;  %v11054_v63 = vcombine.high %v8971_v53, %v8974_v31  ;;  %v5086_v49 = vmax.f32 %v4507_v1, %v5070_v35  ;;  %v4380_v60 = vunpack.c.l.bf16 %v4348_v24  ;;  %v11058_v35 = vld [vmem:[#allocation78_spill] sm:$0xff]  ;;  %v11060_v28 = vld [vmem:[#allocation61_spill] sm:$0xff] }
 0x116   : > { %v3865_v7 = vadd.f32 %v3817_v54, %v3286_v8  ;;  %v4412_v23 = vmax.bf16 %v9230_v29, %v4348_v24  ;;  %v3929_v39 = vmax.f32 %v3350_v20, %v3913_v16  ;;  %v4959_v59 = vunpack.c.l.bf16 %v4927_v51  ;;  %7139 = vmatpush3.bf16.msra.mxu1 %v7733_v26 }
 0x117   : > { %3099 = vmatprep.mubr.bf16.mxu0 %v11053_v6  ;;  %3678 = vmatprep.mubr.bf16.mxu1 %v11054_v63  ;;  %v4991_v18 = vmax.bf16 %v9242_v57, %v4927_v51  ;;  %v11056_v27 = vunpack.c.l.bf16 %v11055_v10  ;;  %v9523_v14 = vadd.f32 %v5134_v17, %v5086_v49  ;;  %v4396_v1 = vadd.f32 %v4380_v60, %v4332_v34  ;;  %v7732_v49 = vld [vmem:[#allocation8 + $0x330] sm:$0xff]  }
 0x118   : > { %v4492_v54 = vunpack.c.l.bf16 %v4412_v23  ;;  %v11059_v8 = vunpack.c.l.bf16 %v11058_v35  ;;  %7140 = vmatprep.subr.bf16.mxu1 %v7734_v48  ;;  %v4975_v44 = vadd.f32 %v4959_v59, %v4911_v37  ;;  %v11061_v16 = vrot.slane %v11060_v28, 4  ;;  %7077 = vmatpush3.bf16.msra.mxu0 %v7722_v56  ;;  %v7741_v60 = vld [vmem:[#allocation8 + $0x3f0] sm:$0xff]  }
 0x119   : > { %v2081_v43 = vadd.f32 %v11057_v62, %v11056_v27  ;;  %v5071_v20 = vunpack.c.l.bf16 %v4991_v18  ;;  %v4444_v6 = vadd.f32 %v4396_v1, %v3865_v7  ;;  %v3175_v34 = vunpack.c.l.bf16 %v8919_v2  ;;  %7078 = vmatprep.subr.bf16.mxu0 %v7730_v30  ;;  %v7740_v7 = vld [vmem:[#allocation8 + $0x378] sm:$0xff]  }
 0x11a   : > { %v2193_v12 = vmax.f32 %v9200_v38, %v11059_v8  ;;  %v2644_v51 = vunpack.c.l.bf16 %v11061_v16  ;;  %v4508_v63 = vmax.f32 %v3929_v39, %v4492_v54  ;;  %v11062_v26 = vmov %v11061_v16  ;;  %7141 = vmatpush3.bf16.msra.mxu1 %v7735_v22  ;;  %v7743_v39 = vld [vmem:[#allocation8 + $0x3b0] sm:$0xff]  }
 0x11b   : > { %v2129_v24 = vadd.f32 %v2081_v43, %v9194_v15  ;;  %v2676_v17 = vmax.bf16 %v7858_v36, %v11062_v26  ;;  %v11063_v38 = vunpack.c.l.bf16 %v11060_v28  ;;  %v3191_v37 = vrot.slane %v8919_v2, 4  ;;  %v7744_v43 = vld [vmem:[#allocation8 + $0x3f8] sm:$0xff]   ;;  %v11067_v8 = vld [vmem:[#allocation124_spill] sm:$0xff]  ;;  %7142 = vmatprep.subr.bf16.mxu1 %v7741_v60 }
 0x11c   : > { %v3754_v15 = vunpack.c.l.bf16 %v8930_v52  ;;  %v3770_v23 = vrot.slane %v8930_v52, 4  ;;  %v5023_v59 = vadd.f32 %v4975_v44, %v4444_v6  ;;  %v5087_v18 = vmax.f32 %v4508_v63, %v5071_v20  ;;  %7079 = vmatpush3.bf16.msra.mxu0 %v7732_v49  ;;  %v11069_v49 = vld [vmem:[#allocation25_spill] sm:$0xff] }
 0x11d   : > { %v2660_v48 = vadd.f32 %v2644_v51, %v11063_v38  ;;  %v2756_v10 = vunpack.c.l.bf16 %v2676_v17  ;;  %v4333_v56 = vunpack.c.l.bf16 %v9239_v50  ;;  %v11064_v27 = vcombine.low %v8958_v46, %v8961_v61  ;;  %7080 = vmatprep.subr.bf16.mxu0 %v7740_v7  ;;  %v7745_v51 = vld [vmem:[#allocation8 + $0x3b8] sm:$0xff]  }
 0x11e   : > { %v11065_v62 = vcombine.low %v8971_v53, %v8974_v31  ;;  %v3223_v54 = vunpack.c.l.bf16 %v3191_v37  ;;  %v3255_v30 = vmax.bf16 %v8919_v2, %v3191_v37  ;;  %v3802_v22 = vunpack.c.l.bf16 %v3770_v23  ;;  %v7742_v31 = vld [vmem:[#allocation8 + $0x338] sm:$0xff]   ;;  %7143 = vmatpush3.bf16.msra.mxu1 %v7743_v39  ;;  %v11071_v37 = vld [vmem:[#allocation27_spill] sm:$0xff] }
 0x11f   : > { %3100 = vmatmul.mubr.bf16.gmra.mrb[76].mxu0 %v11064_v27  ;;  %v2708_v1 = vadd.f32 %v2660_v48, %v2129_v24  ;;  %v11066_v35 = vcombine.high %v8977_v45, %v8980_v9  ;;  %v11068_v44 = vcombine.high %v8991_v58, %v11067_v8  ;;  %v5135_v61 = vmul.f32 0.0625, %v5023_v59  ;;  %7144 = vmatprep.subr.bf16.mxu1 %v7744_v43  ;;  %v11075_v59 = vld [vmem:[#allocation68_spill] sm:$0xff] }
 0x120   : > { %3679 = vmatmul.mubr.bf16.gmra.mrb[76].mxu1 %v11065_v62  ;;  %v2772_v46 = vmax.f32 %v2193_v12, %v2756_v10  ;;  %v3834_v20 = vmax.bf16 %v8930_v52, %v3770_v23  ;;  %v4349_v53 = vrot.slane %v9239_v50, 4  ;;  %v3239_v24 = vadd.f32 %v3223_v54, %v3175_v34  ;;  %v11070_v34 = vld [vmem:[#allocation32_spill] sm:$0xff]  ;;  %7081 = vmatpush3.bf16.msra.mxu0 %v7742_v31 }
 0x121   : > { %3107 = vmatprep.mubr.bf16.mxu0 %v11066_v35  ;;  %3686 = vmatprep.mubr.bf16.mxu1 %v11068_v44  ;;  %v3335_v2 = vunpack.c.l.bf16 %v3255_v30  ;;  %v3818_v28 = vadd.f32 %v3802_v22, %v3754_v15  ;;  %v4912_v16 = vunpack.c.l.bf16 %v9245_v13  ;;  %v9557_v6 = vadd.f32 %v5135_v61, %v5087_v18  ;;  %v11073_v23 = vld [vmem:[#allocation24_spill] sm:$0xff] }
 0x122   : > { %v3914_v63 = vunpack.c.l.bf16 %v3834_v20  ;;  %v4381_v36 = vunpack.c.l.bf16 %v4349_v53  ;;  %v4413_v12 = vmax.bf16 %v9239_v50, %v4349_v53  ;;  %v3287_v52 = vadd.f32 %v3239_v24, %v2708_v1  ;;  %v11077_v10 = vld [vmem:[#allocation88_spill] sm:$0xff]  ;;  %7145 = vmatpush3.bf16.msra.mxu1 %v7745_v51  ;;  %7422 = vmatprep.subr.bf16.mxu0 %v9252_v55  ;;  %v7859_v20 = vld [vmem:[%s8193_s26 + $0x1a0] sm:$0xff] }
 0x123   : > { %v3351_v26 = vmax.f32 %v2772_v46, %v3335_v2  ;;  %v4928_v17 = vrot.slane %v9245_v13, 4  ;;  %v1551_v60 = vadd.f32 %v11070_v34, %v11069_v49  ;;  %v11072_v15 = vunpack.c.l.bf16 %v11071_v37  ;;  %v11078_v30 = vld [vmem:[#allocation84_spill] sm:$0xff] }
 0x124   : > { %v4397_v38 = vadd.f32 %v4381_v36, %v4333_v56  ;;  %v4493_v48 = vunpack.c.l.bf16 %v4413_v12  ;;  %v11074_v7 = vunpack.c.l.bf16 %v11073_v23  ;;  %v11076_v18 = vunpack.c.l.bf16 %v11075_v59  ;;  %v11080_v44 = vld [vmem:[#allocation72_spill] sm:$0xff]  ;;  %v11085_v12 = vld [vmem:[#allocation125_spill] sm:$0xff] }
 0x125   : > { %v3866_v62 = vadd.f32 %v3818_v28, %v3287_v52  ;;  %v3930_v43 = vmax.f32 %v3351_v26, %v3914_v63  ;;  %v4960_v1 = vunpack.c.l.bf16 %v4928_v17  ;;  %v4992_v54 = vmax.bf16 %v9245_v13, %v4928_v17  ;;  %v11086_v52 = vld [vmem:[#allocation126_spill] sm:$0xff] }
 0x126   : > { %v1615_v39 = vmax.f32 %v11074_v7, %v11072_v15  ;;  %v2082_v27 = vadd.f32 %v11077_v10, %v11076_v18  ;;  %v11079_v22 = vunpack.c.l.bf16 %v11078_v30  ;;  %v11081_v61 = vrot.slane %v11080_v44, 4 }
 0x127   : > { %v11083_v31 = vcombine.low %v8977_v45, %v8980_v9  ;;  %v11084_v2 = vcombine.low %v8991_v58, %v11067_v8  ;;  %v4445_v28 = vadd.f32 %v4397_v38, %v3866_v62  ;;  %v4509_v51 = vmax.f32 %v3930_v43, %v4493_v48 }
 0x128   : > { %v2130_v56 = vadd.f32 %v2082_v27, %v1551_v60  ;;  %v2194_v35 = vmax.f32 %v1615_v39, %v11079_v22  ;;  %v2645_v46 = vunpack.c.l.bf16 %v11081_v61  ;;  %v11082_v53 = vmov %v11081_v61 }
 0x129   : > { %v2677_v24 = vmax.bf16 %v7859_v20, %v11082_v53  ;;  %3108 = vmatmul.mubr.bf16.gmra.mrb[80].mxu0 %v11083_v31  ;;  %3687 = vmatmul.mubr.bf16.gmra.mrb[80].mxu1 %v11084_v2  ;;  %v4976_v63 = vadd.f32 %v4960_v1, %v4912_v16  ;;  %v5072_v36 = vunpack.c.l.bf16 %v4992_v54  ;;  %v11087_v26 = vcombine.high %v11085_v12, %v11086_v52  ;;  %v11092_v53 = vld [vmem:[#allocation28_spill] sm:$0xff]  ;;  %v11094_v2 = vld [vmem:[#allocation29_spill] sm:$0xff] }
 0x12a   : > { %v11088_v17 = vcombine.high %v9029_v19, %v9040_v47  ;;  %v11089_v49 = vunpack.c.l.bf16 %v11080_v44  ;;  %v3176_v34 = vunpack.c.l.bf16 %v8941_v5  ;;  %v3192_v58 = vrot.slane %v8941_v5, 4 }
 0x12b   : > { %3115 = vmatprep.mubr.bf16.mxu0 %v11087_v26  ;;  %v2757_v9 = vunpack.c.l.bf16 %v2677_v24  ;;  %v5024_v8 = vadd.f32 %v4976_v63, %v4445_v28  ;;  %v5088_v60 = vmax.f32 %v4509_v51, %v5072_v36  ;;  %v3755_v16 = vunpack.c.l.bf16 %v8952_v42  ;;  %v11093_v24 = vld [vmem:[#allocation33_spill] sm:$0xff]  ;;  %v11096_v51 = vld [vmem:[#allocation26_spill] sm:$0xff]  ;;  %v11098_v26 = vld [vmem:[#allocation127_spill] sm:$0xff] }
 0x12c   : > { %3694 = vmatprep.mubr.bf16.mxu1 %v11088_v17  ;;  %v2661_v45 = vadd.f32 %v2645_v46, %v11089_v49  ;;  %v3771_v38 = vrot.slane %v8952_v42, 4  ;;  %v3224_v15 = vunpack.c.l.bf16 %v3192_v58  ;;  %v3256_v23 = vmax.bf16 %v8941_v5, %v3192_v58  ;;  %v11101_v17 = vld [vmem:[#allocation129_spill] sm:$0xff] }
 0x12d   : > { %v2773_v37 = vmax.f32 %v2194_v35, %v2757_v9  ;;  %v5136_v7 = vmul.f32 0.0625, %v5024_v8  ;;  %v4334_v18 = vunpack.c.l.bf16 %v9263_v25  ;;  %v4350_v62 = vrot.slane %v9263_v25, 4  ;;  %v11103_v8 = vld [vmem:[#allocation71_spill] sm:$0xff] }
 0x12e   : > { %v2709_v48 = vadd.f32 %v2661_v45, %v2130_v56  ;;  %v3803_v39 = vunpack.c.l.bf16 %v3771_v38  ;;  %v3835_v59 = vmax.bf16 %v8952_v42, %v3771_v38  ;;  %v3240_v10 = vadd.f32 %v3224_v15, %v3176_v34 }
 0x12f   : > { %v3336_v27 = vunpack.c.l.bf16 %v3256_v23  ;;  %v4913_v43 = vunpack.c.l.bf16 %v9277_v33  ;;  %v9602_v1 = vadd.f32 %v5136_v7, %v5088_v60  ;;  %v4929_v30 = vrot.slane %v9277_v33, 4 }
 0x130   : > { %v3819_v54 = vadd.f32 %v3803_v39, %v3755_v16  ;;  %v3915_v56 = vunpack.c.l.bf16 %v3835_v59  ;;  %v3288_v22 = vadd.f32 %v3240_v10, %v2709_v48  ;;  %v4382_v35 = vunpack.c.l.bf16 %v4350_v62  ;;  %v11105_v16 = vld [vmem:[#allocation89_spill] sm:$0xff] }
 0x131   : > { %v3352_v5 = vmax.f32 %v2773_v37, %v3336_v27  ;;  %v4414_v44 = vmax.bf16 %v9263_v25, %v4350_v62  ;;  %v11090_v42 = vcombine.low %v11085_v12, %v11086_v52  ;;  %v11091_v61 = vcombine.low %v9029_v19, %v9040_v47  ;;  %v11100_v52 = vld [vmem:[#allocation128_spill] sm:$0xff]  ;;  %v11106_v48 = vld [vmem:[#allocation85_spill] sm:$0xff]  ;;  %v7860_v27 = vld [vmem:[%s8193_s26 + $0x1a8] sm:$0xff] }
 0x132   : > { %v4961_v46 = vunpack.c.l.bf16 %v4929_v30  ;;  %v4993_v20 = vmax.bf16 %v9277_v33, %v4929_v30  ;;  %v1552_v31 = vadd.f32 %v11093_v24, %v11092_v53  ;;  %v11095_v28 = vunpack.c.l.bf16 %v11094_v2  ;;  %v11108_v39 = vld [vmem:[#allocation73_spill] sm:$0xff]  ;;  %v11112_v2 = vld [vmem:[#allocation135_spill] sm:$0xff] }
 0x133   : > { %3116 = vmatmul.mubr.bf16.gmra.mrb[84].mxu0 %v11090_v42  ;;  %3695 = vmatmul.mubr.bf16.gmra.mrb[84].mxu1 %v11091_v61  ;;  %v11097_v63 = vunpack.c.l.bf16 %v11096_v51  ;;  %v11099_v12 = vcombine.high %v9059_v32, %v11098_v26  ;;  %v11102_v19 = vcombine.high %v11100_v52, %v11101_v17  ;;  %v3867_v47 = vadd.f32 %v3819_v54, %v3288_v22  ;;  %v7862_v22 = vld [vmem:[%s8193_s26 + $0x2a8] sm:$0xff] }
 0x134   : > { %v3931_v49 = vmax.f32 %v3352_v5, %v3915_v56  ;;  %v4398_v45 = vadd.f32 %v4382_v35, %v4334_v18  ;;  %v4494_v9 = vunpack.c.l.bf16 %v4414_v44  ;;  %v4977_v34 = vadd.f32 %v4961_v46, %v4913_v43  ;;  %v7861_v56 = vld [vmem:[%s8193_s26 + $0x228] sm:$0xff] }
 0x135   : > { %v1616_v36 = vmax.f32 %v11097_v63, %v11095_v28  ;;  %3123 = vmatprep.mubr.bf16.mxu0 %v11099_v12  ;;  %3702 = vmatprep.mubr.bf16.mxu1 %v11102_v19  ;;  %v5073_v58 = vunpack.c.l.bf16 %v4993_v20  ;;  %v11104_v60 = vunpack.c.l.bf16 %v11103_v8  ;;  %v11107_v37 = vunpack.c.l.bf16 %v11106_v48 }
 0x136   : > { %v4446_v23 = vadd.f32 %v4398_v45, %v3867_v47  ;;  %v4510_v7 = vmax.f32 %v3931_v49, %v4494_v9  ;;  %v11109_v59 = vrot.slane %v11108_v39, 4  ;;  %v3177_v43 = vunpack.c.l.bf16 %v7861_v56 }
 0x137   : > { %v2083_v38 = vadd.f32 %v11105_v16, %v11104_v60  ;;  %v2195_v15 = vmax.f32 %v1616_v36, %v11107_v37  ;;  %v3193_v30 = vrot.slane %v7861_v56, 4  ;;  %v3756_v5 = vunpack.c.l.bf16 %v7862_v22  ;;  %v11118_v60 = vld [vmem:[#allocation132_spill] sm:$0xff]  ;;  %v11119_v16 = vld [vmem:[#allocation133_spill] sm:$0xff] }
 0x138   : > { %v2646_v10 = vunpack.c.l.bf16 %v11109_v59  ;;  %v11110_v62 = vmov %v11109_v59  ;;  %v5025_v35 = vadd.f32 %v4977_v34, %v4446_v23  ;;  %v5089_v44 = vmax.f32 %v4510_v7, %v5073_v58  ;;  %v11115_v34 = vld [vmem:[#allocation130_spill] sm:$0xff]  ;;  %v11116_v58 = vld [vmem:[#allocation131_spill] sm:$0xff]  ;;  %v11121_v37 = vld [vmem:[#allocation136_spill] sm:$0xff] }
 0x139   : > { %v2678_v54 = vmax.bf16 %v7860_v27, %v11110_v62  ;;  %v2131_v18 = vadd.f32 %v2083_v38, %v1552_v31  ;;  %v11111_v42 = vunpack.c.l.bf16 %v11108_v39  ;;  %v3225_v20 = vunpack.c.l.bf16 %v3193_v30  ;;  %v11122_v27 = vld [vmem:[#allocation34_spill] sm:$0xff] }
 0x13a   : > { %v3257_v53 = vmax.bf16 %v7861_v56, %v3193_v30  ;;  %v3772_v24 = vrot.slane %v7862_v22, 4  ;;  %v4335_v28 = vunpack.c.l.bf16 %v11112_v2  ;;  %v5137_v51 = vmul.f32 0.0625, %v5025_v35  ;;  %v11123_v62 = vld [vmem:[#allocation38_spill] sm:$0xff] }
 0x13b   : > { %v2662_v61 = vadd.f32 %v2646_v10, %v11111_v42  ;;  %v2758_v46 = vunpack.c.l.bf16 %v2678_v54  ;;  %v4351_v31 = vrot.slane %v11112_v2, 4  ;;  %v11113_v12 = vcombine.low %v9059_v32, %v11098_v26  ;;  %v11128_v42 = vld [vmem:[#allocation80_spill] sm:$0xff] }
 0x13c   : > { %v11114_v19 = vcombine.low %v11100_v52, %v11101_v17  ;;  %v3241_v47 = vadd.f32 %v3225_v20, %v3177_v43  ;;  %v3337_v49 = vunpack.c.l.bf16 %v3257_v53  ;;  %v3804_v45 = vunpack.c.l.bf16 %v3772_v24  ;;  %v11124_v43 = vld [vmem:[#allocation35_spill] sm:$0xff] }
 0x13d   : > { %v2710_v63 = vadd.f32 %v2662_v61, %v2131_v18  ;;  %v2774_v36 = vmax.f32 %v2195_v15, %v2758_v46  ;;  %3124 = vmatmul.mubr.bf16.gmra.mrb[88].mxu0 %v11113_v12  ;;  %v3836_v9 = vmax.bf16 %v7862_v22, %v3772_v24  ;;  %v11117_v8 = vcombine.high %v11115_v34, %v11116_v58  ;;  %v11126_v22 = vld [vmem:[#allocation30_spill] sm:$0xff]  ;;  %v11130_v46 = vld [vmem:[#allocation92_spill] sm:$0xff] }
 0x13e   : > { %3703 = vmatmul.mubr.bf16.gmra.mrb[88].mxu1 %v11114_v19  ;;  %v11120_v38 = vcombine.high %v11118_v60, %v11119_v16  ;;  %v9653_v48 = vadd.f32 %v5137_v51, %v5089_v44  ;;  %v4383_v32 = vunpack.c.l.bf16 %v4351_v31  ;;  %v4415_v26 = vmax.bf16 %v11112_v2, %v4351_v31  ;;  %v11131_v24 = vld [vmem:[#allocation82_spill] sm:$0xff] }
 0x13f   : > { %3131 = vmatprep.mubr.bf16.mxu0 %v11117_v8  ;;  %v4914_v52 = vunpack.c.l.bf16 %v11121_v37  ;;  %v3289_v17 = vadd.f32 %v3241_v47, %v2710_v63  ;;  %v3353_v15 = vmax.f32 %v2774_v36, %v3337_v49  ;;  %v3820_v23 = vadd.f32 %v3804_v45, %v3756_v5  ;;  %v7863_v63 = vld [vmem:[%s8193_s26 + $0x1b0] sm:$0xff]  ;;  %v11134_v49 = vld [vmem:[#allocation90_spill] sm:$0xff] }
 0x140   : > { %3710 = vmatprep.mubr.bf16.mxu1 %v11120_v38  ;;  %v3916_v7 = vunpack.c.l.bf16 %v3836_v9  ;;  %v4399_v39 = vadd.f32 %v4383_v32, %v4335_v28  ;;  %v4495_v59 = vunpack.c.l.bf16 %v4415_v26  ;;  %v4930_v10 = vrot.slane %v11121_v37, 4 }
 0x141   : > { %v1553_v54 = vadd.f32 %v11123_v62, %v11122_v27  ;;  %v3868_v18 = vadd.f32 %v3820_v23, %v3289_v17  ;;  %v11125_v30 = vunpack.c.l.bf16 %v11124_v43  ;;  %v11127_v35 = vunpack.c.l.bf16 %v11126_v22 }
 0x142   : > { %v3932_v56 = vmax.f32 %v3353_v15, %v3916_v7  ;;  %v11129_v61 = vunpack.c.l.bf16 %v11128_v42  ;;  %v4962_v5 = vunpack.c.l.bf16 %v4930_v10  ;;  %v4994_v53 = vmax.bf16 %v11121_v37, %v4930_v10  ;;  %v7864_v7 = vld [vmem:[%s8193_s26 + $0x230] sm:$0xff] }
 0x143   : > { %v1617_v44 = vmax.f32 %v11127_v35, %v11125_v30  ;;  %v11132_v28 = vrot.slane %v11131_v24, 4  ;;  %v4447_v12 = vadd.f32 %v4399_v39, %v3868_v18  ;;  %v11135_v45 = vunpack.c.l.bf16 %v11134_v49  ;;  %v7865_v10 = vld [vmem:[%s8193_s26 + $0x2b0] sm:$0xff]  ;;  %v11143_v30 = vld [vmem:[#allocation137_spill] sm:$0xff] }
 0x144   : > { %v2084_v20 = vadd.f32 %v11130_v46, %v11129_v61  ;;  %v4511_v19 = vmax.f32 %v3932_v56, %v4495_v59  ;;  %v4978_v8 = vadd.f32 %v4962_v5, %v4914_v52  ;;  %v5074_v38 = vunpack.c.l.bf16 %v4994_v53  ;;  %v11139_v52 = vld [vmem:[#allocation134_spill] sm:$0xff] }
 0x145   : > { %v2647_v51 = vunpack.c.l.bf16 %v11132_v28  ;;  %v11133_v36 = vmov %v11132_v28  ;;  %v2196_v9 = vmax.f32 %v1617_v44, %v11135_v45  ;;  %v11136_v32 = vunpack.c.l.bf16 %v11131_v24 }
 0x146   : > { %v2679_v31 = vmax.bf16 %v7863_v63, %v11133_v36  ;;  %v2132_v47 = vadd.f32 %v2084_v20, %v1553_v54  ;;  %v11137_v15 = vcombine.low %v11115_v34, %v11116_v58  ;;  %v11138_v23 = vcombine.low %v11118_v60, %v11119_v16  ;;  %v11140_v54 = vld [vmem:[#allocation23_spill] sm:$0xff]  ;;  %v11144_v20 = vld [vmem:[#allocation140_spill] sm:$0xff] }
 0x147   : > { %v2663_v26 = vadd.f32 %v2647_v51, %v11136_v32  ;;  %v3178_v39 = vunpack.c.l.bf16 %v7864_v7  ;;  %v3194_v59 = vrot.slane %v7864_v7, 4  ;;  %v3757_v27 = vunpack.c.l.bf16 %v7865_v10  ;;  %v11146_v32 = vld [vmem:[#allocation39_spill] sm:$0xff] }
 0x148   : > { %v2759_v17 = vunpack.c.l.bf16 %v2679_v31  ;;  %3132 = vmatmul.mubr.bf16.gmra.mrb[92].mxu0 %v11137_v15  ;;  %3711 = vmatmul.mubr.bf16.gmra.mrb[92].mxu1 %v11138_v23  ;;  %v3773_v62 = vrot.slane %v7865_v10, 4  ;;  %v11141_v18 = vcombine.high %v11139_v52, %v11140_v54  ;;  %v11142_v56 = vcombine.high %v9206_v40, %v9209_v3  ;;  %v11149_v23 = vld [vmem:[#allocation31_spill] sm:$0xff] }
 0x149   : > { %v5026_v34 = vadd.f32 %v4978_v8, %v4447_v12  ;;  %v5090_v58 = vmax.f32 %v4511_v19, %v5074_v38  ;;  %v2711_v43 = vadd.f32 %v2663_v26, %v2132_v47  ;;  %v4336_v60 = vunpack.c.l.bf16 %v11143_v30  ;;  %v11145_v38 = vld [vmem:[#allocation36_spill] sm:$0xff] }
 0x14a   : > { %4233 = vmatprep.mubr.bf16.mxu0 %v11141_v18  ;;  %4812 = vmatprep.mubr.bf16.mxu1 %v11142_v56  ;;  %v2775_v16 = vmax.f32 %v2196_v9, %v2759_v17  ;;  %v3226_v22 = vunpack.c.l.bf16 %v3194_v59  ;;  %v3258_v35 = vmax.bf16 %v7864_v7, %v3194_v59  ;;  %v3805_v44 = vunpack.c.l.bf16 %v3773_v62  ;;  %v11147_v17 = vld [vmem:[#allocation37_spill] sm:$0xff] }
 0x14b   : > { %v5138_v42 = vmul.f32 0.0625, %v5026_v34  ;;  %v3837_v61 = vmax.bf16 %v7865_v10, %v3773_v62  ;;  %v4352_v46 = vrot.slane %v11143_v30, 4  ;;  %v4915_v5 = vunpack.c.l.bf16 %v11144_v20 }
 0x14c   : > { %v3242_v53 = vadd.f32 %v3226_v22, %v3178_v39  ;;  %v3338_v24 = vunpack.c.l.bf16 %v3258_v35  ;;  %v3821_v28 = vadd.f32 %v3805_v44, %v3757_v27  ;;  %v4931_v51 = vrot.slane %v11144_v20, 4  ;;  %v7866_v44 = vld [vmem:[%s8193_s26 + $0x1b8] sm:$0xff] }
 0x14d   : > { %v9695_v63 = vadd.f32 %v5138_v42, %v5090_v58  ;;  %v3917_v36 = vunpack.c.l.bf16 %v3837_v61  ;;  %v4384_v31 = vunpack.c.l.bf16 %v4352_v46  ;;  %v4416_v12 = vmax.bf16 %v11143_v30, %v4352_v46  ;;  %v11154_v58 = vld [vmem:[#allocation81_spill] sm:$0xff]  ;;  %v11163_v46 = vld [vmem:[#allocation22_spill] sm:$0xff] }
 0x14e   : > { %v3290_v19 = vadd.f32 %v3242_v53, %v2711_v43  ;;  %v3354_v47 = vmax.f32 %v2775_v16, %v3338_v24  ;;  %v4963_v49 = vunpack.c.l.bf16 %v4931_v51  ;;  %v4995_v45 = vmax.bf16 %v11144_v20, %v4931_v51  ;;  %v7867_v24 = vld [vmem:[%s8193_s26 + $0x238] sm:$0xff] }
 0x14f   : > { %v4400_v9 = vadd.f32 %v4384_v31, %v4336_v60  ;;  %v4496_v8 = vunpack.c.l.bf16 %v4416_v12  ;;  %v1554_v26 = vadd.f32 %v11146_v32, %v11145_v38  ;;  %v11148_v15 = vunpack.c.l.bf16 %v11147_v17  ;;  %v11156_v60 = vld [vmem:[#allocation95_spill] sm:$0xff] }
 0x150   : > { %v11150_v7 = vunpack.c.l.bf16 %v11149_v23  ;;  %v11151_v59 = vcombine.low %v11139_v52, %v11140_v54  ;;  %v11152_v10 = vcombine.low %v9206_v40, %v9209_v3  ;;  %v3869_v27 = vadd.f32 %v3821_v28, %v3290_v19  ;;  %v11157_v54 = vld [vmem:[#allocation91_spill] sm:$0xff] }
 0x151   : > { %v3933_v62 = vmax.f32 %v3354_v47, %v3917_v36  ;;  %v4979_v18 = vadd.f32 %v4963_v49, %v4915_v5  ;;  %v5075_v56 = vunpack.c.l.bf16 %v4995_v45  ;;  %v11153_v34 = vcombine.high %v9230_v29, %v9239_v50  ;;  %v11159_v3 = vld [vmem:[#allocation83_spill] sm:$0xff]  ;;  %v7868_v47 = vld [vmem:[%s8193_s26 + $0x2b8] sm:$0xff] }
 0x152   : > { %v1618_v39 = vmax.f32 %v11150_v7, %v11148_v15  ;;  %4234 = vmatmul.mubr.bf16.vlgmr.msra.gmra.mrb[96].mxu0 %v11151_v59  ;;  %4813 = vmatmul.mubr.bf16.vlgmr.msra.gmra.mrb[96].mxu1 %v11152_v10  ;;  %v11155_v43 = vunpack.c.l.bf16 %v11154_v58  ;;  %v11158_v16 = vunpack.c.l.bf16 %v11157_v54  ;;  %v11160_v22 = vrot.slane %v11159_v3, 4 }
 0x153   : > { %7424 = vmatpush3.bf16.msra.mxu0 %v9252_v55  ;;  %4241 = vmatprep.mubr.bf16.mxu0 %v11153_v34  ;;  %v11162_v55 = vcombine.high %v9242_v57, %v9245_v13  ;;  %v4448_v5 = vadd.f32 %v4400_v9, %v3869_v27  ;;  %v4512_v53 = vmax.f32 %v3933_v62, %v4496_v8  ;;  %v3179_v28 = vunpack.c.l.bf16 %v7867_v24  ;;  %v11165_v8 = vld [vmem:[#allocation139_spill] sm:$0xff] }
 0x154   : > { %v2085_v52 = vadd.f32 %v11156_v60, %v11155_v43  ;;  %v2197_v40 = vmax.f32 %v1618_v39, %v11158_v16  ;;  %v2648_v35 = vunpack.c.l.bf16 %v11160_v22  ;;  %v11161_v42 = vmov %v11160_v22  ;;  %7426 = vmatprep.subr.bf16.mxu0 %v11163_v46  ;;  %v11166_v39 = vld [vmem:[#allocation138_spill] sm:$0xff] }
 0x155   : > { %v2680_v61 = vmax.bf16 %v7866_v44, %v11161_v42  ;;  %4820 = vmatprep.mubr.bf16.mxu1 %v11162_v55  ;;  %v3195_v51 = vrot.slane %v7867_v24, 4  ;;  %v11164_v31 = vunpack.c.l.bf16 %v11159_v3  ;;  %v3758_v49 = vunpack.c.l.bf16 %v7868_v47  ;;  %v11172_v42 = vld [vmem:[#allocation41_spill] sm:$0xff] }
 0x156   : > { %v2133_v36 = vadd.f32 %v2085_v52, %v1554_v26  ;;  %v5027_v45 = vadd.f32 %v4979_v18, %v4448_v5  ;;  %v5091_v38 = vmax.f32 %v4512_v53, %v5075_v56  ;;  %v3774_v9 = vrot.slane %v7868_v47, 4  ;;  %v11167_v18 = vld [vmem:[#allocation141_spill] sm:$0xff]  ;;  %v11176_v53 = vld [vmem:[#allocation40_spill] sm:$0xff] }
 0x157   : > { %v2664_v12 = vadd.f32 %v2648_v35, %v11164_v31  ;;  %v2760_v19 = vunpack.c.l.bf16 %v2680_v61  ;;  %v3227_v32 = vunpack.c.l.bf16 %v3195_v51  ;;  %v3259_v17 = vmax.bf16 %v7867_v24, %v3195_v51  ;;  %7428 = vmatpush3.bf16.msra.mxu0 %v11163_v46  ;;  %v11173_v61 = vld [vmem:[#allocation49_spill] sm:$0xff]  ;;  %v11174_v46 = vld [vmem:[#allocation43_spill] sm:$0xff] }
 0x158   : > { %v4337_v7 = vunpack.c.l.bf16 %v11165_v8  ;;  %7430 = vmatprep.subr.bf16.mxu0 %v11166_v39  ;;  %v5139_v26 = vmul.f32 0.0625, %v5027_v45  ;;  %v4353_v27 = vrot.slane %v11165_v8, 4  ;;  %v3806_v62 = vunpack.c.l.bf16 %v3774_v9  ;;  %v11178_v51 = vld [vmem:[#allocation143_spill] sm:$0xff] }
 0x159   : > { %v2712_v15 = vadd.f32 %v2664_v12, %v2133_v36  ;;  %v2776_v23 = vmax.f32 %v2197_v40, %v2760_v19  ;;  %v3243_v59 = vadd.f32 %v3227_v32, %v3179_v28  ;;  %v3339_v10 = vunpack.c.l.bf16 %v3259_v17  ;;  %v11182_v17 = vld [vmem:[#allocation98_spill] sm:$0xff] }
 0x15a   : > { %v3838_v34 = vmax.bf16 %v7868_v47, %v3774_v9  ;;  %v4916_v56 = vunpack.c.l.bf16 %v11167_v18  ;;  %v4932_v58 = vrot.slane %v11167_v18, 4  ;;  %v11168_v43 = vcombine.low %v9230_v29, %v9239_v50  ;;  %v11184_v9 = vld [vmem:[#allocation93_spill] sm:$0xff] }
 0x15b   : > { %v11169_v60 = vcombine.low %v9242_v57, %v9245_v13  ;;  %v9745_v52 = vadd.f32 %v5139_v26, %v5091_v38  ;;  %v3291_v54 = vadd.f32 %v3243_v59, %v2712_v15  ;;  %v3355_v16 = vmax.f32 %v2776_v23, %v3339_v10  ;;  %7432 = vmatpush3.bf16.msra.mxu0 %v11166_v39  ;;  %v11181_v38 = vld [vmem:[#allocation102_spill] sm:$0xff] }
 0x15c   : > { %4242 = vmatmul.mubr.bf16.gmra.mrb[100].mxu0 %v11168_v43  ;;  %v4385_v40 = vunpack.c.l.bf16 %v4353_v27  ;;  %v11170_v3 = vcombine.high %v9263_v25, %v11112_v2  ;;  %v11171_v22 = vcombine.high %v9277_v33, %v11121_v37  ;;  %v3822_v35 = vadd.f32 %v3806_v62, %v3758_v49  ;;  %7434 = vmatprep.subr.bf16.mxu0 %v11178_v51  ;;  %v11179_v49 = vld [vmem:[#allocation86_spill] sm:$0xff] }
 0x15d   : > { %4821 = vmatmul.mubr.bf16.gmra.mrb[100].mxu1 %v11169_v60  ;;  %v3918_v50 = vunpack.c.l.bf16 %v3838_v34  ;;  %v4417_v29 = vmax.bf16 %v11165_v8, %v4353_v27  ;;  %v4964_v44 = vunpack.c.l.bf16 %v4932_v58  ;;  %v4996_v57 = vmax.bf16 %v11167_v18, %v4932_v58  ;;  %v7869_v10 = vld [vmem:[%s8193_s26 + $0x1c0] sm:$0xff] }
 0x15e   : > { %4249 = vmatprep.mubr.bf16.mxu0 %v11170_v3  ;;  %4828 = vmatprep.mubr.bf16.mxu1 %v11171_v22  ;;  %v4401_v13 = vadd.f32 %v4385_v40, %v4337_v7  ;;  %v1555_v55 = vadd.f32 %v11173_v61, %v11172_v42  ;;  %v11175_v5 = vunpack.c.l.bf16 %v11174_v46  ;;  %v11177_v24 = vunpack.c.l.bf16 %v11176_v53  ;;  %v7870_v34 = vld [vmem:[%s8193_s26 + $0x240] sm:$0xff]  ;;  %v11188_v3 = vld [vmem:[#allocation148_spill] sm:$0xff] }
 0x15f   : > { %v3870_v36 = vadd.f32 %v3822_v35, %v3291_v54  ;;  %v3934_v31 = vmax.f32 %v3355_v16, %v3918_v50  ;;  %v4497_v12 = vunpack.c.l.bf16 %v4417_v29  ;;  %v4980_v19 = vadd.f32 %v4964_v44, %v4916_v56  ;;  %7436 = vmatpush3.bf16.msra.mxu0 %v11178_v51  ;;  %v7871_v16 = vld [vmem:[%s8193_s26 + $0x2c0] sm:$0xff]  ;;  %v6698_v51 = vpop.f32.mrb[0].mxu0 }
 0x160   : > { %v1619_v28 = vmax.f32 %v11177_v24, %v11175_v5  ;;  %v5076_v47 = vunpack.c.l.bf16 %v4996_v57  ;;  %v11180_v45 = vunpack.c.l.bf16 %v11179_v49  ;;  %v11183_v15 = vunpack.c.l.bf16 %v11182_v17  ;;  %7438 = vmatprep.subr.bf16.mxu0 %v11188_v3  ;;  %v11195_v49 = vld [vmem:[#allocation153_spill] sm:$0xff] }
 0x161   : > { %v11185_v7 = vrot.slane %v11184_v9, 4  ;;  %v4449_v26 = vadd.f32 %v4401_v13, %v3870_v36  ;;  %v4513_v59 = vmax.f32 %v3934_v31, %v4497_v12  ;;  %v3180_v58 = vunpack.c.l.bf16 %v7870_v34  ;;  %v11194_v31 = vld [vmem:[#allocation145_spill] sm:$0xff] }
 0x162   : > { %v2086_v32 = vadd.f32 %v11181_v38, %v11180_v45  ;;  %v2198_v23 = vmax.f32 %v1619_v28, %v11183_v15  ;;  %v11187_v43 = vunpack.c.l.bf16 %v11184_v9  ;;  %v3196_v54 = vrot.slane %v7870_v34, 4 }
 0x163   : > { %v2649_v39 = vunpack.c.l.bf16 %v11185_v7  ;;  %v11186_v27 = vmov %v11185_v7  ;;  %v3759_v40 = vunpack.c.l.bf16 %v7871_v16  ;;  %v5028_v22 = vadd.f32 %v4980_v19, %v4449_v26  ;;  %7440 = vmatpush3.bf16.msra.mxu0 %v11188_v3  ;;  %v9795_v19 = vpop.f32.mrb[0].mxu1 }
 0x164   : > { %v2681_v62 = vmax.bf16 %v7869_v10, %v11186_v27  ;;  %v2134_v56 = vadd.f32 %v2086_v32, %v1555_v55  ;;  %v5092_v35 = vmax.f32 %v4513_v59, %v5076_v47  ;;  %v3775_v29 = vrot.slane %v7871_v16, 4  ;;  %v11191_v55 = vld [vmem:[#allocation142_spill] sm:$0xff]  ;;  %v6699_v47 = vpop.f32.mrb[1].mxu0  ;;  %7442 = vmatprep.subr.bf16.mxu0 %v11195_v49  ;;  %v9801_v15 = vpop.f32.mrb[1].mxu1 }
 0x165   : > { %v2665_v60 = vadd.f32 %v2649_v39, %v11187_v43  ;;  %v11189_v44 = vcombine.low %v9263_v25, %v11112_v2  ;;  %v11190_v13 = vcombine.low %v9277_v33, %v11121_v37  ;;  %v3228_v42 = vunpack.c.l.bf16 %v3196_v54  ;;  %v6701_v9 = vpop.f32.mrb[2].mxu0  ;;  %v9805_v59 = vpop.f32.mrb[2].mxu1 }
 0x166   : > { %v2761_v50 = vunpack.c.l.bf16 %v2681_v62  ;;  %v3260_v61 = vmax.bf16 %v7870_v34, %v3196_v54  ;;  %v4338_v46 = vunpack.c.l.bf16 %v11191_v55  ;;  %v11192_v5 = vcombine.high %v11143_v30, %v11165_v8  ;;  %v6702_v10 = vpop.f32.mrb[3].mxu0 }
 0x167   : > { %4250 = vmatmul.mubr.bf16.gmra.mrb[104].mxu0 %v11189_v44  ;;  %4829 = vmatmul.mubr.bf16.gmra.mrb[104].mxu1 %v11190_v13  ;;  %v2713_v57 = vadd.f32 %v2665_v60, %v2134_v56  ;;  %v11193_v53 = vcombine.high %v11144_v20, %v11167_v18  ;;  %v5140_v24 = vmul.f32 0.0625, %v5028_v22  ;;  %v3807_v2 = vunpack.c.l.bf16 %v3775_v29  ;;  %v11197_v56 = vld [vmem:[#allocation51_spill] sm:$0xff]  ;;  %v9811_v60 = vpop.f32.mrb[3].mxu1  ;;  %v11200_v13 = vld [vmem:[#allocation42_spill] sm:$0xff] }
 0x168   : > { %4257 = vmatprep.mubr.bf16.mxu0 %v11192_v5  ;;  %v2777_v25 = vmax.f32 %v2198_v23, %v2761_v50  ;;  %v3839_v28 = vmax.bf16 %v7871_v16, %v3775_v29  ;;  %v3244_v33 = vadd.f32 %v3228_v42, %v3180_v58  ;;  %v3340_v37 = vunpack.c.l.bf16 %v3260_v61  ;;  %v11196_v58 = vld [vmem:[#allocation48_spill] sm:$0xff]  ;;  %7444 = vmatpush3.bf16.msra.mxu0 %v11195_v49  ;;  %v11214_v49 = vld [vmem:[#allocation99_spill] sm:$0xff] }
 0x169   : > { %4836 = vmatprep.mubr.bf16.mxu1 %v11193_v53  ;;  %v4354_v36 = vrot.slane %v11191_v55, 4  ;;  %v4917_v12 = vunpack.c.l.bf16 %v11194_v31  ;;  %v9798_v45 = vadd.f32 %v5140_v24, %v5092_v35  ;;  %v3823_v38 = vadd.f32 %v3807_v2, %v3759_v40  ;;  %7446 = vmatprep.subr.bf16.mxu0 %v9449_v11  ;;  %v11198_v29 = vld [vmem:[#allocation44_spill] sm:$0xff]  ;;  %v11204_v53 = vld [vmem:[#allocation87_spill] sm:$0xff] }
 0x16a   : > { %v3919_v32 = vunpack.c.l.bf16 %v3839_v28  ;;  %v4933_v17 = vrot.slane %v11194_v31, 4  ;;  %v9803_v23 = vadd.f32 %v6699_v47, %v6698_v51  ;;  %v3292_v7 = vadd.f32 %v3244_v33, %v2713_v57  ;;  %v11207_v28 = vld [vmem:[#allocation94_spill] sm:$0xff]  ;;  %v11210_v47 = vld [vmem:[#allocation144_spill] sm:$0xff] }
 0x16b   : > { %v3356_v39 = vmax.f32 %v2777_v25, %v3340_v37  ;;  %v4386_v26 = vunpack.c.l.bf16 %v4354_v36  ;;  %v4418_v27 = vmax.bf16 %v11191_v55, %v4354_v36  ;;  %v1556_v43 = vadd.f32 %v11197_v56, %v11196_v58  ;;  %v11206_v25 = vld [vmem:[#allocation103_spill] sm:$0xff] }
 0x16c   : > { %v4965_v62 = vunpack.c.l.bf16 %v4933_v17  ;;  %v4997_v34 = vmax.bf16 %v11194_v31, %v4933_v17  ;;  %v9813_v54 = vadd.f32 %v6702_v10, %v6701_v9  ;;  %v3871_v16 = vadd.f32 %v3823_v38, %v3292_v7  ;;  %v7872_v37 = vld [vmem:[%s8193_s26 + $0x1c8] sm:$0xff]  ;;  %7448 = vmatpush3.bf16.msra.mxu0 %v9449_v11 }
 0x16d   : > { %v3935_v40 = vmax.f32 %v3356_v39, %v3919_v32  ;;  %v4402_v3 = vadd.f32 %v4386_v26, %v4338_v46  ;;  %v4498_v22 = vunpack.c.l.bf16 %v4418_v27  ;;  %v11199_v44 = vunpack.c.l.bf16 %v11198_v29  ;;  %v7873_v17 = vld [vmem:[%s8193_s26 + $0x248] sm:$0xff]  ;;  %7450 = vmatprep.subr.bf16.mxu0 %v9477_v0 }
 0x16e   : > { %v4981_v35 = vadd.f32 %v4965_v62, %v4917_v12  ;;  %v5077_v50 = vunpack.c.l.bf16 %v4997_v34  ;;  %v11201_v57 = vunpack.c.l.bf16 %v11200_v13  ;;  %v11202_v61 = vcombine.low %v11143_v30, %v11165_v8  ;;  %v11212_v8 = vld [vmem:[#allocation146_spill] sm:$0xff]  ;;  %v6704_v34 = vpop.f32.mrb[4].mxu0 }
 0x16f   : > { %v11203_v5 = vcombine.low %v11144_v20, %v11167_v18  ;;  %v4450_v46 = vadd.f32 %v4402_v3, %v3871_v16  ;;  %v11205_v24 = vunpack.c.l.bf16 %v11204_v53  ;;  %v11208_v51 = vrot.slane %v11207_v28, 4  ;;  %v6705_v29 = vpop.f32.mrb[5].mxu0 }
 0x170   : > { %v1620_v42 = vmax.f32 %v11201_v57, %v11199_v44  ;;  %4258 = vmatmul.mubr.bf16.gmra.mrb[108].mxu0 %v11202_v61  ;;  %v11211_v30 = vcombine.high %v11191_v55, %v11210_v47  ;;  %v11213_v20 = vcombine.high %v11194_v31, %v11212_v8  ;;  %v4514_v18 = vmax.f32 %v3935_v40, %v4498_v22  ;;  %v7874_v40 = vld [vmem:[%s8193_s26 + $0x2c8] sm:$0xff]  ;;  %v9849_v22 = vpop.f32.mrb[4].mxu1 }
 0x171   : > { %4837 = vmatmul.mubr.bf16.gmra.mrb[108].mxu1 %v11203_v5  ;;  %v2087_v2 = vadd.f32 %v11206_v25, %v11205_v24  ;;  %v2650_v33 = vunpack.c.l.bf16 %v11208_v51  ;;  %v11209_v36 = vmov %v11208_v51  ;;  %v11215_v38 = vunpack.c.l.bf16 %v11214_v49  ;;  %v9851_v13 = vpop.f32.mrb[5].mxu1  ;;  %v7875_v5 = vld [vmem:[%s8193_s26 + $0x348] sm:$0xff]  ;;  %7452 = vmatpush3.bf16.msra.mxu0 %v9477_v0 }
 0x172   : > { %v2682_v12 = vmax.bf16 %v7872_v37, %v11209_v36  ;;  %4265 = vmatprep.mubr.bf16.mxu0 %v11211_v30  ;;  %4844 = vmatprep.mubr.bf16.mxu1 %v11213_v20  ;;  %v3181_v9 = vunpack.c.l.bf16 %v7873_v17  ;;  %v3197_v7 = vrot.slane %v7873_v17, 4  ;;  %v5029_v39 = vadd.f32 %v4981_v35, %v4450_v46  ;;  %v9856_v53 = vpop.f32.mrb[6].mxu1  ;;  %v7876_v30 = vld [vmem:[%s8193_s26 + $0x3c8] sm:$0xff] }
 0x173   : > { %v2199_v32 = vmax.f32 %v1620_v42, %v11215_v38  ;;  %v2135_v26 = vadd.f32 %v2087_v2, %v1556_v43  ;;  %v11216_v10 = vunpack.c.l.bf16 %v11207_v28  ;;  %v5093_v58 = vmax.f32 %v4514_v18, %v5077_v50  ;;  %v6707_v42 = vpop.f32.mrb[6].mxu0 }
 0x174   : > { %v2762_v62 = vunpack.c.l.bf16 %v2682_v12  ;;  %v3229_v56 = vunpack.c.l.bf16 %v3197_v7  ;;  %v3261_v16 = vmax.bf16 %v7873_v17, %v3197_v7  ;;  %v3760_v3 = vunpack.c.l.bf16 %v7874_v40  ;;  %v6708_v24 = vpop.f32.mrb[7].mxu0  ;;  %v11220_v7 = vld [vmem:[#allocation149_spill] sm:$0xff] }
 0x175   : > { %v2666_v27 = vadd.f32 %v2650_v33, %v11216_v10  ;;  %v5141_v44 = vmul.f32 0.0625, %v5029_v39  ;;  %v3776_v43 = vrot.slane %v7874_v40, 4  ;;  %v9853_v57 = vadd.f32 %v6705_v29, %v6704_v34  ;;  %v9861_v33 = vpop.f32.mrb[7].mxu1  ;;  %v11223_v10 = vld [vmem:[#allocation151_spill] sm:$0xff]  ;;  %v11225_v34 = vld [vmem:[#allocation52_spill] sm:$0xff]  ;;  %v11233_v29 = vld [vmem:[#allocation109_spill] sm:$0xff] }
 0x176   : > { %v2778_v35 = vmax.f32 %v2199_v32, %v2762_v62  ;;  %v3245_v61 = vadd.f32 %v3229_v56, %v3181_v9  ;;  %v3341_v50 = vunpack.c.l.bf16 %v3261_v16  ;;  %v4339_v46 = vunpack.c.l.bf16 %v7875_v5  ;;  %v11219_v9 = vld [vmem:[#allocation147_spill] sm:$0xff] }
 0x177   : > { %v2714_v11 = vadd.f32 %v2666_v27, %v2135_v26  ;;  %v9859_v25 = vadd.f32 %v5141_v44, %v5093_v58  ;;  %v3808_v2 = vunpack.c.l.bf16 %v3776_v43  ;;  %v3840_v28 = vmax.bf16 %v7874_v40, %v3776_v43  ;;  %v11222_v26 = vld [vmem:[#allocation150_spill] sm:$0xff]  ;;  %v11227_v58 = vld [vmem:[#allocation47_spill] sm:$0xff]  ;;  %v11231_v40 = vld [vmem:[#allocation96_spill] sm:$0xff] }
 0x178   : > { %v4355_v51 = vrot.slane %v7875_v5, 4  ;;  %v9863_v37 = vadd.f32 %v6708_v24, %v6707_v42  ;;  %v3357_v12 = vmax.f32 %v2778_v35, %v3341_v50  ;;  %v4918_v20 = vunpack.c.l.bf16 %v7876_v30 }
 0x179   : > { %v3293_v36 = vadd.f32 %v3245_v61, %v2714_v11  ;;  %v11217_v18 = vcombine.low %v11191_v55, %v11210_v47  ;;  %v11218_v0 = vcombine.low %v11194_v31, %v11212_v8  ;;  %v3824_v49 = vadd.f32 %v3808_v2, %v3760_v3  ;;  %v11226_v55 = vld [vmem:[#allocation54_spill] sm:$0xff]  ;;  %v11229_v31 = vld [vmem:[#allocation45_spill] sm:$0xff]  ;;  %v6710_v61 = vpop.f32.mrb[8].mxu0 }
 0x17a   : > { %v3920_v38 = vunpack.c.l.bf16 %v3840_v28  ;;  %v4387_v32 = vunpack.c.l.bf16 %v4355_v51  ;;  %v4419_v17 = vmax.bf16 %v7875_v5, %v4355_v51  ;;  %v11221_v39 = vcombine.high %v11219_v9, %v11220_v7  ;;  %v11234_v2 = vld [vmem:[#allocation106_spill] sm:$0xff] }
 0x17b   : > { %4266 = vmatmul.mubr.bf16.gmra.mrb[112].mxu0 %v11217_v18  ;;  %4845 = vmatmul.mubr.bf16.gmra.mrb[112].mxu1 %v11218_v0  ;;  %v11224_v27 = vcombine.high %v11222_v26, %v11223_v10  ;;  %v4934_v62 = vrot.slane %v7876_v30, 4  ;;  %v1557_v47 = vadd.f32 %v11226_v55, %v11225_v34  ;;  %v11228_v56 = vunpack.c.l.bf16 %v11227_v58  ;;  %v9889_v18 = vpop.f32.mrb[8].mxu1  ;;  %v6711_v0 = vpop.f32.mrb[9].mxu0  ;;  %v11236_v34 = vld [vmem:[#allocation100_spill] sm:$0xff] }
 0x17c   : > { %4273 = vmatprep.mubr.bf16.mxu0 %v11221_v39  ;;  %v11230_v8 = vunpack.c.l.bf16 %v11229_v31  ;;  %v11232_v3 = vunpack.c.l.bf16 %v11231_v40  ;;  %v3872_v11 = vadd.f32 %v3824_v49, %v3293_v36  ;;  %v3936_v35 = vmax.f32 %v3357_v12, %v3920_v38  ;;  %v7877_v12 = vld [vmem:[%s8193_s26 + $0x1d0] sm:$0xff]  ;;  %v9896_v38 = vpop.f32.mrb[9].mxu1 }
 0x17d   : > { %4852 = vmatprep.mubr.bf16.mxu1 %v11224_v27  ;;  %v4403_v43 = vadd.f32 %v4387_v32, %v4339_v46  ;;  %v4499_v42 = vunpack.c.l.bf16 %v4419_v17  ;;  %v4966_v50 = vunpack.c.l.bf16 %v4934_v62  ;;  %v4998_v5 = vmax.bf16 %v7876_v30, %v4934_v62  ;;  %v6713_v32 = vpop.f32.mrb[10].mxu0 }
 0x17e   : > { %v1621_v16 = vmax.f32 %v11230_v8, %v11228_v56  ;;  %v2088_v44 = vadd.f32 %v11233_v29, %v11232_v3  ;;  %v11235_v28 = vunpack.c.l.bf16 %v11234_v2  ;;  %v11237_v55 = vrot.slane %v11236_v34, 4  ;;  %v9901_v56 = vpop.f32.mrb[10].mxu1  ;;  %v6714_v31 = vpop.f32.mrb[11].mxu0  ;;  %v7879_v29 = vld [vmem:[%s8193_s26 + $0x2d0] sm:$0xff] }
 0x17f   : > { %v4451_v39 = vadd.f32 %v4403_v43, %v3872_v11  ;;  %v4515_v27 = vmax.f32 %v3936_v35, %v4499_v42  ;;  %v9898_v30 = vadd.f32 %v6711_v0, %v6710_v61  ;;  %v4982_v17 = vadd.f32 %v4966_v50, %v4918_v20  ;;  %v9906_v11 = vpop.f32.mrb[11].mxu1 }
 0x180   : > { %v2136_v24 = vadd.f32 %v2088_v44, %v1557_v47  ;;  %v2200_v51 = vmax.f32 %v1621_v16, %v11235_v28  ;;  %v2651_v36 = vunpack.c.l.bf16 %v11237_v55  ;;  %v11238_v46 = vmov %v11237_v55  ;;  %v7878_v47 = vld [vmem:[%s8193_s26 + $0x250] sm:$0xff]  ;;  %11240 = vst [vmem:[#allocation59_spill] sm:$0xff] %v9906_v11  ;;  %v11244_v55 = vld [vmem:[#allocation154_spill] sm:$0xff] }
 0x181   : > { %v2683_v49 = vmax.bf16 %v7877_v12, %v11238_v46  ;;  %v5078_v62 = vunpack.c.l.bf16 %v4998_v5  ;;  %v3182_v58 = vunpack.c.l.bf16 %v7878_v47  ;;  %v11239_v8 = vunpack.c.l.bf16 %v11236_v34  ;;  %v11243_v34 = vld [vmem:[#allocation152_spill] sm:$0xff] }
 0x182   : > { %v3198_v3 = vrot.slane %v7878_v47, 4  ;;  %v3761_v44 = vunpack.c.l.bf16 %v7879_v29  ;;  %v9908_v35 = vadd.f32 %v6714_v31, %v6713_v32  ;;  %v5030_v43 = vadd.f32 %v4982_v17, %v4451_v39  ;;  %v11246_v39 = vld [vmem:[#allocation155_spill] sm:$0xff] }
 0x183   : > { %v2667_v16 = vadd.f32 %v2651_v36, %v11239_v8  ;;  %v2763_v40 = vunpack.c.l.bf16 %v2683_v49  ;;  %v5094_v20 = vmax.f32 %v4515_v27, %v5078_v62  ;;  %v3777_v42 = vrot.slane %v7879_v29, 4  ;;  %v11247_v27 = vld [vmem:[#allocation156_spill] sm:$0xff]  ;;  %v6716_v62 = vpop.f32.mrb[12].mxu0 }
 0x184   : > { %v11241_v61 = vcombine.low %v11219_v9, %v11220_v7  ;;  %v11242_v50 = vcombine.low %v11222_v26, %v11223_v10  ;;  %v3230_v28 = vunpack.c.l.bf16 %v3198_v3  ;;  %v3262_v0 = vmax.bf16 %v7878_v47, %v3198_v3  ;;  %v7880_v49 = vld [vmem:[%s8193_s26 + $0x350] sm:$0xff]  ;;  %v6717_v3 = vpop.f32.mrb[13].mxu0 }
 0x185   : > { %v2715_v5 = vadd.f32 %v2667_v16, %v2136_v24  ;;  %v2779_v2 = vmax.f32 %v2200_v51, %v2763_v40  ;;  %v11245_v36 = vcombine.high %v11243_v34, %v11244_v55  ;;  %v11248_v12 = vcombine.high %v11246_v39, %v11247_v27  ;;  %v7881_v24 = vld [vmem:[%s8193_s26 + $0x3d0] sm:$0xff]  ;;  %v9926_v40 = vpop.f32.mrb[12].mxu1 }
 0x186   : > { %4274 = vmatmul.mubr.bf16.gmra.mrb[116].mxu0 %v11241_v61  ;;  %4853 = vmatmul.mubr.bf16.gmra.mrb[116].mxu1 %v11242_v50  ;;  %v5142_v46 = vmul.f32 0.0625, %v5030_v43  ;;  %v3809_v9 = vunpack.c.l.bf16 %v3777_v42  ;;  %v3841_v7 = vmax.bf16 %v7879_v29, %v3777_v42  ;;  %v4340_v32 = vunpack.c.l.bf16 %v7880_v49  ;;  %11249 = vst [vmem:[#allocation79_spill] sm:$0xff] %v9926_v40  ;;  %v9928_v42 = vpop.f32.mrb[13].mxu1 }
 0x187   : > { %4281 = vmatprep.mubr.bf16.mxu0 %v11245_v36  ;;  %4860 = vmatprep.mubr.bf16.mxu1 %v11248_v12  ;;  %v3246_v26 = vadd.f32 %v3230_v28, %v3182_v58  ;;  %v3342_v10 = vunpack.c.l.bf16 %v3262_v0  ;;  %v4356_v17 = vrot.slane %v7880_v49, 4  ;;  %v4919_v51 = vunpack.c.l.bf16 %v7881_v24  ;;  %v6719_v28 = vpop.f32.mrb[14].mxu0  ;;  %v11250_v12 = vld [vmem:[#allocation53_spill] sm:$0xff] }
 0x188   : > { %v9924_v47 = vadd.f32 %v5142_v46, %v5094_v20  ;;  %v3825_v31 = vadd.f32 %v3809_v9, %v3761_v44  ;;  %v3921_v8 = vunpack.c.l.bf16 %v3841_v7  ;;  %v4935_v16 = vrot.slane %v7881_v24, 4  ;;  %v11251_v20 = vld [vmem:[#allocation55_spill] sm:$0xff]  ;;  %v9934_v44 = vpop.f32.mrb[14].mxu1  ;;  %v6720_v9 = vpop.f32.mrb[15].mxu0 }
 0x189   : > { %v3294_v61 = vadd.f32 %v3246_v26, %v2715_v5  ;;  %v3358_v43 = vmax.f32 %v2779_v2, %v3342_v10  ;;  %v4388_v50 = vunpack.c.l.bf16 %v4356_v17  ;;  %v4420_v29 = vmax.bf16 %v7880_v49, %v4356_v17  ;;  %11252 = vst [vmem:[#allocation78_spill] sm:$0xff] %v9934_v44  ;;  %v9936_v2 = vpop.f32.mrb[15].mxu1  ;;  %v11255_v17 = vld [vmem:[#allocation50_spill] sm:$0xff] }
 0x18a   : > { %v9930_v58 = vadd.f32 %v6717_v3, %v6716_v62  ;;  %v4967_v0 = vunpack.c.l.bf16 %v4935_v16  ;;  %v4999_v36 = vmax.bf16 %v7881_v24, %v4935_v16  ;;  %v1558_v46 = vadd.f32 %v11251_v20, %v11250_v12  ;;  %11253 = vst [vmem:[#allocation61_spill] sm:$0xff] %v9936_v2  ;;  %v11257_v62 = vld [vmem:[#allocation46_spill] sm:$0xff]  ;;  %v7885_v2 = vld [vmem:[%s8193_s26 + $0x358] sm:$0xff] }
 0x18b   : > { %v3873_v7 = vadd.f32 %v3825_v31, %v3294_v61  ;;  %v3937_v40 = vmax.f32 %v3358_v43, %v3921_v8  ;;  %v4404_v11 = vadd.f32 %v4388_v50, %v4340_v32  ;;  %v4500_v5 = vunpack.c.l.bf16 %v4420_v29  ;;  %v11261_v61 = vld [vmem:[#allocation97_spill] sm:$0xff]  ;;  %v11263_v50 = vld [vmem:[#allocation110_spill] sm:$0xff] }
 0x18c   : > { %v9938_v49 = vadd.f32 %v6720_v9, %v6719_v28  ;;  %v4983_v26 = vadd.f32 %v4967_v0, %v4919_v51  ;;  %v5079_v10 = vunpack.c.l.bf16 %v4999_v36  ;;  %v11256_v24 = vunpack.c.l.bf16 %v11255_v17  ;;  %v11264_v29 = vld [vmem:[#allocation101_spill] sm:$0xff]  ;;  %v11267_v20 = vld [vmem:[#allocation158_spill] sm:$0xff] }
 0x18d   : > { %v11258_v16 = vunpack.c.l.bf16 %v11257_v62  ;;  %v11259_v12 = vcombine.low %v11243_v34, %v11244_v55  ;;  %v11260_v32 = vcombine.low %v11246_v39, %v11247_v27  ;;  %v4452_v31 = vadd.f32 %v4404_v11, %v3873_v7  ;;  %v11266_v36 = vld [vmem:[#allocation157_spill] sm:$0xff]  ;;  %v11270_v55 = vld [vmem:[#allocation107_spill] sm:$0xff] }
 0x18e   : > { %11254 = vst [vmem:[#allocation124_spill] sm:$0xff] %v9938_v49  ;;  %v4516_v8 = vmax.f32 %v3937_v40, %v4500_v5  ;;  %v11262_v43 = vunpack.c.l.bf16 %v11261_v61  ;;  %v11265_v28 = vrot.slane %v11264_v29, 4  ;;  %v11268_v9 = vcombine.high %v11266_v36, %v11267_v20  ;;  %v7882_v27 = vld [vmem:[%s8193_s26 + $0x1d8] sm:$0xff] }
 0x18f   : > { %v1622_v3 = vmax.f32 %v11258_v16, %v11256_v24  ;;  %4282 = vmatmul.mubr.bf16.gmra.mrb[120].mxu0 %v11259_v12  ;;  %4861 = vmatmul.mubr.bf16.gmra.mrb[120].mxu1 %v11260_v32  ;;  %v11269_v34 = vcombine.high %v9455_v4, %v9458_v41  ;;  %v11271_v39 = vunpack.c.l.bf16 %v11270_v55  ;;  %v7883_v5 = vld [vmem:[%s8193_s26 + $0x258] sm:$0xff]  ;;  %v5031_v62 = vadd.f32 %v4983_v26, %v4452_v31  ;;  %v9970_v55 = vpop.f32.mrb[16].mxu1 }
 0x190   : > { %v2089_v51 = vadd.f32 %v11263_v50, %v11262_v43  ;;  %v2652_v0 = vunpack.c.l.bf16 %v11265_v28  ;;  %4289 = vmatprep.mubr.bf16.mxu0 %v11268_v9  ;;  %v11272_v40 = vmov %v11265_v28  ;;  %v3183_v17 = vunpack.c.l.bf16 %v7883_v5  ;;  %v6722_v43 = vpop.f32.mrb[16].mxu0  ;;  %v9973_v26 = vpop.f32.mrb[17].mxu1 }
 0x191   : > { %4868 = vmatprep.mubr.bf16.mxu1 %v11269_v34  ;;  %v2201_v11 = vmax.f32 %v1622_v3, %v11271_v39  ;;  %v2684_v7 = vmax.bf16 %v7882_v27, %v11272_v40  ;;  %v3199_v24 = vrot.slane %v7883_v5, 4  ;;  %v5095_v16 = vmax.f32 %v4516_v8, %v5079_v10  ;;  %v7884_v34 = vld [vmem:[%s8193_s26 + $0x2d8] sm:$0xff]  ;;  %v6723_v39 = vpop.f32.mrb[17].mxu0  ;;  %11274 = vst [vmem:[#allocation25_spill] sm:$0xff] %v9973_v26 }
 0x192   : > { %v2137_v12 = vadd.f32 %v2089_v51, %v1558_v46  ;;  %v11273_v32 = vunpack.c.l.bf16 %v11264_v29  ;;  %v3762_v3 = vunpack.c.l.bf16 %v7884_v34  ;;  %v5143_v27 = vmul.f32 0.0625, %v5031_v62  ;;  %v6725_v10 = vpop.f32.mrb[18].mxu0  ;;  %v9977_v29 = vpop.f32.mrb[18].mxu1 }
 0x193   : > { %v2764_v50 = vunpack.c.l.bf16 %v2684_v7  ;;  %v3231_v28 = vunpack.c.l.bf16 %v3199_v24  ;;  %v3263_v9 = vmax.bf16 %v7883_v5, %v3199_v24  ;;  %v3778_v49 = vrot.slane %v7884_v34, 4 }
 0x194   : > { %v2668_v61 = vadd.f32 %v2652_v0, %v11273_v32  ;;  %v4341_v44 = vunpack.c.l.bf16 %v7885_v2  ;;  %v9975_v46 = vadd.f32 %v6723_v39, %v6722_v43  ;;  %v6726_v0 = vpop.f32.mrb[19].mxu0  ;;  %v9979_v7 = vadd.f32 %v5143_v27, %v5095_v16  ;;  %v7886_v43 = vld [vmem:[%s8193_s26 + $0x3d8] sm:$0xff]  ;;  %v11280_v27 = vld [vmem:[#allocation66_spill] sm:$0xff] }
 0x195   : > { %v2780_v31 = vmax.f32 %v2201_v11, %v2764_v50  ;;  %v3247_v8 = vadd.f32 %v3231_v28, %v3183_v17  ;;  %v3343_v51 = vunpack.c.l.bf16 %v3263_v9  ;;  %v3810_v5 = vunpack.c.l.bf16 %v3778_v49 }
 0x196   : > { %v2716_v40 = vadd.f32 %v2668_v61, %v2137_v12  ;;  %11275 = vst [vmem:[#allocation32_spill] sm:$0xff] %v9975_v46  ;;  %v3842_v24 = vmax.bf16 %v7884_v34, %v3778_v49  ;;  %v4357_v62 = vrot.slane %v7885_v2, 4  ;;  %v9981_v12 = vpop.f32.mrb[19].mxu1  ;;  %v9983_v32 = vadd.f32 %v6726_v0, %v6725_v10  ;;  %v11279_v34 = vld [vmem:[#allocation57_spill] sm:$0xff]  ;;  %v11281_v10 = vld [vmem:[#allocation62_spill] sm:$0xff] }
 0x197   : > { %v3359_v26 = vmax.f32 %v2780_v31, %v3343_v51  ;;  %v4920_v39 = vunpack.c.l.bf16 %v7886_v43  ;;  %v11277_v11 = vcombine.low %v11266_v36, %v11267_v20  ;;  %v11278_v17 = vcombine.low %v9455_v4, %v9458_v41  ;;  %v11285_v20 = vld [vmem:[#allocation104_spill] sm:$0xff] }
 0x198   : > { %11276 = vst [vmem:[#allocation27_spill] sm:$0xff] %v9983_v32  ;;  %v3295_v61 = vadd.f32 %v3247_v8, %v2716_v40  ;;  %v3826_v16 = vadd.f32 %v3810_v5, %v3762_v3  ;;  %v3922_v50 = vunpack.c.l.bf16 %v3842_v24  ;;  %v4389_v49 = vunpack.c.l.bf16 %v4357_v62  ;;  %v11283_v8 = vld [vmem:[#allocation56_spill] sm:$0xff]  ;;  %v6728_v24 = vpop.f32.mrb[20].mxu0  ;;  %v10004_v32 = vpop.f32.mrb[20].mxu1 }
 0x199   : > { %4290 = vmatmul.mubr.bf16.gmra.mrb[124].mxu0 %v11277_v11  ;;  %4869 = vmatmul.mubr.bf16.gmra.mrb[124].mxu1 %v11278_v17  ;;  %v4421_v28 = vmax.bf16 %v7885_v2, %v4357_v62  ;;  %v4936_v9 = vrot.slane %v7886_v43, 4  ;;  %v1559_v40 = vadd.f32 %v11280_v27, %v11279_v34  ;;  %v11282_v31 = vunpack.c.l.bf16 %v11281_v10  ;;  %v11287_v11 = vld [vmem:[#allocation118_spill] sm:$0xff]  ;;  %v11288_v34 = vld [vmem:[#allocation115_spill] sm:$0xff] }
 0x19a   : > { %7307 = vmatprep.mubr.f32.mxu0 %v9500_v21  ;;  %v11284_v51 = vunpack.c.l.bf16 %v11283_v8  ;;  %v11286_v0 = vunpack.c.l.bf16 %v11285_v20  ;;  %v3874_v41 = vadd.f32 %v3826_v16, %v3295_v61  ;;  %v3938_v3 = vmax.f32 %v3359_v26, %v3922_v50  ;;  %v11290_v20 = vld [vmem:[#allocation108_spill] sm:$0xff]  ;;  %v7887_v26 = vld [vmem:[%s8193_s26 + $0x1e0] sm:$0xff]  ;;  %v10011_v50 = vpop.f32.mrb[21].mxu1 }
 0x19b   : > { %v4405_v5 = vadd.f32 %v4389_v49, %v4341_v44  ;;  %v4501_v2 = vunpack.c.l.bf16 %v4421_v28  ;;  %v4968_v21 = vunpack.c.l.bf16 %v4936_v9  ;;  %v5000_v62 = vmax.bf16 %v7886_v43, %v4936_v9 }
 0x19c   : > { %v1623_v36 = vmax.f32 %v11284_v51, %v11282_v31  ;;  %v2090_v4 = vadd.f32 %v11287_v11, %v11286_v0  ;;  %v11289_v27 = vunpack.c.l.bf16 %v11288_v34  ;;  %v6729_v31 = vpop.f32.mrb[21].mxu0  ;;  %v11291_v46 = vrot.slane %v11290_v20, 4  ;;  %v10016_v0 = vpop.f32.mrb[22].mxu1 }
 0x19d   : > { %v4453_v8 = vadd.f32 %v4405_v5, %v3874_v41  ;;  %v4517_v51 = vmax.f32 %v3938_v3, %v4501_v2  ;;  %v10013_v43 = vadd.f32 %v6729_v31, %v6728_v24  ;;  %v6731_v49 = vpop.f32.mrb[22].mxu0  ;;  %v4984_v28 = vadd.f32 %v4968_v21, %v4920_v39  ;;  %v7889_v5 = vld [vmem:[%s8193_s26 + $0x2e0] sm:$0xff]  ;;  %v10021_v34 = vpop.f32.mrb[23].mxu1 }
 0x19e   : > { %v2138_v17 = vadd.f32 %v2090_v4, %v1559_v40  ;;  %v2202_v10 = vmax.f32 %v1623_v36, %v11289_v27  ;;  %v2653_v61 = vunpack.c.l.bf16 %v11291_v46  ;;  %v11292_v44 = vmov %v11291_v46  ;;  %v7888_v40 = vld [vmem:[%s8193_s26 + $0x260] sm:$0xff]  ;;  %v6732_v11 = vpop.f32.mrb[23].mxu0  ;;  %11295 = vst [vmem:[#allocation68_spill] sm:$0xff] %v10021_v34 }
 0x19f   : > { %v2685_v16 = vmax.bf16 %v7887_v26, %v11292_v44  ;;  %11293 = vst [vmem:[#allocation24_spill] sm:$0xff] %v10013_v43  ;;  %v5080_v9 = vunpack.c.l.bf16 %v5000_v62  ;;  %v3184_v36 = vunpack.c.l.bf16 %v7888_v40  ;;  %v11294_v4 = vunpack.c.l.bf16 %v11290_v20 }
 0x1a0   : > { %v3200_v3 = vrot.slane %v7888_v40, 4  ;;  %v3763_v2 = vunpack.c.l.bf16 %v7889_v5  ;;  %v10023_v24 = vadd.f32 %v6732_v11, %v6731_v49  ;;  %v5032_v27 = vadd.f32 %v4984_v28, %v4453_v8  ;;  %v7891_v8 = vld [vmem:[%s8193_s26 + $0x3e0] sm:$0xff]  ;;  %v6734_v28 = vpop.f32.mrb[24].mxu0 }
 0x1a1   : > { %v2669_v41 = vadd.f32 %v2653_v61, %v11294_v4  ;;  %v2765_v46 = vunpack.c.l.bf16 %v2685_v16  ;;  %v5096_v39 = vmax.f32 %v4517_v51, %v5080_v9  ;;  %v3779_v21 = vrot.slane %v7889_v5, 4  ;;  %7308 = vmatmul.mubr.f32.vlgmr.msra.gmra.mrb[128].mxu0 %v9523_v14  ;;  %v7890_v4 = vld [vmem:[%s8193_s26 + $0x360] sm:$0xff] }
 0x1a2   : > { %11296 = vst [vmem:[#allocation88_spill] sm:$0xff] %v10023_v24  ;;  %v3232_v26 = vunpack.c.l.bf16 %v3200_v3  ;;  %v3264_v20 = vmax.bf16 %v7888_v40, %v3200_v3  ;;  %7310 = vmatprep.mubr.f32.mxu0 %v9557_v6  ;;  %v5144_v61 = vmul.f32 0.0625, %v5032_v27  ;;  %v4342_v43 = vunpack.c.l.bf16 %v7890_v4  ;;  %v6735_v40 = vpop.f32.mrb[25].mxu0 }
 0x1a3   : > { %v2717_v62 = vadd.f32 %v2669_v41, %v2138_v17  ;;  %v2781_v31 = vmax.f32 %v2202_v10, %v2765_v46  ;;  %v3811_v44 = vunpack.c.l.bf16 %v3779_v21  ;;  %v3843_v16 = vmax.bf16 %v7889_v5, %v3779_v21  ;;  %v10031_v41 = vpop.f32.mrb[24].mxu1  ;;  %v6737_v21 = vpop.f32.mrb[26].mxu0 }
 0x1a4   : > { %v3248_v34 = vadd.f32 %v3232_v26, %v3184_v36  ;;  %v3344_v49 = vunpack.c.l.bf16 %v3264_v20  ;;  %v4358_v11 = vrot.slane %v7890_v4, 4  ;;  %v4921_v51 = vunpack.c.l.bf16 %v7891_v8  ;;  %v10034_v36 = vpop.f32.mrb[25].mxu1  ;;  %v11298_v26 = vld [vmem:[#allocation60_spill] sm:$0xff]  ;;  %v11299_v20 = vld [vmem:[#allocation67_spill] sm:$0xff] }
 0x1a5   : > { %v10029_v9 = vadd.f32 %v5144_v61, %v5096_v39  ;;  %v3827_v14 = vadd.f32 %v3811_v44, %v3763_v2  ;;  %v3923_v17 = vunpack.c.l.bf16 %v3843_v16  ;;  %v4937_v10 = vrot.slane %v7891_v8, 4  ;;  %7311 = vmatmul.mubr.f32.gmra.mrb[130].mxu0 %v9602_v1  ;;  %v10041_v44 = vpop.f32.mrb[26].mxu1  ;;  %v6738_v16 = vpop.f32.mrb[27].mxu0 }
 0x1a6   : > { %v3296_v6 = vadd.f32 %v3248_v34, %v2717_v62  ;;  %v3360_v46 = vmax.f32 %v2781_v31, %v3344_v49  ;;  %v4390_v3 = vunpack.c.l.bf16 %v4358_v11  ;;  %v4422_v5 = vmax.bf16 %v7890_v4, %v4358_v11  ;;  %7313 = vmatprep.mubr.f32.mxu0 %v9653_v48  ;;  %v10043_v4 = vpop.f32.mrb[27].mxu1 }
 0x1a7   : > { %v10036_v27 = vadd.f32 %v6735_v40, %v6734_v28  ;;  %v4969_v39 = vunpack.c.l.bf16 %v4937_v10  ;;  %v5001_v2 = vmax.bf16 %v7891_v8, %v4937_v10  ;;  %v1560_v61 = vadd.f32 %v11299_v20, %v11298_v26  ;;  %v11301_v28 = vld [vmem:[#allocation63_spill] sm:$0xff]  ;;  %v11303_v10 = vld [vmem:[#allocation58_spill] sm:$0xff] }
 0x1a8   : > { %v3875_v1 = vadd.f32 %v3827_v14, %v3296_v6  ;;  %v3939_v34 = vmax.f32 %v3360_v46, %v3923_v17  ;;  %v4406_v62 = vadd.f32 %v4390_v3, %v4342_v43  ;;  %v4502_v31 = vunpack.c.l.bf16 %v4422_v5  ;;  %v11305_v6 = vld [vmem:[#allocation105_spill] sm:$0xff]  ;;  %v11307_v43 = vld [vmem:[#allocation119_spill] sm:$0xff] }
 0x1a9   : > { %11297 = vst [vmem:[#allocation84_spill] sm:$0xff] %v10036_v27  ;;  %v10045_v49 = vadd.f32 %v6738_v16, %v6737_v21  ;;  %v4985_v11 = vadd.f32 %v4969_v39, %v4921_v51  ;;  %v5081_v48 = vunpack.c.l.bf16 %v5001_v2  ;;  %v11302_v8 = vunpack.c.l.bf16 %v11301_v28  ;;  %7314 = vmatmul.mubr.f32.gmra.mrb[132].mxu0 %v9695_v63  ;;  %v11308_v3 = vld [vmem:[#allocation111_spill] sm:$0xff]  ;;  %v11310_v51 = vld [vmem:[#allocation116_spill] sm:$0xff] }
 0x1aa   : > { %v11304_v40 = vunpack.c.l.bf16 %v11303_v10  ;;  %v4454_v20 = vadd.f32 %v4406_v62, %v3875_v1  ;;  %v4518_v14 = vmax.f32 %v3939_v34, %v4502_v31  ;;  %v11306_v17 = vunpack.c.l.bf16 %v11305_v6  ;;  %7316 = vmatprep.mubr.f32.mxu0 %v9745_v52  ;;  %v7892_v2 = vld [vmem:[%s8193_s26 + $0x1e8] sm:$0xff]  ;;  %v6740_v6 = vpop.f32.mrb[28].mxu0 }
 0x1ab   : > { %11300 = vst [vmem:[#allocation72_spill] sm:$0xff] %v10045_v49  ;;  %v11309_v5 = vrot.slane %v11308_v3, 4  ;;  %v11311_v21 = vunpack.c.l.bf16 %v11310_v51  ;;  %v7893_v63 = vld [vmem:[%s8193_s26 + $0x268] sm:$0xff]  ;;  %v11313_v10 = vunpack.c.l.bf16 %v11308_v3  ;;  %v10067_v51 = vpop.f32.mrb[28].mxu1 }
 0x1ac   : > { %v1624_v26 = vmax.f32 %v11304_v40, %v11302_v8  ;;  %v2091_v46 = vadd.f32 %v11307_v43, %v11306_v17  ;;  %v3185_v1 = vunpack.c.l.bf16 %v7893_v63  ;;  %v3201_v34 = vrot.slane %v7893_v63, 4 }
 0x1ad   : > { %v2654_v27 = vunpack.c.l.bf16 %v11309_v5  ;;  %v11312_v16 = vmov %v11309_v5  ;;  %v5033_v62 = vadd.f32 %v4985_v11, %v4454_v20  ;;  %v5097_v31 = vmax.f32 %v4518_v14, %v5081_v48  ;;  %v7894_v5 = vld [vmem:[%s8193_s26 + $0x2e8] sm:$0xff]  ;;  %7317 = vmatmul.mubr.f32.gmra.mrb[134].mxu0 %v9798_v45 }
 0x1ae   : > { %v2203_v39 = vmax.f32 %v1624_v26, %v11311_v21  ;;  %v2686_v28 = vmax.bf16 %v7892_v2, %v11312_v16  ;;  %v2139_v8 = vadd.f32 %v2091_v46, %v1560_v61  ;;  %v3233_v52 = vunpack.c.l.bf16 %v3201_v34  ;;  %v6741_v21 = vpop.f32.mrb[29].mxu0  ;;  %v7895_v20 = vld [vmem:[%s8193_s26 + $0x368] sm:$0xff]  ;;  %v10071_v61 = vpop.f32.mrb[29].mxu1  ;;  %7319 = vmatprep.mubr.f32.mxu0 %v9859_v25 }
 0x1af   : > { %v2670_v40 = vadd.f32 %v2654_v27, %v11313_v10  ;;  %v3265_v43 = vmax.bf16 %v7893_v63, %v3201_v34  ;;  %v3764_v26 = vunpack.c.l.bf16 %v7894_v5  ;;  %v5145_v2 = vmul.f32 0.0625, %v5033_v62  ;;  %v6743_v27 = vpop.f32.mrb[30].mxu0  ;;  %v10076_v63 = vpop.f32.mrb[30].mxu1 }
 0x1b0   : > { %v2766_v17 = vunpack.c.l.bf16 %v2686_v28  ;;  %v3780_v11 = vrot.slane %v7894_v5, 4  ;;  %v4343_v48 = vunpack.c.l.bf16 %v7895_v20  ;;  %v10073_v14 = vadd.f32 %v6741_v21, %v6740_v6  ;;  %11315 = vst [vmem:[#allocation126_spill] sm:$0xff] %v10076_v63  ;;  %v6744_v34 = vpop.f32.mrb[31].mxu0  ;;  %v11327_v63 = vld [vmem:[#allocation120_spill] sm:$0xff] }
 0x1b1   : > { %v2718_v16 = vadd.f32 %v2670_v40, %v2139_v8  ;;  %v3249_v3 = vadd.f32 %v3233_v52, %v3185_v1  ;;  %v3345_v28 = vunpack.c.l.bf16 %v3265_v43  ;;  %v5177_v45 = vadd.f32 %v5145_v2, %v5097_v31  ;;  %v10078_v40 = vpop.f32.mrb[31].mxu1  ;;  %7320 = vmatmul.mubr.f32.gmra.mrb[136].mxu0 %v9924_v47  ;;  %v11318_v52 = vld [vmem:[#allocation69_spill] sm:$0xff]  ;;  %v11319_v43 = vld [vmem:[#allocation76_spill] sm:$0xff]  ;;  %v11320_v2 = vld [vmem:[#allocation70_spill] sm:$0xff] }
 0x1b2   : > { %11314 = vst [vmem:[#allocation125_spill] sm:$0xff] %v10073_v14  ;;  %v2782_v46 = vmax.f32 %v2203_v39, %v2766_v17  ;;  %v3812_v62 = vunpack.c.l.bf16 %v3780_v11  ;;  %v3844_v8 = vmax.bf16 %v7894_v5, %v3780_v11  ;;  %v4359_v10 = vrot.slane %v7895_v20, 4  ;;  %11316 = vst [vmem:[#allocation28_spill] sm:$0xff] %v10078_v40  ;;  %v7896_v14 = vld [vmem:[%s8193_s26 + $0x3e8] sm:$0xff]  ;;  %7322 = vmatprep.mubr.f32.mxu0 %v9979_v7 }
 0x1b3   : > { %v10080_v49 = vadd.f32 %v6744_v34, %v6743_v27  ;;  %v3297_v6 = vadd.f32 %v3249_v3, %v2718_v16  ;;  %v4922_v24 = vunpack.c.l.bf16 %v7896_v14  ;;  %v4938_v31 = vrot.slane %v7896_v14, 4  ;;  %v11322_v27 = vld [vmem:[#allocation64_spill] sm:$0xff] }
 0x1b4   : > { %v3361_v21 = vmax.f32 %v2782_v46, %v3345_v28  ;;  %v3828_v25 = vadd.f32 %v3812_v62, %v3764_v26  ;;  %v3924_v39 = vunpack.c.l.bf16 %v3844_v8  ;;  %v4391_v1 = vunpack.c.l.bf16 %v4359_v10  ;;  %v11324_v46 = vld [vmem:[#allocation112_spill] sm:$0xff]  ;;  %v11326_v28 = vld [vmem:[#allocation121_spill] sm:$0xff]  ;;  %v6826_v8 = vpop.f32.mrb[32].mxu0 }
 0x1b5   : > { %11317 = vst [vmem:[#allocation33_spill] sm:$0xff] %v10080_v49  ;;  %v4423_v17 = vmax.bf16 %v7895_v20, %v4359_v10  ;;  %v1561_v5 = vadd.f32 %v11319_v43, %v11318_v52  ;;  %v11321_v11 = vunpack.c.l.bf16 %v11320_v2  ;;  %v11323_v34 = vunpack.c.l.bf16 %v11322_v27  ;;  %v10096_v2 = vpop.f32.mrb[32].mxu1  ;;  %7323 = vmatmul.mubr.f32.gmra.mrb[138].mxu0 %v10029_v9 }
 0x1b6   : > { %v11325_v3 = vunpack.c.l.bf16 %v11324_v46  ;;  %v3876_v47 = vadd.f32 %v3828_v25, %v3297_v6  ;;  %v3940_v26 = vmax.f32 %v3361_v21, %v3924_v39  ;;  %v4407_v62 = vadd.f32 %v4391_v1, %v4343_v48  ;;  %11329 = vst [vmem:[#allocation29_spill] sm:$0xff] %v10096_v2  ;;  %v11330_v46 = vld [vmem:[#allocation114_spill] sm:$0xff]  ;;  %v7897_v48 = vld [vmem:[%s8193_s26 + $0x1f0] sm:$0xff]  ;;  %7325 = vmatprep.mubr.f32.mxu0 %v5177_v45 }
 0x1b7   : > { %v1625_v16 = vmax.f32 %v11323_v34, %v11321_v11  ;;  %v4503_v20 = vunpack.c.l.bf16 %v4423_v17  ;;  %v4970_v7 = vunpack.c.l.bf16 %v4938_v31  ;;  %v5002_v10 = vmax.bf16 %v7896_v14, %v4938_v31  ;;  %v6827_v11 = vpop.f32.mrb[33].mxu0  ;;  %v7898_v31 = vld [vmem:[%s8193_s26 + $0x270] sm:$0xff] }
 0x1b8   : > { %v2092_v49 = vadd.f32 %v11326_v28, %v11325_v3  ;;  %v11328_v52 = vunpack.c.l.bf16 %v11327_v63  ;;  %v4455_v27 = vadd.f32 %v4407_v62, %v3876_v47  ;;  %v11331_v6 = vrot.slane %v11330_v46, 4  ;;  %v6829_v39 = vpop.f32.mrb[34].mxu0  ;;  %v7899_v62 = vld [vmem:[%s8193_s26 + $0x2f0] sm:$0xff] }
 0x1b9   : > { %v4519_v34 = vmax.f32 %v3940_v26, %v4503_v20  ;;  %v6828_v63 = vadd.f32 %v6827_v11, %v6826_v8  ;;  %v4986_v1 = vadd.f32 %v4970_v7, %v4922_v24  ;;  %v5082_v17 = vunpack.c.l.bf16 %v5002_v10 }
 0x1ba   : > { %v2140_v40 = vadd.f32 %v2092_v49, %v1561_v5  ;;  %v2204_v43 = vmax.f32 %v1625_v16, %v11328_v52  ;;  %v2655_v21 = vunpack.c.l.bf16 %v11331_v6  ;;  %v11332_v25 = vmov %v11331_v6  ;;  %v10104_v49 = vpop.f32.mrb[33].mxu1  ;;  %v6830_v16 = vpop.f32.mrb[35].mxu0 }
 0x1bb   : > { %v2687_v14 = vmax.bf16 %v7897_v48, %v11332_v25  ;;  %11333 = vst [vmem:[#allocation26_spill] sm:$0xff] %v10104_v49  ;;  %v3186_v5 = vunpack.c.l.bf16 %v7898_v31  ;;  %v10107_v9 = vpop.f32.mrb[34].mxu1  ;;  %v11335_v3 = vunpack.c.l.bf16 %v11330_v46  ;;  %v3202_v26 = vrot.slane %v7898_v31, 4 }
 0x1bc   : > { %11334 = vst [vmem:[#allocation127_spill] sm:$0xff] %v10107_v9  ;;  %v3765_v20 = vunpack.c.l.bf16 %v7899_v62  ;;  %v10112_v52 = vpop.f32.mrb[35].mxu1  ;;  %v10115_v8 = vadd.f32 %v6828_v63, %v9803_v23  ;;  %v6831_v24 = vadd.f32 %v6830_v16, %v6829_v39  ;;  %v5034_v45 = vadd.f32 %v4986_v1, %v4455_v27  ;;  %v5365_v23 = vld [vmem:[%s10675_s3] sm:$0xff]  ;;  %v7901_v27 = vld [vmem:[%s8193_s26 + $0x3f0] sm:$0xff] }
 0x1bd   : > { %v2671_v28 = vadd.f32 %v2655_v21, %v11335_v3  ;;  %v2767_v47 = vunpack.c.l.bf16 %v2687_v14  ;;  %11336 = vst [vmem:[#allocation128_spill] sm:$0xff] %v10112_v52  ;;  %v5098_v7 = vmax.f32 %v4519_v34, %v5082_v17  ;;  %v3234_v6 = vunpack.c.l.bf16 %v3202_v26  ;;  %v7900_v14 = vld [vmem:[%s8193_s26 + $0x370] sm:$0xff]  ;;  %7331 = vmatprep.subr.mxu1 %v5365_v23 }
 0x1be   : > { %11337 = vst [vmem:[#allocation129_spill] sm:$0xff] %v10115_v8  ;;  %v3266_v48 = vmax.bf16 %v7898_v31, %v3202_v26  ;;  %v10118_v46 = vadd.f32 %v6831_v24, %v9813_v54  ;;  %v5146_v21 = vmul.f32 0.0625, %v5034_v45  ;;  %v3781_v25 = vrot.slane %v7899_v62, 4  ;;  %v10125_v31 = vpop.f32.mrb[36].mxu1  ;;  %7332 = vmatpush3.msra.mxu1 %v5365_v23 }
 0x1bf   : > { %v2719_v10 = vadd.f32 %v2671_v28, %v2140_v40  ;;  %v2783_v11 = vmax.f32 %v2204_v43, %v2767_v47  ;;  %v4344_v3 = vunpack.c.l.bf16 %v7900_v14  ;;  %v3250_v63 = vadd.f32 %v3234_v6, %v3186_v5  ;;  %v6832_v43 = vpop.f32.mrb[36].mxu0  ;;  %11339 = vst [vmem:[#allocation89_spill] sm:$0xff] %v10125_v31 }
 0x1c0   : > { %11338 = vst [vmem:[#allocation71_spill] sm:$0xff] %v10118_v46  ;;  %v3346_v39 = vunpack.c.l.bf16 %v3266_v48  ;;  %v4360_v16 = vrot.slane %v7900_v14, 4  ;;  %v4923_v34 = vunpack.c.l.bf16 %v7901_v27  ;;  %v5178_v40 = vadd.f32 %v5146_v21, %v5098_v7  ;;  %v6833_v45 = vpop.f32.mrb[37].mxu0  ;;  %v10127_v46 = vpop.f32.mrb[37].mxu1 }
 0x1c1   : > { %v3813_v1 = vunpack.c.l.bf16 %v3781_v25  ;;  %v3845_v17 = vmax.bf16 %v7899_v62, %v3781_v25  ;;  %v4939_v54 = vrot.slane %v7901_v27, 4  ;;  %v3298_v28 = vadd.f32 %v3250_v63, %v2719_v10  ;;  %11340 = vst [vmem:[#allocation85_spill] sm:$0xff] %v10127_v46  ;;  %v10129_v7 = vpop.f32.mrb[38].mxu0  ;;  %v10131_v21 = vpop.f32.mrb[38].mxu1  ;;  %v11342_v10 = vld [vmem:[#allocation74_spill] sm:$0xff] }
 0x1c2   : > { %v3362_v47 = vmax.f32 %v2783_v11, %v3346_v39  ;;  %v4392_v26 = vunpack.c.l.bf16 %v4360_v16  ;;  %v4424_v24 = vmax.bf16 %v7900_v14, %v4360_v16  ;;  %7326 = vmatmul.mubr.f32.gmra.mrb[140].mxu0 %v5178_v40  ;;  %11341 = vst [vmem:[#allocation73_spill] sm:$0xff] %v10131_v21  ;;  %v6834_v23 = vadd.f32 %v6833_v45, %v6832_v43  ;;  %v11343_v11 = vld [vmem:[#allocation77_spill] sm:$0xff]  ;;  %v6836_v63 = vpop.f32.mrb[39].mxu0  ;;  %v10135_v39 = vpop.f32.mrb[39].mxu1  ;;  %v11352_v21 = vld [vmem:[#allocation122_spill] sm:$0xff] }
 0x1c3   : > { %v3829_v5 = vadd.f32 %v3813_v1, %v3765_v20  ;;  %v3925_v6 = vunpack.c.l.bf16 %v3845_v17  ;;  %v4971_v48 = vunpack.c.l.bf16 %v4939_v54  ;;  %v5003_v8 = vmax.bf16 %v7901_v27, %v4939_v54  ;;  %11344 = vst [vmem:[#allocation135_spill] sm:$0xff] %v10135_v39  ;;  %v11346_v17 = vld [vmem:[#allocation75_spill] sm:$0xff]  ;;  %v11350_v43 = vld [vmem:[#allocation113_spill] sm:$0xff] }
 0x1c4   : > { %v4408_v62 = vadd.f32 %v4392_v26, %v4344_v3  ;;  %v4504_v25 = vunpack.c.l.bf16 %v4424_v24  ;;  %v1562_v14 = vadd.f32 %v11343_v11, %v11342_v10  ;;  %v10138_v27 = vadd.f32 %v6834_v23, %v9853_v57  ;;  %v11348_v3 = vld [vmem:[#allocation65_spill] sm:$0xff]  ;;  %v11356_v23 = vld [vmem:[#allocation123_spill] sm:$0xff] }
 0x1c5   : > { %v3877_v16 = vadd.f32 %v3829_v5, %v3298_v28  ;;  %v3941_v20 = vmax.f32 %v3362_v47, %v3925_v6  ;;  %v4987_v40 = vadd.f32 %v4971_v48, %v4923_v34  ;;  %v5083_v1 = vunpack.c.l.bf16 %v5003_v8  ;;  %v11353_v11 = vld [vmem:[#allocation117_spill] sm:$0xff] }
 0x1c6   : > { %11345 = vst [vmem:[#allocation130_spill] sm:$0xff] %v10138_v27  ;;  %v11347_v54 = vunpack.c.l.bf16 %v11346_v17  ;;  %v11349_v26 = vunpack.c.l.bf16 %v11348_v3  ;;  %v11351_v45 = vunpack.c.l.bf16 %v11350_v43  ;;  %v11354_v46 = vrot.slane %v11353_v11, 4  ;;  %v7902_v34 = vld [vmem:[%s8193_s26 + $0x1f8] sm:$0xff] }
 0x1c7   : > { %v4456_v28 = vadd.f32 %v4408_v62, %v3877_v16  ;;  %v4520_v47 = vmax.f32 %v3941_v20, %v4504_v25  ;;  %v7903_v5 = vld [vmem:[%s8193_s26 + $0x278] sm:$0xff]  ;;  %v11357_v17 = vunpack.c.l.bf16 %v11356_v23  ;;  %v11358_v3 = vunpack.c.l.bf16 %v11353_v11  ;;  %v6838_v16 = vpop.f32.mrb[40].mxu0  ;;  %v10158_v20 = vpop.f32.mrb[40].mxu1 }
 0x1c8   : > { %v1626_v24 = vmax.f32 %v11349_v26, %v11347_v54  ;;  %v2093_v10 = vadd.f32 %v11352_v21, %v11351_v45  ;;  %v2656_v39 = vunpack.c.l.bf16 %v11354_v46  ;;  %v11355_v8 = vmov %v11354_v46  ;;  %v7904_v62 = vld [vmem:[%s8193_s26 + $0x2f8] sm:$0xff]  ;;  %11359 = vst [vmem:[#allocation131_spill] sm:$0xff] %v10158_v20  ;;  %v10160_v23 = vpop.f32.mrb[41].mxu1 }
 0x1c9   : > { %v2688_v57 = vmax.bf16 %v7902_v34, %v11355_v8  ;;  %v3187_v6 = vunpack.c.l.bf16 %v7903_v5  ;;  %v3203_v43 = vrot.slane %v7903_v5, 4  ;;  %v5035_v21 = vadd.f32 %v4987_v40, %v4456_v28  ;;  %11360 = vst [vmem:[#allocation132_spill] sm:$0xff] %v10160_v23  ;;  %v7905_v11 = vld [vmem:[%s8193_s26 + $0x378] sm:$0xff]  ;;  %v10163_v28 = vpop.f32.mrb[42].mxu1 }
 0x1ca   : > { %v2141_v48 = vadd.f32 %v2093_v10, %v1562_v14  ;;  %v2205_v54 = vmax.f32 %v1626_v24, %v11357_v17  ;;  %v2672_v26 = vadd.f32 %v2656_v39, %v11358_v3  ;;  %v5099_v45 = vmax.f32 %v4520_v47, %v5083_v1  ;;  %v6839_v10 = vpop.f32.mrb[41].mxu0  ;;  %11361 = vst [vmem:[#allocation133_spill] sm:$0xff] %v10163_v28  ;;  %v7906_v23 = vld [vmem:[%s8193_s26 + $0x3f8] sm:$0xff]  ;;  %s8016_s26 = smov [#allocation10]  }
 0x1cb   : > { %v2768_v46 = vunpack.c.l.bf16 %v2688_v57  ;;  %v3766_v25 = vunpack.c.l.bf16 %v7904_v62  ;;  %v3235_v8 = vunpack.c.l.bf16 %v3203_v43  ;;  %v3267_v27 = vmax.bf16 %v7903_v5, %v3203_v43  ;;  %v6841_v1 = vpop.f32.mrb[42].mxu0  ;;  %s7939_s29 = sshll.u32 %s8016_s26, 4  ;;  %s7940_s29 = int_to_ptr.vmem [resolvable:$false] %s7939_s29 }
 0x1cc   : > { %v2720_v34 = vadd.f32 %v2672_v26, %v2141_v48  ;;  %v3782_v14 = vrot.slane %v7904_v62, 4  ;;  %v5147_v24 = vmul.f32 0.0625, %v5035_v21  ;;  %v4345_v17 = vunpack.c.l.bf16 %v7905_v11  ;;  %v6842_v48 = vpop.f32.mrb[43].mxu0  ;;  %v10165_v26 = vpop.f32.mrb[43].mxu1  ;;  %s7941_s12 = scalar_lea.vmem %s7940_s29, 4096  ;;  %p7942_p8 = scmp.lt.s32.totalorder %s10625_s16, %s7940_s29 }
 0x1cd   : > { %v2784_v39 = vmax.f32 %v2205_v54, %v2768_v46  ;;  %v4361_v40 = vrot.slane %v7905_v11, 4  ;;  %v3251_v47 = vadd.f32 %v3235_v8, %v3187_v6  ;;  %v3347_v57 = vunpack.c.l.bf16 %v3267_v27  ;;  %11362 = vst [vmem:[#allocation136_spill] sm:$0xff] %v10165_v26  ;;  %p7943_p9 = scmp.lt.s32.totalorder %s7941_s12, %s7935_s19 }
 0x1ce   : > { %v3814_v3 = vunpack.c.l.bf16 %v3782_v14  ;;  %v3846_v20 = vmax.bf16 %v7904_v62, %v3782_v14  ;;  %v5179_v5 = vadd.f32 %v5147_v24, %v5099_v45  ;;  %v4924_v21 = vunpack.c.l.bf16 %v7906_v23 }
 0x1cf   : > { %v4393_v43 = vunpack.c.l.bf16 %v4361_v40  ;;  %v4425_v31 = vmax.bf16 %v7905_v11, %v4361_v40  ;;  %v3299_v52 = vadd.f32 %v3251_v47, %v2720_v34  ;;  %v3363_v54 = vmax.f32 %v2784_v39, %v3347_v57  ;;  %v6844_v11 = vpop.f32.mrb[44].mxu0  ;;  %p7944_p10 = por %p7943_p9, %p7942_p8 }
 0x1d0   : > { %v3830_v46 = vadd.f32 %v3814_v3, %v3766_v25  ;;  %v3926_v9 = vunpack.c.l.bf16 %v3846_v20  ;;  %7328 = vmatprep.mubr.f32.mxu0 %v5179_v5  ;;  %v4940_v28 = vrot.slane %v7906_v23, 4  ;;  %v6837_v27 = vadd.f32 %v6836_v63, %v10129_v7  ;;  %v6908_v20 = vpop.f32.mrb[44].mxu1 }
 0x1d1   : > { %v4409_v49 = vadd.f32 %v4393_v43, %v4345_v17  ;;  %v4505_v2 = vunpack.c.l.bf16 %v4425_v31  ;;  %v6840_v8 = vadd.f32 %v6839_v10, %v6838_v16  ;;  %v6843_v14 = vadd.f32 %v6842_v48, %v6841_v1  ;;  %v6909_v7 = vpop.f32.mrb[45].mxu1  ;;  %v11371_v43 = vld [vmem:[#allocation28_spill] sm:$0xff]  ;;  %p7945_p1 = pnand %p7944_p10, %p7938_p7 }
 0x1d2   : > { %v3878_v6 = vadd.f32 %v3830_v46, %v3299_v52  ;;  %v3942_v62 = vmax.f32 %v3363_v54, %v3926_v9  ;;  %v4972_v26 = vunpack.c.l.bf16 %v4940_v28  ;;  %v5004_v45 = vmax.bf16 %v7906_v23, %v4940_v28  ;;  %v6845_v9 = vpop.f32.mrb[45].mxu0  ;;  %v6911_v17 = vpop.f32.mrb[46].mxu1  ;;  %v11372_v54 = vld [vmem:[#allocation29_spill] sm:$0xff] }
 0x1d3   : > { %v10170_v24 = vadd.f32 %v6837_v27, %v9863_v37  ;;  %v6764_v25 = vadd.f32 %v9801_v15, %v9795_v19  ;;  %v10175_v31 = vadd.f32 %v6840_v8, %v9898_v30  ;;  %v10178_v52 = vadd.f32 %v6843_v14, %v9908_v35  ;;  %v6847_v37 = vpop.f32.mrb[46].mxu0  ;;  %v6912_v40 = vpop.f32.mrb[47].mxu1  ;;  %v11374_v27 = vld [vmem:[#allocation127_spill] sm:$0xff]  ;;  %v11378_v14 = vld [vmem:[#allocation73_spill] sm:$0xff] }
 0x1d4   : > { %v4457_v34 = vadd.f32 %v4409_v49, %v3878_v6  ;;  %v4521_v39 = vmax.f32 %v3942_v62, %v4505_v2  ;;  %v4988_v63 = vadd.f32 %v4972_v26, %v4924_v21  ;;  %v5084_v16 = vunpack.c.l.bf16 %v5004_v45  ;;  %v6848_v19 = vpop.f32.mrb[47].mxu0  ;;  %v11363_v2 = vld [vmem:[#allocation59_spill] sm:$0xff]  ;;  %v11369_v26 = vld [vmem:[#allocation68_spill] sm:$0xff]  ;;  %v11376_v6 = vld [vmem:[#allocation89_spill] sm:$0xff] }
 0x1d5   : > { %v6846_v10 = vadd.f32 %v6845_v9, %v6844_v11  ;;  %v6767_v23 = vadd.f32 %v9811_v60, %v9805_v59  ;;  %v6770_v15 = vadd.f32 %v9851_v13, %v9849_v22  ;;  %v6773_v30 = vadd.f32 %v9861_v33, %v9856_v53  ;;  %v11364_v60 = vld [vmem:[#allocation79_spill] sm:$0xff]  ;;  %v11365_v22 = vld [vmem:[#allocation78_spill] sm:$0xff]  ;;  %v11366_v13 = vld [vmem:[#allocation61_spill] sm:$0xff] }
 0x1d6   : > { %v6776_v35 = vadd.f32 %v9896_v38, %v9889_v18  ;;  %v6779_v49 = vadd.f32 %v11363_v2, %v9901_v56  ;;  %v5036_v1 = vadd.f32 %v4988_v63, %v4457_v34  ;;  %v5100_v28 = vmax.f32 %v4521_v39, %v5084_v16  ;;  %v11367_v53 = vld [vmem:[#allocation25_spill] sm:$0xff]  ;;  %v11368_v56 = vld [vmem:[#allocation124_spill] sm:$0xff]  ;;  %v11380_v45 = vld [vmem:[#allocation131_spill] sm:$0xff] }
 0x1d7   : > { %v10191_v47 = vadd.f32 %v6846_v10, %v9930_v58  ;;  %v6849_v59 = vadd.f32 %v6848_v19, %v6847_v37  ;;  %v6782_v57 = vadd.f32 %v9928_v42, %v11364_v60  ;;  %v6785_v3 = vadd.f32 %v11366_v13, %v11365_v22  ;;  %v11377_v62 = vld [vmem:[#allocation85_spill] sm:$0xff]  ;;  %v11381_v11 = vld [vmem:[#allocation132_spill] sm:$0xff] }
 0x1d8   : > { %v6788_v33 = vadd.f32 %v11367_v53, %v9970_v55  ;;  %v6791_v18 = vadd.f32 %v9981_v12, %v9977_v29  ;;  %v5148_v38 = vmul.f32 0.0625, %v5036_v1  ;;  %v6794_v58 = vadd.f32 %v10011_v50, %v10004_v32  ;;  %v11370_v12 = vld [vmem:[#allocation126_spill] sm:$0xff]  ;;  %v6850_v50 = vpop.f32.mrb[48].mxu0  ;;  %v11382_v39 = vld [vmem:[#allocation133_spill] sm:$0xff]  ;;  %v11383_v9 = vld [vmem:[#allocation136_spill] sm:$0xff] }
 0x1d9   : > { %v10202_v48 = vadd.f32 %v6849_v59, %v11368_v56  ;;  %v6797_v5 = vadd.f32 %v11369_v26, %v10016_v0  ;;  %v10210_v42 = vadd.f32 %v10034_v36, %v10031_v41  ;;  %v10214_v55 = vadd.f32 %v10043_v4, %v10041_v44  ;;  %v11373_v0 = vld [vmem:[#allocation26_spill] sm:$0xff]  ;;  %v11375_v41 = vld [vmem:[#allocation128_spill] sm:$0xff]  ;;  %v6914_v4 = vpop.f32.mrb[48].mxu1  ;;  %v6851_v8 = vpop.f32.mrb[49].mxu0 }
 0x1da   : > { %v10218_v29 = vadd.f32 %v10071_v61, %v10067_v51  ;;  %v10222_v21 = vadd.f32 %v11371_v43, %v11370_v12  ;;  %v5180_v32 = vadd.f32 %v5148_v38, %v5100_v28  ;;  %v6892_v46 = vadd.f32 %v11373_v0, %v11372_v54  ;;  %v11379_v51 = vld [vmem:[#allocation135_spill] sm:$0xff]  ;;  %v6915_v10 = vpop.f32.mrb[49].mxu1  ;;  %v6853_v19 = vpop.f32.mrb[50].mxu0 }
 0x1db   : > { %v6895_v36 = vadd.f32 %v11375_v41, %v11374_v27  ;;  %v6898_v44 = vadd.f32 %v11377_v62, %v11376_v6  ;;  %v6901_v61 = vadd.f32 %v11379_v51, %v11378_v14  ;;  %v6904_v34 = vadd.f32 %v11381_v11, %v11380_v45  ;;  %v6917_v59 = vpop.f32.mrb[50].mxu1  ;;  %v6854_v60 = vpop.f32.mrb[51].mxu0 }
 0x1dc   : > { %v6907_v63 = vadd.f32 %v11383_v9, %v11382_v39  ;;  %v6910_v16 = vadd.f32 %v6909_v7, %v6908_v20  ;;  %7329 = vmatmul.mubr.f32.gmra.mrb[142].mxu0 %v5180_v32  ;;  %v6852_v37 = vadd.f32 %v6851_v8, %v6850_v50  ;;  %v10236_v2 = vadd.f32 %v6892_v46, %v6764_v25  ;;  %v6918_v20 = vpop.f32.mrb[51].mxu1  ;;  %v11384_v7 = vld [vmem:[#allocation32_spill] sm:$0xff] }
 0x1dd   : > { %v10238_v1 = vadd.f32 %v6895_v36, %v6767_v23  ;;  %v10240_v28 = vadd.f32 %v6898_v44, %v6770_v15  ;;  %v10242_v22 = vadd.f32 %v6901_v61, %v6773_v30  ;;  %v10244_v13 = vadd.f32 %v6904_v34, %v6776_v35  ;;  %v11385_v15 = vld [vmem:[#allocation27_spill] sm:$0xff]  ;;  %v11386_v36 = vld [vmem:[#allocation24_spill] sm:$0xff] }
 0x1de   : > { %v10246_v53 = vadd.f32 %v6907_v63, %v6779_v49  ;;  %v10248_v38 = vadd.f32 %v6910_v16, %v6782_v57  ;;  %v10251_v56 = vadd.f32 %v6852_v37, %v11384_v7  ;;  %v6855_v25 = vadd.f32 %v6854_v60, %v6853_v19  ;;  %v6856_v49 = vpop.f32.mrb[52].mxu0  ;;  %v6920_v57 = vpop.f32.mrb[52].mxu1  ;;  %v11387_v44 = vld [vmem:[#allocation88_spill] sm:$0xff] }
 0x1df   : > { %v6913_v26 = vadd.f32 %v6912_v40, %v6911_v17  ;;  %v6916_v23 = vadd.f32 %v6915_v10, %v6914_v4  ;;  %v6919_v12 = vadd.f32 %v6918_v20, %v6917_v59  ;;  %v6857_v50 = vpop.f32.mrb[53].mxu0  ;;  %v6921_v54 = vpop.f32.mrb[53].mxu1  ;;  %v11388_v16 = vld [vmem:[#allocation84_spill] sm:$0xff] }
 0x1e0   : > { %v10254_v43 = vadd.f32 %v6855_v25, %v11385_v15  ;;  %v6858_v0 = vadd.f32 %v6857_v50, %v6856_v49  ;;  %v6859_v46 = vpop.f32.mrb[54].mxu0  ;;  %v6922_v27 = vadd.f32 %v6921_v54, %v6920_v57  ;;  %v6923_v41 = vpop.f32.mrb[54].mxu1  ;;  %v11390_v54 = vld [vmem:[#allocation125_spill] sm:$0xff] }
 0x1e1   : > { %v10256_v32 = vadd.f32 %v6913_v26, %v6785_v3  ;;  %v10258_v30 = vadd.f32 %v6916_v23, %v6788_v33  ;;  %v10260_v35 = vadd.f32 %v6919_v12, %v6791_v18  ;;  %v6860_v17 = vpop.f32.mrb[55].mxu0  ;;  %v6924_v40 = vpop.f32.mrb[55].mxu1 }
 0x1e2   : > { %v10263_v6 = vadd.f32 %v6858_v0, %v11386_v36  ;;  %v6861_v62 = vadd.f32 %v6860_v17, %v6859_v46  ;;  %v10265_v3 = vadd.f32 %v6922_v27, %v6794_v58  ;;  %v6925_v33 = vadd.f32 %v6924_v40, %v6923_v41  ;;  %v6862_v8 = vpop.f32.mrb[56].mxu0  ;;  %v6926_v14 = vpop.f32.mrb[56].mxu1 }
 0x1e3   : > { %v6863_v51 = vpop.f32.mrb[57].mxu0  ;;  %v6927_v61 = vpop.f32.mrb[57].mxu1 }
 0x1e4   : > { %v10268_v18 = vadd.f32 %v6861_v62, %v11387_v44  ;;  %v10270_v4 = vadd.f32 %v6925_v33, %v6797_v5  ;;  %v6864_v45 = vadd.f32 %v6863_v51, %v6862_v8  ;;  %v6865_v11 = vpop.f32.mrb[58].mxu0  ;;  %v6928_v34 = vadd.f32 %v6927_v61, %v6926_v14  ;;  %v6929_v39 = vpop.f32.mrb[58].mxu1  ;;  %v11389_v5 = vld [vmem:[#allocation72_spill] sm:$0xff] }
 0x1e5   : > { %v6866_v9 = vpop.f32.mrb[59].mxu0  ;;  %v6930_v63 = vpop.f32.mrb[59].mxu1 }
 0x1e6   : > { %v10273_v10 = vadd.f32 %v6864_v45, %v11388_v16  ;;  %v6867_v58 = vadd.f32 %v6866_v9, %v6865_v11  ;;  %v10276_v37 = vadd.f32 %v6928_v34, %v10210_v42  ;;  %v6931_v19 = vadd.f32 %v6930_v63, %v6929_v39  ;;  %v6868_v20 = vpop.f32.mrb[60].mxu0  ;;  %v6932_v7 = vpop.f32.mrb[60].mxu1  ;;  %v11392_v11 = vld [vmem:[#allocation129_spill] sm:$0xff] }
 0x1e7   : > { %v6869_v25 = vpop.f32.mrb[61].mxu0  ;;  %v6933_v26 = vpop.f32.mrb[61].mxu1 }
 0x1e8   : > { %v10279_v59 = vadd.f32 %v6867_v58, %v11389_v5  ;;  %v10282_v60 = vadd.f32 %v6931_v19, %v10214_v55  ;;  %v6870_v23 = vadd.f32 %v6869_v25, %v6868_v20  ;;  %v6871_v12 = vpop.f32.mrb[62].mxu0  ;;  %v6934_v15 = vadd.f32 %v6933_v26, %v6932_v7  ;;  %v6935_v49 = vpop.f32.mrb[62].mxu1  ;;  %v11391_v55 = vld [vmem:[#allocation33_spill] sm:$0xff] }
 0x1e9   : > { %v6872_v57 = vpop.f32.mrb[63].mxu0  ;;  %v6936_v50 = vpop.f32.mrb[63].mxu1 }
 0x1ea   : > { %v10285_v42 = vadd.f32 %v6870_v23, %v11390_v54  ;;  %v6873_v0 = vadd.f32 %v6872_v57, %v6871_v12  ;;  %v10288_v46 = vadd.f32 %v6934_v15, %v10218_v29  ;;  %v6937_v27 = vadd.f32 %v6936_v50, %v6935_v49  ;;  %v6954_v40 = vpop.f32.mrb[64].mxu0  ;;  %v7018_v36 = vpop.f32.mrb[64].mxu1  ;;  %v11394_v49 = vld [vmem:[#allocation130_spill] sm:$0xff] }
 0x1eb   : > { %v6955_v62 = vpop.f32.mrb[65].mxu0  ;;  %v7019_v33 = vpop.f32.mrb[65].mxu1 }
 0x1ec   : > { %v10291_v41 = vadd.f32 %v6873_v0, %v11391_v55  ;;  %v10294_v17 = vadd.f32 %v6937_v27, %v10222_v21  ;;  %v6956_v44 = vadd.f32 %v6955_v62, %v6954_v40  ;;  %v6957_v8 = vpop.f32.mrb[66].mxu0  ;;  %v7020_v14 = vadd.f32 %v7019_v33, %v7018_v36  ;;  %v7021_v51 = vpop.f32.mrb[66].mxu1  ;;  %v11393_v21 = vld [vmem:[#allocation71_spill] sm:$0xff] }
 0x1ed   : > { %v6958_v61 = vpop.f32.mrb[67].mxu0  ;;  %v7022_v45 = vpop.f32.mrb[67].mxu1 }
 0x1ee   : > { %v10297_v29 = vadd.f32 %v6956_v44, %v11392_v11  ;;  %v6959_v34 = vadd.f32 %v6958_v61, %v6957_v8  ;;  %v10300_v39 = vadd.f32 %v7020_v14, %v10236_v2  ;;  %v7023_v9 = vadd.f32 %v7022_v45, %v7021_v51  ;;  %v6960_v58 = vpop.f32.mrb[68].mxu0  ;;  %v7024_v19 = vpop.f32.mrb[68].mxu1 }
 0x1ef   : > { %v6961_v5 = vpop.f32.mrb[69].mxu0  ;;  %v7025_v20 = vpop.f32.mrb[69].mxu1 }
 0x1f0   : > { %v10303_v63 = vadd.f32 %v6959_v34, %v11393_v21  ;;  %v10306_v16 = vadd.f32 %v7023_v9, %v10238_v1  ;;  %v6962_v7 = vadd.f32 %v6961_v5, %v6960_v58  ;;  %v6963_v25 = vpop.f32.mrb[70].mxu0  ;;  %v7026_v26 = vadd.f32 %v7025_v20, %v7024_v19  ;;  %v7027_v23 = vpop.f32.mrb[70].mxu1 }
 0x1f1   : > { %v6964_v12 = vpop.f32.mrb[71].mxu0  ;;  %v7028_v15 = vpop.f32.mrb[71].mxu1 }
 0x1f2   : > { %v10309_v2 = vadd.f32 %v6962_v7, %v11394_v49  ;;  %v6965_v57 = vadd.f32 %v6964_v12, %v6963_v25  ;;  %v10312_v50 = vadd.f32 %v7026_v26, %v10240_v28  ;;  %v7029_v54 = vadd.f32 %v7028_v15, %v7027_v23  ;;  %v6966_v27 = vpop.f32.mrb[72].mxu0  ;;  %v7030_v55 = vpop.f32.mrb[72].mxu1 }
 0x1f3   : > { %v6967_v40 = vpop.f32.mrb[73].mxu0  ;;  %v7031_v36 = vpop.f32.mrb[73].mxu1 }
 0x1f4   : > { %v10315_v1 = vadd.f32 %v6965_v57, %v10170_v24  ;;  %v10318_v0 = vadd.f32 %v7029_v54, %v10242_v22  ;;  %v6968_v62 = vadd.f32 %v6967_v40, %v6966_v27  ;;  %v6969_v33 = vpop.f32.mrb[74].mxu0  ;;  %v7032_v44 = vadd.f32 %v7031_v36, %v7030_v55  ;;  %v7033_v8 = vpop.f32.mrb[74].mxu1 }
 0x1f5   : > { %v6970_v14 = vpop.f32.mrb[75].mxu0  ;;  %v7034_v51 = vpop.f32.mrb[75].mxu1 }
 0x1f6   : > { %v10321_v28 = vadd.f32 %v6968_v62, %v10175_v31  ;;  %v6971_v61 = vadd.f32 %v6970_v14, %v6969_v33  ;;  %v10324_v24 = vadd.f32 %v7032_v44, %v10244_v13  ;;  %v7035_v45 = vadd.f32 %v7034_v51, %v7033_v8  ;;  %v6972_v34 = vpop.f32.mrb[76].mxu0  ;;  %v7036_v9 = vpop.f32.mrb[76].mxu1 }
 0x1f7   : > { %v6973_v21 = vpop.f32.mrb[77].mxu0  ;;  %v7037_v58 = vpop.f32.mrb[77].mxu1 }
 0x1f8   : > { %v10327_v22 = vadd.f32 %v6971_v61, %v10178_v52  ;;  %v10330_v11 = vadd.f32 %v7035_v45, %v10246_v53  ;;  %v6974_v19 = vadd.f32 %v6973_v21, %v6972_v34  ;;  %v6975_v5 = vpop.f32.mrb[78].mxu0  ;;  %v7038_v20 = vadd.f32 %v7037_v58, %v7036_v9  ;;  %v7039_v31 = vpop.f32.mrb[78].mxu1 }
 0x1f9   : > { %v6976_v7 = vpop.f32.mrb[79].mxu0  ;;  %v7040_v25 = vpop.f32.mrb[79].mxu1 }
 0x1fa   : > { %v10333_v13 = vadd.f32 %v6974_v19, %v10191_v47  ;;  %v6977_v26 = vadd.f32 %v6976_v7, %v6975_v5  ;;  %v10336_v52 = vadd.f32 %v7038_v20, %v10248_v38  ;;  %v7041_v23 = vadd.f32 %v7040_v25, %v7039_v31 }
 0x1fc   : > { %v10339_v53 = vadd.f32 %v6977_v26, %v10202_v48  ;;  %v10342_v12 = vadd.f32 %v7041_v23, %v10256_v32  ;;  %v6978_v15 = vpop.f32.mrb[80].mxu0  ;;  %v7042_v49 = vpop.f32.mrb[80].mxu1 }
 0x1fd   : > { %v6979_v57 = vpop.f32.mrb[81].mxu0  ;;  %v7043_v54 = vpop.f32.mrb[81].mxu1 }
 0x1fe   : > { %v6980_v27 = vadd.f32 %v6979_v57, %v6978_v15  ;;  %v6981_v55 = vpop.f32.mrb[82].mxu0  ;;  %v7044_v40 = vadd.f32 %v7043_v54, %v7042_v49  ;;  %v7045_v47 = vpop.f32.mrb[82].mxu1 }
 0x1ff   : > { %v6982_v36 = vpop.f32.mrb[83].mxu0  ;;  %v7046_v62 = vpop.f32.mrb[83].mxu1 }
 0x200   : > { %v10345_v38 = vadd.f32 %v6980_v27, %v10251_v56  ;;  %v6983_v33 = vadd.f32 %v6982_v36, %v6981_v55  ;;  %v10348_v48 = vadd.f32 %v7044_v40, %v10258_v30  ;;  %v7047_v44 = vadd.f32 %v7046_v62, %v7045_v47 }
 0x202   : > { %v10351_v32 = vadd.f32 %v6983_v33, %v10254_v43  ;;  %v10354_v8 = vadd.f32 %v7047_v44, %v10260_v35 }
 0x206   : > { %v6984_v14 = vpop.f32.mrb[84].mxu0  ;;  %v7048_v51 = vpop.f32.mrb[84].mxu1 }
 0x207   : > { %v6985_v61 = vpop.f32.mrb[85].mxu0  ;;  %v7049_v45 = vpop.f32.mrb[85].mxu1 }
 0x208   : > { %v6986_v34 = vadd.f32 %v6985_v61, %v6984_v14  ;;  %v6987_v9 = vpop.f32.mrb[86].mxu0  ;;  %v7050_v21 = vadd.f32 %v7049_v45, %v7048_v51  ;;  %v7051_v56 = vpop.f32.mrb[86].mxu1 }
 0x209   : > { %v6988_v58 = vpop.f32.mrb[87].mxu0  ;;  %v7052_v19 = vpop.f32.mrb[87].mxu1 }
 0x20a   : > { %v10357_v30 = vadd.f32 %v6986_v34, %v10263_v6  ;;  %v6989_v5 = vadd.f32 %v6988_v58, %v6987_v9  ;;  %v10360_v43 = vadd.f32 %v7050_v21, %v10265_v3  ;;  %v7053_v20 = vadd.f32 %v7052_v19, %v7051_v56 }
 0x20c   : > { %v10363_v35 = vadd.f32 %v6989_v5, %v10268_v18  ;;  %v10366_v31 = vadd.f32 %v7053_v20, %v10270_v4 }
 0x210   : > { %v6990_v7 = vpop.f32.mrb[88].mxu0 }
 0x211   : > { %v7054_v25 = vpop.f32.mrb[88].mxu1  ;;  %v6991_v26 = vpop.f32.mrb[89].mxu0 }
 0x212   : > { %v7055_v23 = vpop.f32.mrb[89].mxu1  ;;  %v6992_v15 = vadd.f32 %v6991_v26, %v6990_v7  ;;  %v6993_v49 = vpop.f32.mrb[90].mxu0 }
 0x213   : > { %v7056_v57 = vadd.f32 %v7055_v23, %v7054_v25  ;;  %v7057_v6 = vpop.f32.mrb[90].mxu1  ;;  %v6994_v54 = vpop.f32.mrb[91].mxu0 }
 0x214   : > { %v7058_v27 = vpop.f32.mrb[91].mxu1  ;;  %v10369_v3 = vadd.f32 %v6992_v15, %v10273_v10  ;;  %v6995_v55 = vadd.f32 %v6994_v54, %v6993_v49 }
 0x215   : > { %v10372_v18 = vadd.f32 %v7056_v57, %v10276_v37  ;;  %v7059_v40 = vadd.f32 %v7058_v27, %v7057_v6 }
 0x216   : > { %v10375_v4 = vadd.f32 %v6995_v55, %v10279_v59 }
 0x217   : > { %v10378_v47 = vadd.f32 %v7059_v40, %v10282_v60 }
 0x21b   : > { %v6996_v36 = vpop.f32.mrb[92].mxu0  ;;  %v7060_v62 = vpop.f32.mrb[92].mxu1 }
 0x21c   : > { %v6997_v33 = vpop.f32.mrb[93].mxu0  ;;  %v7061_v44 = vpop.f32.mrb[93].mxu1 }
 0x21d   : > { %v6998_v14 = vadd.f32 %v6997_v33, %v6996_v36  ;;  %v6999_v51 = vpop.f32.mrb[94].mxu0  ;;  %v7062_v61 = vadd.f32 %v7061_v44, %v7060_v62  ;;  %v7063_v10 = vpop.f32.mrb[94].mxu1 }
 0x21e   : > { %v7000_v45 = vpop.f32.mrb[95].mxu0  ;;  %v7064_v34 = vpop.f32.mrb[95].mxu1 }
 0x21f   : > { %v10381_v37 = vadd.f32 %v6998_v14, %v10285_v42  ;;  %v7001_v9 = vadd.f32 %v7000_v45, %v6999_v51  ;;  %v10384_v59 = vadd.f32 %v7062_v61, %v10288_v46  ;;  %v7065_v21 = vadd.f32 %v7064_v34, %v7063_v10 }
 0x221   : > { %v10387_v60 = vadd.f32 %v7001_v9, %v10291_v41  ;;  %v10390_v56 = vadd.f32 %v7065_v21, %v10294_v17 }
 0x225   : > { %v7082_v58 = vpop.f32.mrb[96].mxu0  ;;  %v7146_v19 = vpop.f32.mrb[96].mxu1 }
 0x226   : > { %v7083_v5 = vpop.f32.mrb[97].mxu0  ;;  %v7147_v20 = vpop.f32.mrb[97].mxu1 }
 0x227   : > { %v7084_v7 = vadd.f32 %v7083_v5, %v7082_v58  ;;  %v7148_v25 = vadd.f32 %v7147_v20, %v7146_v19  ;;  %v7085_v26 = vpop.f32.mrb[98].mxu0  ;;  %v7149_v42 = vpop.f32.mrb[98].mxu1 }
 0x228   : > { %v7086_v23 = vpop.f32.mrb[99].mxu0  ;;  %v7150_v15 = vpop.f32.mrb[99].mxu1 }
 0x229   : > { %v4298_v46 = vadd.f32 %v7084_v7, %v10297_v29  ;;  %v4877_v49 = vadd.f32 %v7148_v25, %v10300_v39  ;;  %v7087_v57 = vadd.f32 %v7086_v23, %v7085_v26  ;;  %v7151_v41 = vadd.f32 %v7150_v15, %v7149_v42 }
 0x22b   : > { %v4299_v6 = vadd.f32 %v7087_v57, %v10303_v63  ;;  %v4878_v17 = vadd.f32 %v7151_v41, %v10306_v16  ;;  %v10396_v54 = vadd.f32 %v4877_v49, %v4298_v46 }
 0x22d   : > { %v10398_v40 = vadd.f32 %v4878_v17, %v4299_v6 }
 0x22f   : > { %v7088_v27 = vpop.f32.mrb[100].mxu0 }
 0x230   : > { %v7152_v55 = vpop.f32.mrb[100].mxu1  ;;  %v7089_v36 = vpop.f32.mrb[101].mxu0 }
 0x231   : > { %v7153_v62 = vpop.f32.mrb[101].mxu1  ;;  %v7090_v33 = vadd.f32 %v7089_v36, %v7088_v27  ;;  %v7091_v14 = vpop.f32.mrb[102].mxu0 }
 0x232   : > { %v7154_v44 = vadd.f32 %v7153_v62, %v7152_v55  ;;  %v7155_v29 = vpop.f32.mrb[102].mxu1  ;;  %v7092_v51 = vpop.f32.mrb[103].mxu0 }
 0x233   : > { %v7156_v39 = vpop.f32.mrb[103].mxu1  ;;  %v4300_v61 = vadd.f32 %v7090_v33, %v10309_v2  ;;  %v7093_v10 = vadd.f32 %v7092_v51, %v7091_v14 }
 0x234   : > { %v4879_v63 = vadd.f32 %v7154_v44, %v10312_v50  ;;  %v7157_v16 = vadd.f32 %v7156_v39, %v7155_v29 }
 0x235   : > { %v4301_v45 = vadd.f32 %v7093_v10, %v10315_v1 }
 0x236   : > { %v4880_v34 = vadd.f32 %v7157_v16, %v10318_v0  ;;  %v10404_v9 = vadd.f32 %v4879_v63, %v4300_v61 }
 0x238   : > { %v10406_v19 = vadd.f32 %v4880_v34, %v4301_v45 }
 0x23a   : > { %v7094_v21 = vpop.f32.mrb[104].mxu0  ;;  %v7158_v58 = vpop.f32.mrb[104].mxu1 }
 0x23b   : > { %v7095_v5 = vpop.f32.mrb[105].mxu0  ;;  %v7159_v20 = vpop.f32.mrb[105].mxu1 }
 0x23c   : > { %v7096_v7 = vadd.f32 %v7095_v5, %v7094_v21  ;;  %v7160_v25 = vadd.f32 %v7159_v20, %v7158_v58  ;;  %v7097_v26 = vpop.f32.mrb[106].mxu0  ;;  %v7161_v2 = vpop.f32.mrb[106].mxu1 }
 0x23d   : > { %v7098_v42 = vpop.f32.mrb[107].mxu0  ;;  %v7162_v50 = vpop.f32.mrb[107].mxu1 }
 0x23e   : > { %v4302_v23 = vadd.f32 %v7096_v7, %v10321_v28  ;;  %v4881_v1 = vadd.f32 %v7160_v25, %v10324_v24  ;;  %v7099_v15 = vadd.f32 %v7098_v42, %v7097_v26  ;;  %v7163_v0 = vadd.f32 %v7162_v50, %v7161_v2 }
 0x240   : > { %v4303_v46 = vadd.f32 %v7099_v15, %v10327_v22  ;;  %v4882_v49 = vadd.f32 %v7163_v0, %v10330_v11  ;;  %v10412_v57 = vadd.f32 %v4881_v1, %v4302_v23 }
 0x242   : > { %v10414_v17 = vadd.f32 %v4882_v49, %v4303_v46 }
 0x243   : > { %v7100_v41 = vpop.f32.mrb[108].mxu0 }
 0x244   : > { %v7164_v6 = vpop.f32.mrb[108].mxu1  ;;  %v7101_v27 = vpop.f32.mrb[109].mxu0 }
 0x245   : > { %v7165_v55 = vpop.f32.mrb[109].mxu1  ;;  %v7102_v36 = vadd.f32 %v7101_v27, %v7100_v41  ;;  %v7103_v33 = vpop.f32.mrb[110].mxu0 }
 0x246   : > { %v7166_v62 = vadd.f32 %v7165_v55, %v7164_v6  ;;  %v7167_v28 = vpop.f32.mrb[110].mxu1  ;;  %v7104_v44 = vpop.f32.mrb[111].mxu0 }
 0x247   : > { %v7168_v24 = vpop.f32.mrb[111].mxu1  ;;  %v4304_v14 = vadd.f32 %v7102_v36, %v10333_v13  ;;  %v7105_v29 = vadd.f32 %v7104_v44, %v7103_v33 }
 0x248   : > { %v4883_v22 = vadd.f32 %v7166_v62, %v10336_v52  ;;  %v7169_v11 = vadd.f32 %v7168_v24, %v7167_v28 }
 0x249   : > { %v4305_v51 = vadd.f32 %v7105_v29, %v10339_v53 }
 0x24a   : > { %v4884_v39 = vadd.f32 %v7169_v11, %v10342_v12  ;;  %v10420_v61 = vadd.f32 %v4883_v22, %v4304_v14 }
 0x24c   : > { %v10422_v16 = vadd.f32 %v4884_v39, %v4305_v51 }
 0x24e   : > { %v7106_v63 = vpop.f32.mrb[112].mxu0  ;;  %v7170_v10 = vpop.f32.mrb[112].mxu1 }
 0x24f   : > { %v7107_v45 = vpop.f32.mrb[113].mxu0  ;;  %v7171_v34 = vpop.f32.mrb[113].mxu1 }
 0x250   : > { %v7108_v21 = vadd.f32 %v7107_v45, %v7106_v63  ;;  %v7172_v58 = vadd.f32 %v7171_v34, %v7170_v10  ;;  %v7109_v5 = vpop.f32.mrb[114].mxu0  ;;  %v7173_v13 = vpop.f32.mrb[114].mxu1 }
 0x251   : > { %v7110_v20 = vpop.f32.mrb[115].mxu0  ;;  %v7174_v52 = vpop.f32.mrb[115].mxu1 }
 0x252   : > { %v4306_v7 = vadd.f32 %v7108_v21, %v10345_v38  ;;  %v4885_v53 = vadd.f32 %v7172_v58, %v10348_v48  ;;  %v7111_v25 = vadd.f32 %v7110_v20, %v7109_v5  ;;  %v7175_v12 = vadd.f32 %v7174_v52, %v7173_v13 }
 0x254   : > { %v4307_v26 = vadd.f32 %v7111_v25, %v10351_v32  ;;  %v4886_v2 = vadd.f32 %v7175_v12, %v10354_v8  ;;  %v10428_v42 = vadd.f32 %v4885_v53, %v4306_v7 }
 0x256   : > { %v10430_v1 = vadd.f32 %v4886_v2, %v4307_v26 }
 0x259   : > { %v7112_v50 = vpop.f32.mrb[116].mxu0  ;;  %v7176_v23 = vpop.f32.mrb[116].mxu1 }
 0x25a   : > { %v7113_v15 = vpop.f32.mrb[117].mxu0  ;;  %v7177_v0 = vpop.f32.mrb[117].mxu1 }
 0x25b   : > { %v7114_v46 = vadd.f32 %v7113_v15, %v7112_v50  ;;  %v7178_v49 = vadd.f32 %v7177_v0, %v7176_v23  ;;  %v7115_v41 = vpop.f32.mrb[118].mxu0  ;;  %v7179_v38 = vpop.f32.mrb[118].mxu1  ;;  %v10455_v15 = vld [vmem:[%s10674_s2] ss:$0 sm:$0xff] }
 0x25c   : > { %v7116_v6 = vpop.f32.mrb[119].mxu0  ;;  %v7180_v48 = vpop.f32.mrb[119].mxu1 }
 0x25d   : > { %v4308_v27 = vadd.f32 %v7114_v46, %v10357_v30  ;;  %v4887_v32 = vadd.f32 %v7178_v49, %v10360_v43  ;;  %v7117_v55 = vadd.f32 %v7116_v6, %v7115_v41  ;;  %v7181_v8 = vadd.f32 %v7180_v48, %v7179_v38 }
 0x25f   : > { %v4309_v36 = vadd.f32 %v7117_v55, %v10363_v35  ;;  %v4888_v62 = vadd.f32 %v7181_v8, %v10366_v31  ;;  %v10436_v33 = vadd.f32 %v4887_v32, %v4308_v27 }
 0x261   : > { %v10438_v24 = vadd.f32 %v4888_v62, %v4309_v36 }
 0x262   : > { %v7118_v28 = vpop.f32.mrb[120].mxu0  ;;  %v7182_v44 = vpop.f32.mrb[120].mxu1 }
 0x263   : > { %v7119_v14 = vpop.f32.mrb[121].mxu0  ;;  %v7183_v22 = vpop.f32.mrb[121].mxu1 }
 0x264   : > { %v7120_v29 = vadd.f32 %v7119_v14, %v7118_v28  ;;  %v7184_v11 = vadd.f32 %v7183_v22, %v7182_v44  ;;  %v7121_v51 = vpop.f32.mrb[122].mxu0  ;;  %v7185_v30 = vpop.f32.mrb[122].mxu1 }
 0x265   : > { %v7122_v39 = vpop.f32.mrb[123].mxu0  ;;  %v7186_v43 = vpop.f32.mrb[123].mxu1 }
 0x266   : > { %v4310_v63 = vadd.f32 %v7120_v29, %v10369_v3  ;;  %v4889_v35 = vadd.f32 %v7184_v11, %v10372_v18  ;;  %v7123_v10 = vadd.f32 %v7122_v39, %v7121_v51  ;;  %v7187_v31 = vadd.f32 %v7186_v43, %v7185_v30 }
 0x268   : > { %v4311_v45 = vadd.f32 %v7123_v10, %v10375_v4  ;;  %v4890_v34 = vadd.f32 %v7187_v31, %v10378_v47  ;;  %v10444_v21 = vadd.f32 %v4889_v35, %v4310_v63 }
 0x26a   : > { %v10446_v13 = vadd.f32 %v4890_v34, %v4311_v45 }
 0x26c   : > { %v7124_v58 = vpop.f32.mrb[124].mxu0  ;;  %v7188_v5 = vpop.f32.mrb[124].mxu1 }
 0x26d   : > { %v7125_v20 = vpop.f32.mrb[125].mxu0  ;;  %v7189_v52 = vpop.f32.mrb[125].mxu1 }
 0x26e   : > { %v7126_v7 = vadd.f32 %v7125_v20, %v7124_v58  ;;  %v7190_v53 = vadd.f32 %v7189_v52, %v7188_v5  ;;  %v7127_v25 = vpop.f32.mrb[126].mxu0  ;;  %v7191_v3 = vpop.f32.mrb[126].mxu1 }
 0x26f   : > { %v7128_v12 = vpop.f32.mrb[127].mxu0  ;;  %v7192_v18 = vpop.f32.mrb[127].mxu1 }
 0x270   : > { %v4312_v26 = vadd.f32 %v7126_v7, %v10381_v37  ;;  %v4891_v4 = vadd.f32 %v7190_v53, %v10384_v59  ;;  %v7129_v2 = vadd.f32 %v7128_v12, %v7127_v25  ;;  %v7193_v47 = vadd.f32 %v7192_v18, %v7191_v3 }
 0x272   : > { %v4313_v50 = vadd.f32 %v7129_v2, %v10387_v60  ;;  %v4892_v23 = vadd.f32 %v7193_v47, %v10390_v56  ;;  %v10457_v0 = vadd.f32 %v4891_v4, %v4312_v26 }
 0x274   : > { %v7309_v46 = vpop.f32.mrb[128].mxu0  ;;  %v10459_v49 = vadd.f32 %v4892_v23, %v4313_v50 }
 0x275   : > { %v5276_v37 = vadd.f32 %v7309_v46, %v10455_v15  ;;  %v5270_v41 = vpop.f32.mrb[129].mxu0 }
 0x276   : > { %v5271_v59 = vadd.f32 %v10455_v15, %v5270_v41  ;;  %v7779_v41 = vld [vmem:[%s10678_s6 + $0x8] sm:$0xff]  }
 0x277   : > { %v5350_v6 = vmax.f32 %v5276_v37, 0.0  ;;  %v7778_v37 = vld [vmem:[%s10678_s6] sm:$0xff]  }
 0x278   : > { %v5349_v38 = vmax.f32 %v5271_v59, 0.0  ;;  %v7312_v60 = vpop.f32.mrb[130].mxu0  ;;  %7357 = vmatprep.subr.bf16.mxu0 %v7778_v37  ;;  %v7781_v59 = vld [vmem:[%s10678_s6 + $0x18] sm:$0xff]  }
 0x279   : > { %v5286_v56 = vadd.f32 %v7312_v60, %v10455_v15  ;;  %v5280_v48 = vpop.f32.mrb[131].mxu0  ;;  %7358 = vmatpush3.bf16.msra.mxu0 %v7778_v37  ;;  %v7783_v60 = vld [vmem:[%s10678_s6 + $0x28] sm:$0xff]  }
 0x27a   : > { %v5281_v27 = vadd.f32 %v10455_v15, %v5280_v48  ;;  %7333 = vmatprep.mubr.msk.f32.mxu1 %vm5373_vm0, %v5349_v38  ;;  %7359 = vmatprep.subr.bf16.mxu0 %v7779_v41  ;;  %v7782_v38 = vld [vmem:[%s10678_s6 + $0x20] sm:$0xff]  }
 0x27b   : > { %7334 = vmatmul.mubr.msk.f32.vlgmr.msra.gmra.mrb[128].mxu1 %vm5373_vm0, %v5350_v6  ;;  %v5352_v8 = vmax.f32 %v5286_v56, 0.0  ;;  %v7784_v6 = vld [vmem:[%s10678_s6 + $0x30] sm:$0xff]   ;;  %v7785_v56 = vld [vmem:[%s10678_s6 + $0x38] sm:$0xff]   ;;  %v7786_v48 = vld [vmem:[%s10680_s8] sm:$0xff]  }
 0x27c   : > { %v5351_v32 = vmax.f32 %v5281_v27, 0.0  ;;  %v7315_v55 = vpop.f32.mrb[132].mxu0  ;;  %v7787_v27 = vld [vmem:[%s10680_s8 + $0x8] sm:$0xff]   ;;  %7389 = vmatprep.subr.bf16.mxu1 %v7786_v48 }
 0x27d   : > { %v5296_v36 = vadd.f32 %v7315_v55, %v10455_v15  ;;  %v5290_v62 = vpop.f32.mrb[133].mxu0  ;;  %7360 = vmatpush3.bf16.msra.mxu0 %v7779_v41  ;;  %7390 = vmatpush3.bf16.msra.mxu1 %v7786_v48  ;;  %v7789_v55 = vld [vmem:[%s10680_s8 + $0x18] sm:$0xff]  }
 0x27e   : > { %v5291_v28 = vadd.f32 %v10455_v15, %v5290_v62  ;;  %7336 = vmatprep.mubr.msk.f32.mxu1 %vm5373_vm0, %v5351_v32  ;;  %7391 = vmatprep.subr.bf16.mxu1 %v7787_v27  ;;  %v7788_v32 = vld [vmem:[%s10680_s8 + $0x10] sm:$0xff]  }
 0x27f   : > { %7337 = vmatmul.mubr.msk.f32.gmra.mrb[130].mxu1 %vm5373_vm0, %v5352_v8  ;;  %v5354_v22 = vmax.f32 %v5296_v36, 0.0  ;;  %v7790_v8 = vld [vmem:[%s10680_s8 + $0x20] sm:$0xff]  }
 0x280   : > { %v5353_v44 = vmax.f32 %v5291_v28, 0.0  ;;  %v7318_v14 = vpop.f32.mrb[134].mxu0  ;;  %v10535_v36 = vld [vmem:[%s10676_s4] ss:$0 sm:$0xff] }
 0x281   : > { %v5306_v29 = vadd.f32 %v7318_v14, %v10455_v15  ;;  %v5300_v11 = vpop.f32.mrb[135].mxu0  ;;  %7392 = vmatpush3.bf16.msra.mxu1 %v7787_v27 }
 0x282   : > { %v5301_v51 = vadd.f32 %v10455_v15, %v5300_v11  ;;  %7339 = vmatprep.mubr.msk.f32.mxu1 %vm5373_vm0, %v5353_v44  ;;  %7393 = vmatprep.subr.bf16.mxu1 %v7788_v32 }
 0x283   : > { %7340 = vmatmul.mubr.msk.f32.gmra.mrb[132].mxu1 %vm5373_vm0, %v5354_v22  ;;  %v5356_v43 = vmax.f32 %v5306_v29, 0.0 }
 0x284   : > { %v5355_v30 = vmax.f32 %v5301_v51, 0.0  ;;  %v7321_v39 = vpop.f32.mrb[136].mxu0 }
 0x285   : > { %v5316_v63 = vadd.f32 %v7321_v39, %v10455_v15  ;;  %v5310_v35 = vpop.f32.mrb[137].mxu0  ;;  %7394 = vmatpush3.bf16.msra.mxu1 %v7788_v32 }
 0x286   : > { %v5311_v10 = vadd.f32 %v10455_v15, %v5310_v35  ;;  %7342 = vmatprep.mubr.msk.f32.mxu1 %vm5373_vm0, %v5355_v30  ;;  %7395 = vmatprep.subr.bf16.mxu1 %v7789_v55 }
 0x287   : > { %7343 = vmatmul.mubr.msk.f32.gmra.mrb[134].mxu1 %vm5373_vm0, %v5356_v43  ;;  %v5358_v34 = vmax.f32 %v5316_v63, 0.0 }
 0x288   : > { %v5357_v31 = vmax.f32 %v5311_v10, 0.0  ;;  %v7324_v45 = vpop.f32.mrb[138].mxu0 }
 0x289   : > { %v5326_v58 = vadd.f32 %v7324_v45, %v10455_v15  ;;  %v5320_v5 = vpop.f32.mrb[139].mxu0  ;;  %7396 = vmatpush3.bf16.msra.mxu1 %v7789_v55 }
 0x28a   : > { %v5321_v20 = vadd.f32 %v10455_v15, %v5320_v5  ;;  %7345 = vmatprep.mubr.msk.f32.mxu1 %vm5373_vm0, %v5357_v31  ;;  %7397 = vmatprep.subr.bf16.mxu1 %v7790_v8 }
 0x28b   : > { %7346 = vmatmul.mubr.msk.f32.gmra.mrb[136].mxu1 %vm5373_vm0, %v5358_v34  ;;  %v5360_v7 = vmax.f32 %v5326_v58, 0.0 }
 0x28c   : > { %v5359_v52 = vmax.f32 %v5321_v20, 0.0 }
 0x28d   : > { %7398 = vmatpush3.bf16.msra.mxu1 %v7790_v8 }
 0x28e   : > { %7348 = vmatprep.mubr.msk.f32.mxu1 %vm5373_vm0, %v5359_v52 }
 0x28f   : > { %7349 = vmatmul.mubr.msk.f32.gmra.mrb[138].mxu1 %vm5373_vm0, %v5360_v7 }
 0x295   : > { %v7327_v53 = vpop.f32.mrb[140].mxu0 }
 0x296   : > { %v5336_v25 = vadd.f32 %v7327_v53, %v10455_v15  ;;  %v5330_v3 = vpop.f32.mrb[141].mxu0 }
 0x297   : > { %v5331_v12 = vadd.f32 %v10455_v15, %v5330_v3 }
 0x298   : > { %v5362_v26 = vmax.f32 %v5336_v25, 0.0 }
 0x299   : > { %v5361_v18 = vmax.f32 %v5331_v12, 0.0 }
 0x29b   : > { %7351 = vmatprep.mubr.msk.f32.mxu1 %vm5373_vm0, %v5361_v18 }
 0x29c   : > { %7352 = vmatmul.mubr.msk.f32.gmra.mrb[140].mxu1 %vm5373_vm0, %v5362_v26 }
 0x2af   : > { %v7330_v4 = vpop.f32.mrb[142].mxu0 }
 0x2b0   : > { %v5346_v2 = vadd.f32 %v7330_v4, %v10455_v15  ;;  %v5340_v47 = vpop.f32.mrb[143].mxu0 }
 0x2b1   : > { %v5341_v50 = vadd.f32 %v10455_v15, %v5340_v47  ;;  %v7780_v15 = vld [vmem:[%s10678_s6 + $0x10] sm:$0xff]  }
 0x2b2   : > { %v5364_v46 = vmax.f32 %v5346_v2, 0.0  ;;  %7361 = vmatprep.subr.bf16.mxu0 %v7780_v15 }
 0x2b3   : > { %v5363_v23 = vmax.f32 %v5341_v50, 0.0  ;;  %7362 = vmatpush3.bf16.msra.mxu0 %v7780_v15 }
 0x2b4   : > { %7363 = vmatprep.subr.bf16.mxu0 %v7781_v59 }
 0x2b5   : > { %7354 = vmatprep.mubr.msk.f32.mxu1 %vm5373_vm0, %v5363_v23 }
 0x2b6   : > { %7355 = vmatmul.mubr.msk.f32.gmra.mrb[142].mxu1 %vm5373_vm0, %v5364_v46 }
 0x2b7   : > { %7364 = vmatpush3.bf16.msra.mxu0 %v7781_v59 }
 0x2b8   : > { %7365 = vmatprep.subr.bf16.mxu0 %v7782_v38 }
 0x2bb   : > { %7366 = vmatpush3.bf16.msra.mxu0 %v7782_v38 }
 0x2bc   : > { %7367 = vmatprep.subr.bf16.mxu0 %v7783_v60 }
 0x2bf   : > { %7368 = vmatpush3.bf16.msra.mxu0 %v7783_v60 }
 0x2c0   : > { %7369 = vmatprep.subr.bf16.mxu0 %v7784_v6 }
 0x2c3   : > { %7370 = vmatpush3.bf16.msra.mxu0 %v7784_v6 }
 0x2c4   : > { %7371 = vmatprep.subr.bf16.mxu0 %v7785_v56 }
 0x2c7   : > { %7372 = vmatpush3.bf16.msra.mxu0 %v7785_v56 }
 0x34e   : > { %v7335_v62 = vpop.f32.mrb[128].mxu1 }
 0x34f   : > { %v5494_v28 = vadd.f32 %v7335_v62, %v10535_v36  ;;  %v5488_v44 = vpop.f32.mrb[129].mxu1 }
 0x350   : > { %v5489_v14 = vadd.f32 %v10535_v36, %v5488_v44 }
 0x351   : > { %v6641_v22 = vmul.f32 -1.442695, %v5494_v28 }
 0x352   : > { %v6640_v29 = vmul.f32 -1.442695, %v5489_v14  ;;  %v7338_v11 = vpop.f32.mrb[130].mxu1 }
 0x353   : > { %7794 = vpow2.f32 %v6641_v22  ;;  %v5504_v51 = vadd.f32 %v7338_v11, %v10535_v36  ;;  %v5498_v30 = vpop.f32.mrb[131].mxu1 }
 0x354   : > { %7796 = vpow2.f32 %v6640_v29  ;;  %v5499_v39 = vadd.f32 %v10535_v36, %v5498_v30 }
 0x355   : > { %v6643_v43 = vmul.f32 -1.442695, %v5504_v51 }
 0x356   : > { %v6642_v63 = vmul.f32 -1.442695, %v5499_v39  ;;  %v7341_v35 = vpop.f32.mrb[132].mxu1 }
 0x357   : > { %7798 = vpow2.f32 %v6643_v43  ;;  %v5514_v10 = vadd.f32 %v7341_v35, %v10535_v36  ;;  %v5508_v31 = vpop.f32.mrb[133].mxu1 }
 0x358   : > { %7800 = vpow2.f32 %v6642_v63  ;;  %v5509_v45 = vadd.f32 %v10535_v36, %v5508_v31 }
 0x359   : > { %v6645_v34 = vmul.f32 -1.442695, %v5514_v10 }
 0x35a   : > { %v6644_v58 = vmul.f32 -1.442695, %v5509_v45  ;;  %v7344_v5 = vpop.f32.mrb[134].mxu1 }
 0x35b   : > { %7802 = vpow2.f32 %v6645_v34  ;;  %v5524_v20 = vadd.f32 %v7344_v5, %v10535_v36  ;;  %v5518_v52 = vpop.f32.mrb[135].mxu1 }
 0x35c   : > { %7804 = vpow2.f32 %v6644_v58  ;;  %v5519_v7 = vadd.f32 %v10535_v36, %v5518_v52 }
 0x35d   : > { %v7795_v53 = vpop.eup %7794  ;;  %v6647_v25 = vmul.f32 -1.442695, %v5524_v20 }
 0x35e   : > { %v7797_v3 = vpop.eup %7796  ;;  %v5616_v12 = vadd.f32 1.0, %v7795_v53  ;;  %v6646_v18 = vmul.f32 -1.442695, %v5519_v7  ;;  %v7347_v26 = vpop.f32.mrb[136].mxu1 }
 0x35f   : > { %v5615_v4 = vadd.f32 1.0, %v7797_v3  ;;  %7806 = vpow2.f32 %v6647_v25  ;;  %v5534_v2 = vadd.f32 %v7347_v26, %v10535_v36  ;;  %v5528_v47 = vpop.f32.mrb[137].mxu1 }
 0x360   : > { %7808 = vrcp.f32 %v5616_v12  ;;  %v5529_v50 = vadd.f32 %v10535_v36, %v5528_v47 }
 0x361   : > { %v7799_v23 = vpop.eup %7798  ;;  %7810 = vrcp.f32 %v5615_v4  ;;  %v6649_v46 = vmul.f32 -1.442695, %v5534_v2 }
 0x362   : > { %v7801_v37 = vpop.eup %7800  ;;  %v5618_v41 = vadd.f32 1.0, %v7799_v23  ;;  %7812 = vpow2.f32 %v6646_v18  ;;  %v6648_v15 = vmul.f32 -1.442695, %v5529_v50  ;;  %v7350_v59 = vpop.f32.mrb[138].mxu1 }
 0x363   : > { %v5617_v38 = vadd.f32 1.0, %v7801_v37  ;;  %7814 = vpow2.f32 %v6649_v46  ;;  %v5544_v60 = vadd.f32 %v7350_v59, %v10535_v36  ;;  %v5538_v6 = vpop.f32.mrb[139].mxu1 }
 0x364   : > { %7816 = vrcp.f32 %v5618_v41  ;;  %v5539_v56 = vadd.f32 %v10535_v36, %v5538_v6 }
 0x365   : > { %v7803_v48 = vpop.eup %7802  ;;  %7818 = vrcp.f32 %v5617_v38  ;;  %v6651_v27 = vmul.f32 -1.442695, %v5544_v60 }
 0x366   : > { %v7805_v32 = vpop.eup %7804  ;;  %v5620_v55 = vadd.f32 1.0, %v7803_v48  ;;  %7820 = vpow2.f32 %v6648_v15  ;;  %v6650_v8 = vmul.f32 -1.442695, %v5539_v56 }
 0x367   : > { %v5619_v62 = vadd.f32 1.0, %v7805_v32  ;;  %7822 = vpow2.f32 %v6651_v27 }
 0x368   : > { %7824 = vrcp.f32 %v5620_v55 }
 0x369   : > { %v7807_v28 = vpop.eup %7806  ;;  %7826 = vrcp.f32 %v5619_v62 }
 0x36a   : > { %v7809_v44 = vpop.eup %7808  ;;  %v5622_v14 = vadd.f32 1.0, %v7807_v28  ;;  %7828 = vpow2.f32 %v6650_v8 }
 0x36b   : > { %v7811_v22 = vpop.eup %7810 }
 0x36c   : > { %v7813_v11 = vpop.eup %7812  ;;  %v5711_v39 = vpack.c.bf16 %v7809_v44, %v7811_v22  ;;  %7830 = vrcp.f32 %v5622_v14 }
 0x36d   : > { %v7815_v43 = vpop.eup %7814  ;;  %v5621_v63 = vadd.f32 1.0, %v7813_v11 }
 0x36e   : > { %v7817_v10 = vpop.eup %7816  ;;  %v5624_v31 = vadd.f32 1.0, %v7815_v43  ;;  %7373 = vmatprep.mubr.bf16.mxu0 %v5711_v39  ;;  %v7792_v43 = vld [vmem:[%s10680_s8 + $0x30] sm:$0xff]  }
 0x36f   : > { %v7353_v29 = vpop.f32.mrb[140].mxu1  ;;  %v7819_v34 = vpop.eup %7818  ;;  %7832 = vrcp.f32 %v5621_v63  ;;  %v7793_v63 = vld [vmem:[%s10680_s8 + $0x38] sm:$0xff]  }
 0x370   : > { %v5554_v51 = vadd.f32 %v7353_v29, %v10535_v36  ;;  %v5548_v30 = vpop.f32.mrb[141].mxu1  ;;  %v7821_v5 = vpop.eup %7820  ;;  %7834 = vrcp.f32 %v5624_v31  ;;  %v5712_v20 = vpack.c.bf16 %v7817_v10, %v7819_v34  ;;  %v10565_v10 = vld [vmem:[%s10679_s7] ss:$0 sm:$0xff] }
 0x371   : > { %v5549_v35 = vadd.f32 %v10535_v36, %v5548_v30  ;;  %v7823_v52 = vpop.eup %7822  ;;  %v5623_v7 = vadd.f32 1.0, %v7821_v5 }
 0x372   : > { %v6653_v45 = vmul.f32 -1.442695, %v5554_v51  ;;  %v7825_v53 = vpop.eup %7824  ;;  %v5626_v25 = vadd.f32 1.0, %v7823_v52  ;;  %7374 = vmatmul.mubr.bf16.vlgmr.msra.gmra.mrb[144].mxu0 %v5712_v20 }
 0x373   : > { %v6652_v58 = vmul.f32 -1.442695, %v5549_v35  ;;  %v7827_v3 = vpop.eup %7826 }
 0x374   : > { %7836 = vpow2.f32 %v6653_v45  ;;  %v7829_v12 = vpop.eup %7828  ;;  %v5713_v18 = vpack.c.bf16 %v7825_v53, %v7827_v3 }
 0x375   : > { %7838 = vpow2.f32 %v6652_v58  ;;  %v5625_v26 = vadd.f32 1.0, %v7829_v12 }
 0x376   : > { %7840 = vrcp.f32 %v5623_v7  ;;  %7377 = vmatprep.mubr.bf16.mxu0 %v5713_v18  ;;  %v7831_v4 = vpop.eup %7830 }
 0x377   : > { %7842 = vrcp.f32 %v5626_v25 }
 0x378   : > { %7844 = vrcp.f32 %v5625_v26 }
 0x379   : > { %v7833_v2 = vpop.eup %7832 }
 0x37a   : > { %v7835_v47 = vpop.eup %7834  ;;  %v5714_v50 = vpack.c.bf16 %v7831_v4, %v7833_v2 }
 0x37c   : > { %7378 = vmatmul.mubr.bf16.gmra.mrb[148].mxu0 %v5714_v50 }
 0x37e   : > { %v7837_v23 = vpop.eup %7836 }
 0x37f   : > { %v7839_v46 = vpop.eup %7838  ;;  %v5628_v37 = vadd.f32 1.0, %v7837_v23 }
 0x380   : > { %v7841_v41 = vpop.eup %7840  ;;  %v5627_v15 = vadd.f32 1.0, %v7839_v46 }
 0x381   : > { %7846 = vrcp.f32 %v5628_v37  ;;  %v5715_v59 = vpack.c.bf16 %v7835_v47, %v7841_v41  ;;  %v7843_v38 = vpop.eup %7842 }
 0x382   : > { %7848 = vrcp.f32 %v5627_v15  ;;  %v7845_v60 = vpop.eup %7844 }
 0x383   : > { %7381 = vmatprep.mubr.bf16.mxu0 %v5715_v59  ;;  %v5716_v6 = vpack.c.bf16 %v7843_v38, %v7845_v60 }
 0x385   : > { %7382 = vmatmul.mubr.bf16.gmra.mrb[152].mxu0 %v5716_v6 }
 0x389   : > { %v7356_v56 = vpop.f32.mrb[142].mxu1 }
 0x38a   : > { %v5564_v48 = vadd.f32 %v7356_v56, %v10535_v36  ;;  %v5558_v27 = vpop.f32.mrb[143].mxu1 }
 0x38b   : > { %v5559_v32 = vadd.f32 %v10535_v36, %v5558_v27  ;;  %v7847_v62 = vpop.eup %7846  ;;  %v7791_v36 = vld [vmem:[%s10680_s8 + $0x28] sm:$0xff]  }
 0x38c   : > { %v6655_v55 = vmul.f32 -1.442695, %v5564_v48  ;;  %v7849_v28 = vpop.eup %7848  ;;  %7399 = vmatprep.subr.bf16.mxu1 %v7791_v36 }
 0x38d   : > { %v6654_v8 = vmul.f32 -1.442695, %v5559_v32  ;;  %v5717_v44 = vpack.c.bf16 %v7847_v62, %v7849_v28  ;;  %7400 = vmatpush3.bf16.msra.mxu1 %v7791_v36 }
 0x38e   : > { %7850 = vpow2.f32 %v6655_v55  ;;  %7401 = vmatprep.subr.bf16.mxu1 %v7792_v43 }
 0x38f   : > { %7852 = vpow2.f32 %v6654_v8  ;;  %7385 = vmatprep.mubr.bf16.mxu0 %v5717_v44 }
 0x391   : > { %7402 = vmatpush3.bf16.msra.mxu1 %v7792_v43 }
 0x392   : > { %7403 = vmatprep.subr.bf16.mxu1 %v7793_v63 }
 0x395   : > { %7404 = vmatpush3.bf16.msra.mxu1 %v7793_v63 }
 0x398   : > { %v7851_v14 = vpop.eup %7850 }
 0x399   : > { %v7853_v22 = vpop.eup %7852  ;;  %v5630_v29 = vadd.f32 1.0, %v7851_v14 }
 0x39a   : > { %v5629_v11 = vadd.f32 1.0, %v7853_v22 }
 0x39b   : > { %7854 = vrcp.f32 %v5630_v29 }
 0x39c   : > { %7856 = vrcp.f32 %v5629_v11 }
 0x3a5   : > { %v7855_v51 = vpop.eup %7854 }
 0x3a6   : > { %v7857_v30 = vpop.eup %7856 }
 0x3a7   : > { %v5718_v39 = vpack.c.bf16 %v7855_v51, %v7857_v30 }
 0x3a9   : > { %7386 = vmatmul.mubr.bf16.gmra.mrb[156].mxu0 %v5718_v39 }
 0x445   : > { %v7375_v35 = vpop.f32.mrb[144].mxu0 }
 0x446   : > { %v5882_v31 = vadd.f32 %v7375_v35, %v10404_v9  ;;  %v5817_v45 = vpop.f32.mrb[145].mxu0 }
 0x447   : > { %v5880_v34 = vadd.f32 %v5817_v45, %v10396_v54  ;;  %v7376_v58 = vpop.f32.mrb[146].mxu0 }
 0x448   : > { %v5905_v5 = vadd.f32 %v10565_v10, %v5882_v31  ;;  %v5883_v20 = vadd.f32 %v7376_v58, %v10406_v19  ;;  %v5820_v52 = vpop.f32.mrb[147].mxu0 }
 0x449   : > { %v5903_v7 = vadd.f32 %v10565_v10, %v5880_v34  ;;  %v5881_v53 = vadd.f32 %v5820_v52, %v10398_v40 }
 0x44a   : > { %v5906_v25 = vadd.f32 %v10565_v10, %v5883_v20  ;;  %v5921_v12 = vmax.f32 %v5905_v5, 0.0 }
 0x44b   : > { %v5904_v3 = vadd.f32 %v10565_v10, %v5881_v53  ;;  %v5919_v9 = vmax.f32 %v5903_v7, 0.0 }
 0x44c   : > { %v5922_v18 = vmax.f32 %v5906_v25, 0.0 }
 0x44d   : > { %v5920_v26 = vmax.f32 %v5904_v3, 0.0 }
 0x44e   : > { %v5936_v4 = vpack.c.bf16 %v5922_v18, %v5921_v12 }
 0x44f   : > { %v7379_v54 = vpop.f32.mrb[148].mxu0  ;;  %v5935_v2 = vpack.c.bf16 %v5920_v26, %v5919_v9 }
 0x450   : > { %v5886_v47 = vadd.f32 %v7379_v54, %v10420_v61  ;;  %v5833_v50 = vpop.f32.mrb[149].mxu0 }
 0x451   : > { %v5884_v19 = vadd.f32 %v5833_v50, %v10412_v57  ;;  %v7380_v23 = vpop.f32.mrb[150].mxu0  ;;  %7405 = vmatprep.mubr.bf16.mxu1 %v5935_v2 }
 0x452   : > { %v5909_v40 = vadd.f32 %v10565_v10, %v5886_v47  ;;  %v5887_v46 = vadd.f32 %v7380_v23, %v10422_v16  ;;  %v5836_v37 = vpop.f32.mrb[151].mxu0  ;;  %7406 = vmatmul.mubr.bf16.vlgmr.msra.gmra.mrb[144].mxu1 %v5936_v4 }
 0x453   : > { %v5907_v41 = vadd.f32 %v10565_v10, %v5884_v19  ;;  %v5885_v15 = vadd.f32 %v5836_v37, %v10414_v17 }
 0x454   : > { %v5910_v59 = vadd.f32 %v10565_v10, %v5887_v46  ;;  %v5925_v61 = vmax.f32 %v5909_v40, 0.0 }
 0x455   : > { %v5908_v38 = vadd.f32 %v10565_v10, %v5885_v15  ;;  %v5923_v6 = vmax.f32 %v5907_v41, 0.0 }
 0x456   : > { %v5926_v60 = vmax.f32 %v5910_v59, 0.0 }
 0x457   : > { %v5924_v57 = vmax.f32 %v5908_v38, 0.0 }
 0x458   : > { %v7383_v56 = vpop.f32.mrb[152].mxu0  ;;  %v5938_v32 = vpack.c.bf16 %v5926_v60, %v5925_v61 }
 0x459   : > { %v5890_v48 = vadd.f32 %v7383_v56, %v10436_v33  ;;  %v5849_v27 = vpop.f32.mrb[153].mxu0  ;;  %v5937_v8 = vpack.c.bf16 %v5924_v57, %v5923_v6 }
 0x45a   : > { %v5888_v16 = vadd.f32 %v5849_v27, %v10428_v42  ;;  %v7384_v55 = vpop.f32.mrb[154].mxu0 }
 0x45b   : > { %v5913_v62 = vadd.f32 %v10565_v10, %v5890_v48  ;;  %v5891_v17 = vadd.f32 %v7384_v55, %v10438_v24  ;;  %v5852_v28 = vpop.f32.mrb[155].mxu0  ;;  %7409 = vmatprep.mubr.bf16.mxu1 %v5937_v8 }
 0x45c   : > { %v5911_v44 = vadd.f32 %v10565_v10, %v5888_v16  ;;  %v5889_v14 = vadd.f32 %v5852_v28, %v10430_v1  ;;  %7410 = vmatmul.mubr.bf16.gmra.mrb[148].mxu1 %v5938_v32 }
 0x45d   : > { %v5914_v22 = vadd.f32 %v10565_v10, %v5891_v17  ;;  %v5929_v29 = vmax.f32 %v5913_v62, 0.0 }
 0x45e   : > { %v5912_v33 = vadd.f32 %v10565_v10, %v5889_v14  ;;  %v5927_v42 = vmax.f32 %v5911_v44, 0.0 }
 0x45f   : > { %v5930_v11 = vmax.f32 %v5914_v22, 0.0 }
 0x460   : > { %v5928_v51 = vmax.f32 %v5912_v33, 0.0 }
 0x461   : > { %v5940_v30 = vpack.c.bf16 %v5930_v11, %v5929_v29 }
 0x462   : > { %v5939_v39 = vpack.c.bf16 %v5928_v51, %v5927_v42 }
 0x464   : > { %7413 = vmatprep.mubr.bf16.mxu1 %v5939_v39 }
 0x465   : > { %7414 = vmatmul.mubr.bf16.gmra.mrb[152].mxu1 %v5940_v30 }
 0x47c   : > { %v7387_v24 = vpop.f32.mrb[156].mxu0 }
 0x47d   : > { %v5894_v36 = vadd.f32 %v7387_v24, %v10457_v0  ;;  %v5865_v43 = vpop.f32.mrb[157].mxu0 }
 0x47e   : > { %v5892_v1 = vadd.f32 %v5865_v43, %v10444_v21  ;;  %v7388_v63 = vpop.f32.mrb[158].mxu0 }
 0x47f   : > { %v5917_v35 = vadd.f32 %v10565_v10, %v5894_v36  ;;  %v5895_v31 = vadd.f32 %v7388_v63, %v10459_v49  ;;  %v5868_v45 = vpop.f32.mrb[159].mxu0  ;;  %v6665_v49 = vld [vmem:[%s10681_s9] ss:$0 sm:$0xff] }
 0x480   : > { %v5915_v34 = vadd.f32 %v10565_v10, %v5892_v1  ;;  %v5893_v58 = vadd.f32 %v5868_v45, %v10446_v13 }
 0x481   : > { %v5918_v5 = vadd.f32 %v10565_v10, %v5895_v31  ;;  %v5933_v52 = vmax.f32 %v5917_v35, 0.0 }
 0x482   : > { %v5916_v20 = vadd.f32 %v10565_v10, %v5893_v58  ;;  %v5931_v7 = vmax.f32 %v5915_v34, 0.0 }
 0x483   : > { %v5934_v0 = vmax.f32 %v5918_v5, 0.0 }
 0x484   : > { %v5932_v53 = vmax.f32 %v5916_v20, 0.0 }
 0x485   : > { %v5942_v21 = vpack.c.bf16 %v5934_v0, %v5933_v52 }
 0x486   : > { %v5941_v25 = vpack.c.bf16 %v5932_v53, %v5931_v7 }
 0x488   : > { %7417 = vmatprep.mubr.bf16.mxu1 %v5941_v25 }
 0x489   : > { %7418 = vmatmul.mubr.bf16.gmra.mrb[156].mxu1 %v5942_v21 }
 0x525   : > { %v7407_v3 = vpop.f32.mrb[144].mxu1 }
 0x526   : > { %v6057_v12 = vadd.f32 %v7407_v3, %v6665_v49  ;;  %v6048_v13 = vpop.f32.mrb[145].mxu1 }
 0x527   : > { %v6049_v18 = vadd.f32 %v6665_v49, %v6048_v13  ;;  %v7408_v9 = vpop.f32.mrb[146].mxu1 }
 0x528   : > { %v6113_v26 = vmax.f32 %v6057_v12, 0.0  ;;  %v6060_v10 = vadd.f32 %v7408_v9, %v6665_v49  ;;  %v6051_v4 = vpop.f32.mrb[147].mxu1 }
 0x529   : > { %v6111_v54 = vmax.f32 %v6049_v18, 0.0  ;;  %v6052_v2 = vadd.f32 %v6665_v49, %v6051_v4 }
 0x52a   : > { %6129 = vst [vmem:[%s10603_s11 + $0x10] sm:$0xff] %v6113_v26  ;;  %v6114_v47 = vmax.f32 %v6060_v10, 0.0 }
 0x52b   : > { %6127 = vst [vmem:[%s10603_s11] sm:$0xff] %v6111_v54  ;;  %v6112_v50 = vmax.f32 %v6052_v2, 0.0 }
 0x52c   : > { %6130 = vst [vmem:[%s10603_s11 + $0x18] sm:$0xff] %v6114_v47 }
 0x52d   : > { %6128 = vst [vmem:[%s10603_s11 + $0x8] sm:$0xff] %v6112_v50 }
 0x52f   : > { %v7411_v19 = vpop.f32.mrb[148].mxu1 }
 0x530   : > { %v6073_v23 = vadd.f32 %v7411_v19, %v6665_v49  ;;  %v6064_v40 = vpop.f32.mrb[149].mxu1 }
 0x531   : > { %v6065_v46 = vadd.f32 %v6665_v49, %v6064_v40  ;;  %v7412_v37 = vpop.f32.mrb[150].mxu1 }
 0x532   : > { %v6117_v41 = vmax.f32 %v6073_v23, 0.0  ;;  %v6076_v15 = vadd.f32 %v7412_v37, %v6665_v49  ;;  %v6067_v59 = vpop.f32.mrb[151].mxu1 }
 0x533   : > { %v6115_v38 = vmax.f32 %v6065_v46, 0.0  ;;  %v6068_v61 = vadd.f32 %v6665_v49, %v6067_v59 }
 0x534   : > { %6133 = vst [vmem:[%s10603_s11 + $0x30] sm:$0xff] %v6117_v41  ;;  %v6118_v60 = vmax.f32 %v6076_v15, 0.0 }
 0x535   : > { %6131 = vst [vmem:[%s10603_s11 + $0x20] sm:$0xff] %v6115_v38  ;;  %v6116_v6 = vmax.f32 %v6068_v61, 0.0 }
 0x536   : > { %6134 = vst [vmem:[%s10603_s11 + $0x38] sm:$0xff] %v6118_v60 }
 0x537   : > { %6132 = vst [vmem:[%s10603_s11 + $0x28] sm:$0xff] %v6116_v6 }
 0x538   : > { %v7415_v57 = vpop.f32.mrb[152].mxu1 }
 0x539   : > { %v6089_v56 = vadd.f32 %v7415_v57, %v6665_v49  ;;  %v6080_v48 = vpop.f32.mrb[153].mxu1 }
 0x53a   : > { %v6081_v27 = vadd.f32 %v6665_v49, %v6080_v48  ;;  %v7416_v32 = vpop.f32.mrb[154].mxu1 }
 0x53b   : > { %v6121_v16 = vmax.f32 %v6089_v56, 0.0  ;;  %v6092_v55 = vadd.f32 %v7416_v32, %v6665_v49  ;;  %v6083_v8 = vpop.f32.mrb[155].mxu1 }
 0x53c   : > { %v6119_v62 = vmax.f32 %v6081_v27, 0.0  ;;  %v6084_v17 = vadd.f32 %v6665_v49, %v6083_v8 }
 0x53d   : > { %6137 = vst [vmem:[%s10603_s11 + $0x50] sm:$0xff] %v6121_v16  ;;  %v6122_v28 = vmax.f32 %v6092_v55, 0.0 }
 0x53e   : > { %6135 = vst [vmem:[%s10603_s11 + $0x40] sm:$0xff] %v6119_v62  ;;  %v6120_v44 = vmax.f32 %v6084_v17, 0.0 }
 0x53f   : > { %6138 = vst [vmem:[%s10603_s11 + $0x58] sm:$0xff] %v6122_v28 }
 0x540   : > { %6136 = vst [vmem:[%s10603_s11 + $0x48] sm:$0xff] %v6120_v44 }
 0x55c   : > { %v7419_v14 = vpop.f32.mrb[156].mxu1 }
 0x55d   : > { %v6105_v22 = vadd.f32 %v7419_v14, %v6665_v49  ;;  %v6096_v33 = vpop.f32.mrb[157].mxu1 }
 0x55e   : > { %v6097_v29 = vadd.f32 %v6665_v49, %v6096_v33  ;;  %v7420_v11 = vpop.f32.mrb[158].mxu1 }
 0x55f   : > { %v6125_v42 = vmax.f32 %v6105_v22, 0.0  ;;  %v6108_v51 = vadd.f32 %v7420_v11, %v6665_v49  ;;  %v6099_v30 = vpop.f32.mrb[159].mxu1 }
 0x560   : > { %v6123_v39 = vmax.f32 %v6097_v29, 0.0  ;;  %v6100_v24 = vadd.f32 %v6665_v49, %v6099_v30 }
 0x561   : > { %6141 = vst [vmem:[%s10603_s11 + $0x70] sm:$0xff] %v6125_v42  ;;  %v6126_v36 = vmax.f32 %v6108_v51, 0.0 }
 0x562   : > { %6139 = vst [vmem:[%s10603_s11 + $0x60] sm:$0xff] %v6123_v39  ;;  %v6124_v43 = vmax.f32 %v6100_v24, 0.0 }
 0x563   : > { %6142 = vst [vmem:[%s10603_s11 + $0x78] sm:$0xff] %v6126_v36 }
 0x564   : > { %6140 = vst [vmem:[%s10603_s11 + $0x68] sm:$0xff] %v6124_v43 }
 0x565   : > { %7948 = shalt.err (!%p7945_p1)
}
 0x566   : > { %s7949_s20 = scalar_lea.hbm %s10623_s27, 2048  ;;  %s7953_s30 = scalar_lea.hbm %s10682_s10, 4096 }
 0x567   : > { %p7950_p4 = scmp.ne.s32.totalorder %s10623_s27, %s7949_s20  ;;  %p7954_p11 = scmp.lt.u32.totalorder %s10623_s27, %s10682_s10 }
 0x568   : > { %p7955_p12 = scmp.lt.u32.totalorder %s7953_s30, %s7949_s20  ;;  %p7957_p3 = scmp.lt.u32.totalorder %s7949_s20, %s10623_s27 }
 0x569   : > { %p7951_p5 = pnand %p7950_p4, %p11395_p2 }
 0x56a   : > { %p7956_p13 = por %p7955_p12, %p7954_p11 }
 0x56b   : > { %p7952_p6 = pneg %p7951_p5 }
 0x56c   : > { %p7958_p7 = por %p7957_p3, %p7956_p13 }
 0x56e   : > { %p7959_p8 = pnand %p7958_p7, %p7952_p6 }
 0x570   : > { %7962 = shalt.err (!%p7959_p8)
}
 0x571   : > { %s8017_s11 = smov 128   ;;  %s8018_s15 = smov 8  }
 0x572   : > { %7466 = dma.vmem_to_hbm [thread:$0]  (%p11395_p2), %s10625_s16, 2048, %s10623_s27, %s6144_s17, %s8017_s11, %s8017_s11, %s8018_s15  }
 0x573 PF: > { %s11396_s23 = sld [smem:[#allocation21_spill]]  ;;  %s6172_s19 = sand.u32 1, %s7993_s13  }
 0x574   : > { %s6173_s26 = scalar_lea.sflag [#allocation7], %s6172_s19 }
 0x579   : > { %p11398_p9 = scmp.ne.s32.totalorder %s11396_s23, 0 }
 0x57b   : > { %p7473_p10 = pnand %p6243_p0, %p11398_p9 }
 0x57d   : > { %7988 = dma.done.wait (!%p7473_p10), %s6173_s26, 2048  }
 0x57e   : > { %7990 = vsyncadd (!%p7473_p10), %s6173_s26, 4294965248  ;;  %s11399_s16 = sld [smem:[#allocation19_spill]]  ;;  %s11400_s29 = sld [smem:[#allocation17_spill]] }
 0x57f   : > { %s11401_s15 = sld [smem:[#allocation20_spill]]  ;;  %s11402_s13 = smov %s7997_s14 }
 0x584   : > { %p24_p1 = scmp.ge.s32.totalorder %s11399_s16, 4   ;;  %s11403_s14 = smov %s11400_s29 }
 0x586   :  { %26 = sbr.rel (!%p24_p1) target bundleno = 8 (0x8), region = 129 }
 0x58d   :  { %6178 = vsyncpa [#allocation6], 1 }
 0x58e   :  { %6180 = vsyncpa [#allocation6 + $0x1], 1 }
 0x58f   :  { %6181 = vsyncpa [#allocation9], 1 }
 0x590   :  { %6182 = vsyncpa [#allocation7], 1 }
 0x591   :  { %6184 = vsyncpa [#allocation7 + $0x1], 1 }

</bundles_post_ra>
